<compile_context>
chip_gen: v6e
topology: v6e:2x2x1
jax: 0.10.0
libtpu: 0.0.40
codegen_flags: <defaults>
</compile_context>

<pallas_src>
import functools

import jax
import jax.numpy as jnp
from jax import lax
from jax.experimental import pallas as pl
from jax.experimental.pallas import tpu as pltpu

HIDDEN = 64                      # module hidden_size default
HP = 128                         # hidden padded to one full vreg lane width
BITS = (2, 3, 4, 5, 6, 7, 8)     # module bits default
NBITS = len(BITS)                # 7
BATCH = 1                        # module batch_size default


def _sigmoid(v):
    return 1.0 / (1.0 + jnp.exp(-v))


def _controller_kernel(n_layers,
                       gumbel_ref, emb_ref, w_ref, b_ref, wout_ref, bout_ref,
                       probs_ref, act_ref, logp_ref, ent_ref):
    # Load all parameters once; they stay resident in vregs for the whole recurrence.
    emb = emb_ref[...]          # (NBITS, HP)   embedding table (hidden zero-padded)
    w = w_ref[...]              # (2*HP, 4*HP)  fused, pre-transposed [W_ih^T ; W_hh^T]
    b = b_ref[...]              # (1, 4*HP)     b_ih + b_hh (padded lanes = 0)
    wout = wout_ref[...]        # (HP, NBITS)   head weight, pre-transposed
    bout = bout_ref[...]        # (1, NBITS)

    h = jnp.zeros((BATCH, HP), jnp.float32)
    c = jnp.zeros((BATCH, HP), jnp.float32)
    x = jnp.zeros((BATCH, HP), jnp.float32)      # embed input

    lane = lax.broadcasted_iota(jnp.int32, (BATCH, NBITS), 1)   # (1, NBITS)
    sub = lax.broadcasted_iota(jnp.int32, (NBITS, 1), 0)        # (NBITS, 1)

    logp_sum = jnp.zeros((1, 1), jnp.float32)
    ent_sum = jnp.zeros((1, 1), jnp.float32)

    # n_layers is static -> fully unrolled serial recurrence.
    for l in range(n_layers):
        # ---- LSTMCell: single fused gate matmul (PyTorch gate order i, f, g, o) ----
        xh = jnp.concatenate([x, h], axis=1)                                  # (1, 2*HP)
        gates = jnp.dot(xh, w, preferred_element_type=jnp.float32) + b        # (1, 4*HP)
        i_g = _sigmoid(gates[:, 0 * HP:1 * HP])
        f_g = _sigmoid(gates[:, 1 * HP:2 * HP])
        g_g = jnp.tanh(gates[:, 2 * HP:3 * HP])
        o_g = _sigmoid(gates[:, 3 * HP:4 * HP])
        c = f_g * c + i_g * g_g
        h = o_g * jnp.tanh(c)

        # ---- linear head + softmax / log-softmax ----
        logits = jnp.dot(h, wout, preferred_element_type=jnp.float32) + bout  # (1, NBITS)
        m = jnp.max(logits, axis=-1, keepdims=True)
        e = jnp.exp(logits - m)
        z = jnp.sum(e, axis=-1, keepdims=True)
        probs = e / z
        log_probs = (logits - m) - jnp.log(z)

        # ---- Categorical sample via Gumbel-max (pure VPU; noise precomputed) ----
        # TODO(synk): reproduces the Categorical distribution, not torch's exact RNG stream.
        y = log_probs + gumbel_ref[l:l + 1, :]
        ymax = jnp.max(y, axis=-1, keepdims=True)
        act = jnp.min(jnp.where(y == ymax, lane, NBITS), axis=-1, keepdims=True)  # (1,1) int32

        onehot = (lane == act).astype(jnp.float32)                            # (1, NBITS)
        logp_sum = logp_sum + jnp.sum(onehot * log_probs, axis=-1, keepdims=True)
        ent_sum = ent_sum - jnp.sum(probs * log_probs, axis=-1, keepdims=True)

        probs_ref[l:l + 1, :] = probs
        act_ref[l:l + 1, :] = act

        # ---- embedding lookup on the VPU: broadcast-multiply + sublane reduce ----
        x = jnp.sum((sub == act).astype(jnp.float32) * emb, axis=0, keepdims=True)  # (1, HP)

    logp_ref[...] = logp_sum
    ent_ref[...] = ent_sum


@functools.partial(jax.jit, static_argnames=("n_layers",))
def wabe_controller_forward(params, key, *, n_layers):
    emb_p, w_fused, b_fused, wout_p, bout = params
    # Pre-generate all sampling noise once (Gumbel-max); nothing PRNG-related in-kernel.
    gumbel = jax.random.gumbel(key, (n_layers, NBITS), jnp.float32)

    vmem = pl.BlockSpec(memory_space=pltpu.MemorySpace.VMEM)
    out_shape = (
        jax.ShapeDtypeStruct((n_layers, NBITS), jnp.float32),   # per-layer probs
        jax.ShapeDtypeStruct((n_layers, 1), jnp.int32),         # sampled action index
        jax.ShapeDtypeStruct((1, 1), jnp.float32),              # sum log-prob
        jax.ShapeDtypeStruct((1, 1), jnp.float32),              # sum entropy
    )
    probs, actions, logp_sum, ent_sum = pl.pallas_call(
        functools.partial(_controller_kernel, n_layers),
        out_shape=out_shape,
        in_specs=[vmem, vmem, vmem, vmem, vmem, vmem],
        out_specs=(vmem, vmem, vmem, vmem),
    )(gumbel, emb_p, w_fused, b_fused, wout_p, bout)
    return (actions.reshape(n_layers), probs,
            logp_sum.reshape(BATCH), ent_sum.reshape(BATCH))


def init_params(key, init_range=0.1):
    """Deterministic uniform(-0.1, 0.1) init matching reset_parameters(), then padded/fused."""
    ks = jax.random.split(key, 7)
    u = lambda k, shp: jax.random.uniform(k, shp, jnp.float32, -init_range, init_range)
    emb = u(ks[0], (NBITS, HIDDEN))           # nn.Embedding(len(bits), hidden)
    w_ih = u(ks[1], (4 * HIDDEN, HIDDEN))     # LSTMCell.weight_ih
    w_hh = u(ks[2], (4 * HIDDEN, HIDDEN))     # LSTMCell.weight_hh
    b_ih = u(ks[3], (4 * HIDDEN,))
    b_hh = u(ks[4], (4 * HIDDEN,))
    w_out = u(ks[5], (NBITS, HIDDEN))         # Linear.weight
    b_out = u(ks[6], (NBITS,))

    # Pad hidden 64 -> 128 (zero padding keeps the math exact: padded gate lanes are 0,
    # so padded c/h lanes stay 0) and fuse [x | h] @ [W_ih^T ; W_hh^T] into one matmul.
    emb_p = jnp.zeros((NBITS, HP), jnp.float32).at[:, :HIDDEN].set(emb)
    w_fused = jnp.zeros((2 * HP, 4 * HP), jnp.float32)
    b_fused = jnp.zeros((1, 4 * HP), jnp.float32)
    bias = b_ih + b_hh
    for g in range(4):          # PyTorch gate order i, f, g, o
        w_fused = w_fused.at[:HIDDEN, g * HP:g * HP + HIDDEN].set(
            w_ih[g * HIDDEN:(g + 1) * HIDDEN, :].T)
        w_fused = w_fused.at[HP:HP + HIDDEN, g * HP:g * HP + HIDDEN].set(
            w_hh[g * HIDDEN:(g + 1) * HIDDEN, :].T)
        b_fused = b_fused.at[0, g * HP:g * HP + HIDDEN].set(bias[g * HIDDEN:(g + 1) * HIDDEN])
    wout_p = jnp.zeros((HP, NBITS), jnp.float32).at[:HIDDEN, :].set(w_out.T)
    bout = b_out.reshape(1, NBITS)
    return (emb_p, w_fused, b_fused, wout_p, bout)


if __name__ == "__main__":
    n_layers = 6
    params = init_params(jax.random.PRNGKey(0))
    sample_key = jax.random.PRNGKey(1)

    actions, probs, logp_sum, ent_sum = wabe_controller_forward(
        params, sample_key, n_layers=n_layers)
    jax.block_until_ready((actions, probs, logp_sum, ent_sum))

    # Mirror the PyTorch return structure: (bits_seq, probs_buf, sum(logp), sum(entropy))
    bits_seq = [BITS[int(a)] for a in actions]
    probs_buf = [probs[i:i + 1, :] for i in range(n_layers)]

    assert len(bits_seq) == n_layers
    assert all(p.shape == (BATCH, NBITS) for p in probs_buf)
    assert bool(jnp.all(jnp.abs(jnp.sum(probs, axis=1) - 1.0) < 1e-4))
    assert logp_sum.shape == (BATCH,) and ent_sum.shape == (BATCH,)
    assert bool(jnp.isfinite(logp_sum).all() and jnp.isfinite(ent_sum).all())
    assert all(b in BITS for b in bits_seq)

    print("KERNEL_OK")
</pallas_src>

<mosaic_0001>
module attributes {stable_mosaic.version = 11 : i64} {
  func.func @_controller_kernel(%arg0: memref<6x7xf32, #tpu.memory_space<vmem>>, %arg1: memref<7x128xf32, #tpu.memory_space<vmem>>, %arg2: memref<256x512xf32, #tpu.memory_space<vmem>>, %arg3: memref<1x512xf32, #tpu.memory_space<vmem>>, %arg4: memref<128x7xf32, #tpu.memory_space<vmem>>, %arg5: memref<1x7xf32, #tpu.memory_space<vmem>>, %arg6: memref<6x7xf32, #tpu.memory_space<vmem>>, %arg7: memref<6x1xi32, #tpu.memory_space<vmem>>, %arg8: memref<1x1xf32, #tpu.memory_space<vmem>>, %arg9: memref<1x1xf32, #tpu.memory_space<vmem>>) attributes {dimension_semantics = [], scalar_prefetch = 0 : i64, scratch_operands = 0 : i64, tpu.core_type = #tpu.core_type<tc>} {
    %c0 = arith.constant 0 : index
    %c0_0 = arith.constant 0 : index
    %0 = vector.load %arg1[%c0, %c0_0] : memref<7x128xf32, #tpu.memory_space<vmem>>, vector<7x128xf32>
    %c0_1 = arith.constant 0 : index
    %c0_2 = arith.constant 0 : index
    %1 = vector.load %arg2[%c0_1, %c0_2] : memref<256x512xf32, #tpu.memory_space<vmem>>, vector<256x512xf32>
    %c0_3 = arith.constant 0 : index
    %c0_4 = arith.constant 0 : index
    %2 = vector.load %arg3[%c0_3, %c0_4] : memref<1x512xf32, #tpu.memory_space<vmem>>, vector<1x512xf32>
    %c0_5 = arith.constant 0 : index
    %c0_6 = arith.constant 0 : index
    %3 = vector.load %arg4[%c0_5, %c0_6] : memref<128x7xf32, #tpu.memory_space<vmem>>, vector<128x7xf32>
    %c0_7 = arith.constant 0 : index
    %c0_8 = arith.constant 0 : index
    %4 = vector.load %arg5[%c0_7, %c0_8] : memref<1x7xf32, #tpu.memory_space<vmem>>, vector<1x7xf32>
    %cst = arith.constant 0.000000e+00 : f32
    %5 = vector.broadcast %cst : f32 to vector<1x128xf32>
    %cst_9 = arith.constant 0.000000e+00 : f32
    %6 = vector.broadcast %cst_9 : f32 to vector<1x128xf32>
    %cst_10 = arith.constant 0.000000e+00 : f32
    %7 = vector.broadcast %cst_10 : f32 to vector<1x128xf32>
    %8 = tpu.iota {dimensions = array<i32: 1>} : vector<1x7xi32>
    %9 = tpu.iota {dimensions = array<i32: 0>} : vector<7x1xi32>
    %cst_11 = arith.constant 0.000000e+00 : f32
    %10 = vector.broadcast %cst_11 : f32 to vector<1x1xf32>
    %cst_12 = arith.constant 0.000000e+00 : f32
    %11 = vector.broadcast %cst_12 : f32 to vector<1x1xf32>
    %12 = tpu.concatenate %7, %5 in 1 : vector<1x128xf32>, vector<1x128xf32> -> vector<1x256xf32>
    %cst_13 = arith.constant dense<0.000000e+00> : vector<1x512xf32>
    %13 = tpu.matmul %12, %1, %cst_13 {dimension_numbers = #tpu.dot_dimension_numbers<[1], [0], [0], [1], [0, 0, 1, 1], [], []>} : vector<1x256xf32>, vector<256x512xf32>, vector<1x512xf32> -> vector<1x512xf32>
    %14 = arith.addf %13, %2 : vector<1x512xf32>
    %15 = vector.extract_strided_slice %14 {offsets = [0, 0], sizes = [1, 128], strides = [1, 1]} : vector<1x512xf32> to vector<1x128xf32>
    %cst_14 = arith.constant 0.000000e+00 : f32
    %16 = vector.broadcast %cst_14 : f32 to vector<1x128xf32>
    %17 = arith.subf %16, %15 : vector<1x128xf32>
    %18 = math.exp %17 : vector<1x128xf32>
    %cst_15 = arith.constant 1.000000e+00 : f32
    %19 = vector.broadcast %cst_15 : f32 to vector<1x128xf32>
    %20 = arith.addf %19, %18 : vector<1x128xf32>
    %cst_16 = arith.constant 1.000000e+00 : f32
    %21 = vector.broadcast %cst_16 : f32 to vector<1x128xf32>
    %22 = arith.divf %21, %20 : vector<1x128xf32>
    %23 = vector.extract_strided_slice %14 {offsets = [0, 128], sizes = [1, 128], strides = [1, 1]} : vector<1x512xf32> to vector<1x128xf32>
    %cst_17 = arith.constant 0.000000e+00 : f32
    %24 = vector.broadcast %cst_17 : f32 to vector<1x128xf32>
    %25 = arith.subf %24, %23 : vector<1x128xf32>
    %26 = math.exp %25 : vector<1x128xf32>
    %cst_18 = arith.constant 1.000000e+00 : f32
    %27 = vector.broadcast %cst_18 : f32 to vector<1x128xf32>
    %28 = arith.addf %27, %26 : vector<1x128xf32>
    %cst_19 = arith.constant 1.000000e+00 : f32
    %29 = vector.broadcast %cst_19 : f32 to vector<1x128xf32>
    %30 = arith.divf %29, %28 : vector<1x128xf32>
    %31 = vector.extract_strided_slice %14 {offsets = [0, 256], sizes = [1, 128], strides = [1, 1]} : vector<1x512xf32> to vector<1x128xf32>
    %32 = math.tanh %31 : vector<1x128xf32>
    %33 = vector.extract_strided_slice %14 {offsets = [0, 384], sizes = [1, 128], strides = [1, 1]} : vector<1x512xf32> to vector<1x128xf32>
    %cst_20 = arith.constant 0.000000e+00 : f32
    %34 = vector.broadcast %cst_20 : f32 to vector<1x128xf32>
    %35 = arith.subf %34, %33 : vector<1x128xf32>
    %36 = math.exp %35 : vector<1x128xf32>
    %cst_21 = arith.constant 1.000000e+00 : f32
    %37 = vector.broadcast %cst_21 : f32 to vector<1x128xf32>
    %38 = arith.addf %37, %36 : vector<1x128xf32>
    %cst_22 = arith.constant 1.000000e+00 : f32
    %39 = vector.broadcast %cst_22 : f32 to vector<1x128xf32>
    %40 = arith.divf %39, %38 : vector<1x128xf32>
    %41 = arith.mulf %30, %6 : vector<1x128xf32>
    %42 = arith.mulf %22, %32 : vector<1x128xf32>
    %43 = arith.addf %41, %42 : vector<1x128xf32>
    %44 = math.tanh %43 : vector<1x128xf32>
    %45 = arith.mulf %40, %44 : vector<1x128xf32>
    %cst_23 = arith.constant dense<0.000000e+00> : vector<1x7xf32>
    %46 = tpu.matmul %45, %3, %cst_23 {dimension_numbers = #tpu.dot_dimension_numbers<[1], [0], [0], [1], [0, 0, 1, 1], [], []>} : vector<1x128xf32>, vector<128x7xf32>, vector<1x7xf32> -> vector<1x7xf32>
    %47 = arith.addf %46, %4 : vector<1x7xf32>
    %cst_24 = arith.constant dense<0xFF800000> : vector<1xf32>
    %48 = vector.multi_reduction <maximumf>, %47, %cst_24 [1] : vector<1x7xf32> to vector<1xf32>
    %49 = vector.shape_cast %48 : vector<1xf32> to vector<1x1xf32>
    %50 = vector.broadcast %49 : vector<1x1xf32> to vector<1x7xf32>
    %51 = arith.subf %47, %50 : vector<1x7xf32>
    %52 = math.exp %51 : vector<1x7xf32>
    %cst_25 = arith.constant dense<0.000000e+00> : vector<1xf32>
    %53 = vector.multi_reduction <add>, %52, %cst_25 [1] : vector<1x7xf32> to vector<1xf32>
    %54 = vector.shape_cast %53 : vector<1xf32> to vector<1x1xf32>
    %55 = vector.broadcast %54 : vector<1x1xf32> to vector<1x7xf32>
    %56 = arith.divf %52, %55 : vector<1x7xf32>
    %57 = vector.broadcast %49 : vector<1x1xf32> to vector<1x7xf32>
    %58 = arith.subf %47, %57 : vector<1x7xf32>
    %59 = math.log %54 : vector<1x1xf32>
    %60 = vector.broadcast %59 : vector<1x1xf32> to vector<1x7xf32>
    %61 = arith.subf %58, %60 : vector<1x7xf32>
    %c0_26 = arith.constant 0 : index
    %c0_27 = arith.constant 0 : index
    %62 = vector.load %arg0[%c0_26, %c0_27] : memref<6x7xf32, #tpu.memory_space<vmem>>, vector<1x7xf32>
    %63 = arith.addf %61, %62 : vector<1x7xf32>
    %cst_28 = arith.constant dense<0xFF800000> : vector<1xf32>
    %64 = vector.multi_reduction <maximumf>, %63, %cst_28 [1] : vector<1x7xf32> to vector<1xf32>
    %65 = vector.shape_cast %64 : vector<1xf32> to vector<1x1xf32>
    %66 = vector.broadcast %65 : vector<1x1xf32> to vector<1x7xf32>
    %67 = arith.cmpf oeq, %63, %66 : vector<1x7xf32>
    %c7_i32 = arith.constant 7 : i32
    %68 = vector.broadcast %c7_i32 : i32 to vector<1x7xi32>
    %69 = arith.select %67, %8, %68 : vector<1x7xi1>, vector<1x7xi32>
    %cst_29 = arith.constant dense<2147483647> : vector<1xi32>
    %70 = vector.multi_reduction <minsi>, %69, %cst_29 [1] : vector<1x7xi32> to vector<1xi32>
    %71 = vector.shape_cast %70 : vector<1xi32> to vector<1x1xi32>
    %72 = vector.broadcast %71 : vector<1x1xi32> to vector<1x7xi32>
    %73 = arith.cmpi eq, %8, %72 : vector<1x7xi32>
    %74 = arith.extui %73 : vector<1x7xi1> to vector<1x7xi32>
    %75 = arith.sitofp %74 : vector<1x7xi32> to vector<1x7xf32>
    %76 = arith.mulf %75, %61 : vector<1x7xf32>
    %cst_30 = arith.constant dense<0.000000e+00> : vector<1xf32>
    %77 = vector.multi_reduction <add>, %76, %cst_30 [1] : vector<1x7xf32> to vector<1xf32>
    %78 = vector.shape_cast %77 : vector<1xf32> to vector<1x1xf32>
    %79 = arith.addf %10, %78 : vector<1x1xf32>
    %80 = arith.mulf %56, %61 : vector<1x7xf32>
    %cst_31 = arith.constant dense<0.000000e+00> : vector<1xf32>
    %81 = vector.multi_reduction <add>, %80, %cst_31 [1] : vector<1x7xf32> to vector<1xf32>
    %82 = vector.shape_cast %81 : vector<1xf32> to vector<1x1xf32>
    %83 = arith.subf %11, %82 : vector<1x1xf32>
    %c0_32 = arith.constant 0 : index
    %c0_33 = arith.constant 0 : index
    %84 = vector.load %arg6[%c0_32, %c0_33] : memref<6x7xf32, #tpu.memory_space<vmem>>, vector<1x7xf32>
    tpu.vector_store %arg6[%c0_32, %c0_33], %56 {strides = array<i32>} : memref<6x7xf32, #tpu.memory_space<vmem>>, vector<1x7xf32>,
    %c0_34 = arith.constant 0 : index
    %c0_35 = arith.constant 0 : index
    %85 = vector.load %arg7[%c0_34, %c0_35] : memref<6x1xi32, #tpu.memory_space<vmem>>, vector<1x1xi32>
    tpu.vector_store %arg7[%c0_34, %c0_35], %71 {strides = array<i32>} : memref<6x1xi32, #tpu.memory_space<vmem>>, vector<1x1xi32>,
    %86 = vector.broadcast %71 : vector<1x1xi32> to vector<7x1xi32>
    %87 = arith.cmpi eq, %9, %86 : vector<7x1xi32>
    %88 = arith.extui %87 : vector<7x1xi1> to vector<7x1xi32>
    %89 = arith.sitofp %88 : vector<7x1xi32> to vector<7x1xf32>
    %90 = vector.broadcast %89 : vector<7x1xf32> to vector<7x128xf32>
    %91 = arith.mulf %90, %0 : vector<7x128xf32>
    %cst_36 = arith.constant dense<0.000000e+00> : vector<128xf32>
    %92 = vector.multi_reduction <add>, %91, %cst_36 [0] : vector<7x128xf32> to vector<128xf32>
    %93 = vector.shape_cast %92 : vector<128xf32> to vector<1x128xf32>
    %94 = tpu.concatenate %93, %45 in 1 : vector<1x128xf32>, vector<1x128xf32> -> vector<1x256xf32>
    %cst_37 = arith.constant dense<0.000000e+00> : vector<1x512xf32>
    %95 = tpu.matmul %94, %1, %cst_37 {dimension_numbers = #tpu.dot_dimension_numbers<[1], [0], [0], [1], [0, 0, 1, 1], [], []>} : vector<1x256xf32>, vector<256x512xf32>, vector<1x512xf32> -> vector<1x512xf32>
    %96 = arith.addf %95, %2 : vector<1x512xf32>
    %97 = vector.extract_strided_slice %96 {offsets = [0, 0], sizes = [1, 128], strides = [1, 1]} : vector<1x512xf32> to vector<1x128xf32>
    %cst_38 = arith.constant 0.000000e+00 : f32
    %98 = vector.broadcast %cst_38 : f32 to vector<1x128xf32>
    %99 = arith.subf %98, %97 : vector<1x128xf32>
    %100 = math.exp %99 : vector<1x128xf32>
    %cst_39 = arith.constant 1.000000e+00 : f32
    %101 = vector.broadcast %cst_39 : f32 to vector<1x128xf32>
    %102 = arith.addf %101, %100 : vector<1x128xf32>
    %cst_40 = arith.constant 1.000000e+00 : f32
    %103 = vector.broadcast %cst_40 : f32 to vector<1x128xf32>
    %104 = arith.divf %103, %102 : vector<1x128xf32>
    %105 = vector.extract_strided_slice %96 {offsets = [0, 128], sizes = [1, 128], strides = [1, 1]} : vector<1x512xf32> to vector<1x128xf32>
    %cst_41 = arith.constant 0.000000e+00 : f32
    %106 = vector.broadcast %cst_41 : f32 to vector<1x128xf32>
    %107 = arith.subf %106, %105 : vector<1x128xf32>
    %108 = math.exp %107 : vector<1x128xf32>
    %cst_42 = arith.constant 1.000000e+00 : f32
    %109 = vector.broadcast %cst_42 : f32 to vector<1x128xf32>
    %110 = arith.addf %109, %108 : vector<1x128xf32>
    %cst_43 = arith.constant 1.000000e+00 : f32
    %111 = vector.broadcast %cst_43 : f32 to vector<1x128xf32>
    %112 = arith.divf %111, %110 : vector<1x128xf32>
    %113 = vector.extract_strided_slice %96 {offsets = [0, 256], sizes = [1, 128], strides = [1, 1]} : vector<1x512xf32> to vector<1x128xf32>
    %114 = math.tanh %113 : vector<1x128xf32>
    %115 = vector.extract_strided_slice %96 {offsets = [0, 384], sizes = [1, 128], strides = [1, 1]} : vector<1x512xf32> to vector<1x128xf32>
    %cst_44 = arith.constant 0.000000e+00 : f32
    %116 = vector.broadcast %cst_44 : f32 to vector<1x128xf32>
    %117 = arith.subf %116, %115 : vector<1x128xf32>
    %118 = math.exp %117 : vector<1x128xf32>
    %cst_45 = arith.constant 1.000000e+00 : f32
    %119 = vector.broadcast %cst_45 : f32 to vector<1x128xf32>
    %120 = arith.addf %119, %118 : vector<1x128xf32>
    %cst_46 = arith.constant 1.000000e+00 : f32
    %121 = vector.broadcast %cst_46 : f32 to vector<1x128xf32>
    %122 = arith.divf %121, %120 : vector<1x128xf32>
    %123 = arith.mulf %112, %43 : vector<1x128xf32>
    %124 = arith.mulf %104, %114 : vector<1x128xf32>
    %125 = arith.addf %123, %124 : vector<1x128xf32>
    %126 = math.tanh %125 : vector<1x128xf32>
    %127 = arith.mulf %122, %126 : vector<1x128xf32>
    %cst_47 = arith.constant dense<0.000000e+00> : vector<1x7xf32>
    %128 = tpu.matmul %127, %3, %cst_47 {dimension_numbers = #tpu.dot_dimension_numbers<[1], [0], [0], [1], [0, 0, 1, 1], [], []>} : vector<1x128xf32>, vector<128x7xf32>, vector<1x7xf32> -> vector<1x7xf32>
    %129 = arith.addf %128, %4 : vector<1x7xf32>
    %cst_48 = arith.constant dense<0xFF800000> : vector<1xf32>
    %130 = vector.multi_reduction <maximumf>, %129, %cst_48 [1] : vector<1x7xf32> to vector<1xf32>
    %131 = vector.shape_cast %130 : vector<1xf32> to vector<1x1xf32>
    %132 = vector.broadcast %131 : vector<1x1xf32> to vector<1x7xf32>
    %133 = arith.subf %129, %132 : vector<1x7xf32>
    %134 = math.exp %133 : vector<1x7xf32>
    %cst_49 = arith.constant dense<0.000000e+00> : vector<1xf32>
    %135 = vector.multi_reduction <add>, %134, %cst_49 [1] : vector<1x7xf32> to vector<1xf32>
    %136 = vector.shape_cast %135 : vector<1xf32> to vector<1x1xf32>
    %137 = vector.broadcast %136 : vector<1x1xf32> to vector<1x7xf32>
    %138 = arith.divf %134, %137 : vector<1x7xf32>
    %139 = vector.broadcast %131 : vector<1x1xf32> to vector<1x7xf32>
    %140 = arith.subf %129, %139 : vector<1x7xf32>
    %141 = math.log %136 : vector<1x1xf32>
    %142 = vector.broadcast %141 : vector<1x1xf32> to vector<1x7xf32>
    %143 = arith.subf %140, %142 : vector<1x7xf32>
    %c1 = arith.constant 1 : index
    %c0_50 = arith.constant 0 : index
    %144 = vector.load %arg0[%c1, %c0_50] : memref<6x7xf32, #tpu.memory_space<vmem>>, vector<1x7xf32>
    %145 = arith.addf %143, %144 : vector<1x7xf32>
    %cst_51 = arith.constant dense<0xFF800000> : vector<1xf32>
    %146 = vector.multi_reduction <maximumf>, %145, %cst_51 [1] : vector<1x7xf32> to vector<1xf32>
    %147 = vector.shape_cast %146 : vector<1xf32> to vector<1x1xf32>
    %148 = vector.broadcast %147 : vector<1x1xf32> to vector<1x7xf32>
    %149 = arith.cmpf oeq, %145, %148 : vector<1x7xf32>
    %c7_i32_52 = arith.constant 7 : i32
    %150 = vector.broadcast %c7_i32_52 : i32 to vector<1x7xi32>
    %151 = arith.select %149, %8, %150 : vector<1x7xi1>, vector<1x7xi32>
    %cst_53 = arith.constant dense<2147483647> : vector<1xi32>
    %152 = vector.multi_reduction <minsi>, %151, %cst_53 [1] : vector<1x7xi32> to vector<1xi32>
    %153 = vector.shape_cast %152 : vector<1xi32> to vector<1x1xi32>
    %154 = vector.broadcast %153 : vector<1x1xi32> to vector<1x7xi32>
    %155 = arith.cmpi eq, %8, %154 : vector<1x7xi32>
    %156 = arith.extui %155 : vector<1x7xi1> to vector<1x7xi32>
    %157 = arith.sitofp %156 : vector<1x7xi32> to vector<1x7xf32>
    %158 = arith.mulf %157, %143 : vector<1x7xf32>
    %cst_54 = arith.constant dense<0.000000e+00> : vector<1xf32>
    %159 = vector.multi_reduction <add>, %158, %cst_54 [1] : vector<1x7xf32> to vector<1xf32>
    %160 = vector.shape_cast %159 : vector<1xf32> to vector<1x1xf32>
    %161 = arith.addf %79, %160 : vector<1x1xf32>
    %162 = arith.mulf %138, %143 : vector<1x7xf32>
    %cst_55 = arith.constant dense<0.000000e+00> : vector<1xf32>
    %163 = vector.multi_reduction <add>, %162, %cst_55 [1] : vector<1x7xf32> to vector<1xf32>
    %164 = vector.shape_cast %163 : vector<1xf32> to vector<1x1xf32>
    %165 = arith.subf %83, %164 : vector<1x1xf32>
    %c1_56 = arith.constant 1 : index
    %c0_57 = arith.constant 0 : index
    %166 = vector.load %arg6[%c1_56, %c0_57] : memref<6x7xf32, #tpu.memory_space<vmem>>, vector<1x7xf32>
    tpu.vector_store %arg6[%c1_56, %c0_57], %138 {strides = array<i32>} : memref<6x7xf32, #tpu.memory_space<vmem>>, vector<1x7xf32>,
    %c1_58 = arith.constant 1 : index
    %c0_59 = arith.constant 0 : index
    %167 = vector.load %arg7[%c1_58, %c0_59] : memref<6x1xi32, #tpu.memory_space<vmem>>, vector<1x1xi32>
    tpu.vector_store %arg7[%c1_58, %c0_59], %153 {strides = array<i32>} : memref<6x1xi32, #tpu.memory_space<vmem>>, vector<1x1xi32>,
    %168 = vector.broadcast %153 : vector<1x1xi32> to vector<7x1xi32>
    %169 = arith.cmpi eq, %9, %168 : vector<7x1xi32>
    %170 = arith.extui %169 : vector<7x1xi1> to vector<7x1xi32>
    %171 = arith.sitofp %170 : vector<7x1xi32> to vector<7x1xf32>
    %172 = vector.broadcast %171 : vector<7x1xf32> to vector<7x128xf32>
    %173 = arith.mulf %172, %0 : vector<7x128xf32>
    %cst_60 = arith.constant dense<0.000000e+00> : vector<128xf32>
    %174 = vector.multi_reduction <add>, %173, %cst_60 [0] : vector<7x128xf32> to vector<128xf32>
    %175 = vector.shape_cast %174 : vector<128xf32> to vector<1x128xf32>
    %176 = tpu.concatenate %175, %127 in 1 : vector<1x128xf32>, vector<1x128xf32> -> vector<1x256xf32>
    %cst_61 = arith.constant dense<0.000000e+00> : vector<1x512xf32>
    %177 = tpu.matmul %176, %1, %cst_61 {dimension_numbers = #tpu.dot_dimension_numbers<[1], [0], [0], [1], [0, 0, 1, 1], [], []>} : vector<1x256xf32>, vector<256x512xf32>, vector<1x512xf32> -> vector<1x512xf32>
    %178 = arith.addf %177, %2 : vector<1x512xf32>
    %179 = vector.extract_strided_slice %178 {offsets = [0, 0], sizes = [1, 128], strides = [1, 1]} : vector<1x512xf32> to vector<1x128xf32>
    %cst_62 = arith.constant 0.000000e+00 : f32
    %180 = vector.broadcast %cst_62 : f32 to vector<1x128xf32>
    %181 = arith.subf %180, %179 : vector<1x128xf32>
    %182 = math.exp %181 : vector<1x128xf32>
    %cst_63 = arith.constant 1.000000e+00 : f32
    %183 = vector.broadcast %cst_63 : f32 to vector<1x128xf32>
    %184 = arith.addf %183, %182 : vector<1x128xf32>
    %cst_64 = arith.constant 1.000000e+00 : f32
    %185 = vector.broadcast %cst_64 : f32 to vector<1x128xf32>
    %186 = arith.divf %185, %184 : vector<1x128xf32>
    %187 = vector.extract_strided_slice %178 {offsets = [0, 128], sizes = [1, 128], strides = [1, 1]} : vector<1x512xf32> to vector<1x128xf32>
    %cst_65 = arith.constant 0.000000e+00 : f32
    %188 = vector.broadcast %cst_65 : f32 to vector<1x128xf32>
    %189 = arith.subf %188, %187 : vector<1x128xf32>
    %190 = math.exp %189 : vector<1x128xf32>
    %cst_66 = arith.constant 1.000000e+00 : f32
    %191 = vector.broadcast %cst_66 : f32 to vector<1x128xf32>
    %192 = arith.addf %191, %190 : vector<1x128xf32>
    %cst_67 = arith.constant 1.000000e+00 : f32
    %193 = vector.broadcast %cst_67 : f32 to vector<1x128xf32>
    %194 = arith.divf %193, %192 : vector<1x128xf32>
    %195 = vector.extract_strided_slice %178 {offsets = [0, 256], sizes = [1, 128], strides = [1, 1]} : vector<1x512xf32> to vector<1x128xf32>
    %196 = math.tanh %195 : vector<1x128xf32>
    %197 = vector.extract_strided_slice %178 {offsets = [0, 384], sizes = [1, 128], strides = [1, 1]} : vector<1x512xf32> to vector<1x128xf32>
    %cst_68 = arith.constant 0.000000e+00 : f32
    %198 = vector.broadcast %cst_68 : f32 to vector<1x128xf32>
    %199 = arith.subf %198, %197 : vector<1x128xf32>
    %200 = math.exp %199 : vector<1x128xf32>
    %cst_69 = arith.constant 1.000000e+00 : f32
    %201 = vector.broadcast %cst_69 : f32 to vector<1x128xf32>
    %202 = arith.addf %201, %200 : vector<1x128xf32>
    %cst_70 = arith.constant 1.000000e+00 : f32
    %203 = vector.broadcast %cst_70 : f32 to vector<1x128xf32>
    %204 = arith.divf %203, %202 : vector<1x128xf32>
    %205 = arith.mulf %194, %125 : vector<1x128xf32>
    %206 = arith.mulf %186, %196 : vector<1x128xf32>
    %207 = arith.addf %205, %206 : vector<1x128xf32>
    %208 = math.tanh %207 : vector<1x128xf32>
    %209 = arith.mulf %204, %208 : vector<1x128xf32>
    %cst_71 = arith.constant dense<0.000000e+00> : vector<1x7xf32>
    %210 = tpu.matmul %209, %3, %cst_71 {dimension_numbers = #tpu.dot_dimension_numbers<[1], [0], [0], [1], [0, 0, 1, 1], [], []>} : vector<1x128xf32>, vector<128x7xf32>, vector<1x7xf32> -> vector<1x7xf32>
    %211 = arith.addf %210, %4 : vector<1x7xf32>
    %cst_72 = arith.constant dense<0xFF800000> : vector<1xf32>
    %212 = vector.multi_reduction <maximumf>, %211, %cst_72 [1] : vector<1x7xf32> to vector<1xf32>
    %213 = vector.shape_cast %212 : vector<1xf32> to vector<1x1xf32>
    %214 = vector.broadcast %213 : vector<1x1xf32> to vector<1x7xf32>
    %215 = arith.subf %211, %214 : vector<1x7xf32>
    %216 = math.exp %215 : vector<1x7xf32>
    %cst_73 = arith.constant dense<0.000000e+00> : vector<1xf32>
    %217 = vector.multi_reduction <add>, %216, %cst_73 [1] : vector<1x7xf32> to vector<1xf32>
    %218 = vector.shape_cast %217 : vector<1xf32> to vector<1x1xf32>
    %219 = vector.broadcast %218 : vector<1x1xf32> to vector<1x7xf32>
    %220 = arith.divf %216, %219 : vector<1x7xf32>
    %221 = vector.broadcast %213 : vector<1x1xf32> to vector<1x7xf32>
    %222 = arith.subf %211, %221 : vector<1x7xf32>
    %223 = math.log %218 : vector<1x1xf32>
    %224 = vector.broadcast %223 : vector<1x1xf32> to vector<1x7xf32>
    %225 = arith.subf %222, %224 : vector<1x7xf32>
    %c2 = arith.constant 2 : index
    %c0_74 = arith.constant 0 : index
    %226 = vector.load %arg0[%c2, %c0_74] : memref<6x7xf32, #tpu.memory_space<vmem>>, vector<1x7xf32>
    %227 = arith.addf %225, %226 : vector<1x7xf32>
    %cst_75 = arith.constant dense<0xFF800000> : vector<1xf32>
    %228 = vector.multi_reduction <maximumf>, %227, %cst_75 [1] : vector<1x7xf32> to vector<1xf32>
    %229 = vector.shape_cast %228 : vector<1xf32> to vector<1x1xf32>
    %230 = vector.broadcast %229 : vector<1x1xf32> to vector<1x7xf32>
    %231 = arith.cmpf oeq, %227, %230 : vector<1x7xf32>
    %c7_i32_76 = arith.constant 7 : i32
    %232 = vector.broadcast %c7_i32_76 : i32 to vector<1x7xi32>
    %233 = arith.select %231, %8, %232 : vector<1x7xi1>, vector<1x7xi32>
    %cst_77 = arith.constant dense<2147483647> : vector<1xi32>
    %234 = vector.multi_reduction <minsi>, %233, %cst_77 [1] : vector<1x7xi32> to vector<1xi32>
    %235 = vector.shape_cast %234 : vector<1xi32> to vector<1x1xi32>
    %236 = vector.broadcast %235 : vector<1x1xi32> to vector<1x7xi32>
    %237 = arith.cmpi eq, %8, %236 : vector<1x7xi32>
    %238 = arith.extui %237 : vector<1x7xi1> to vector<1x7xi32>
    %239 = arith.sitofp %238 : vector<1x7xi32> to vector<1x7xf32>
    %240 = arith.mulf %239, %225 : vector<1x7xf32>
    %cst_78 = arith.constant dense<0.000000e+00> : vector<1xf32>
    %241 = vector.multi_reduction <add>, %240, %cst_78 [1] : vector<1x7xf32> to vector<1xf32>
    %242 = vector.shape_cast %241 : vector<1xf32> to vector<1x1xf32>
    %243 = arith.addf %161, %242 : vector<1x1xf32>
    %244 = arith.mulf %220, %225 : vector<1x7xf32>
    %cst_79 = arith.constant dense<0.000000e+00> : vector<1xf32>
    %245 = vector.multi_reduction <add>, %244, %cst_79 [1] : vector<1x7xf32> to vector<1xf32>
    %246 = vector.shape_cast %245 : vector<1xf32> to vector<1x1xf32>
    %247 = arith.subf %165, %246 : vector<1x1xf32>
    %c2_80 = arith.constant 2 : index
    %c0_81 = arith.constant 0 : index
    %248 = vector.load %arg6[%c2_80, %c0_81] : memref<6x7xf32, #tpu.memory_space<vmem>>, vector<1x7xf32>
    tpu.vector_store %arg6[%c2_80, %c0_81], %220 {strides = array<i32>} : memref<6x7xf32, #tpu.memory_space<vmem>>, vector<1x7xf32>,
    %c2_82 = arith.constant 2 : index
    %c0_83 = arith.constant 0 : index
    %249 = vector.load %arg7[%c2_82, %c0_83] : memref<6x1xi32, #tpu.memory_space<vmem>>, vector<1x1xi32>
    tpu.vector_store %arg7[%c2_82, %c0_83], %235 {strides = array<i32>} : memref<6x1xi32, #tpu.memory_space<vmem>>, vector<1x1xi32>,
    %250 = vector.broadcast %235 : vector<1x1xi32> to vector<7x1xi32>
    %251 = arith.cmpi eq, %9, %250 : vector<7x1xi32>
    %252 = arith.extui %251 : vector<7x1xi1> to vector<7x1xi32>
    %253 = arith.sitofp %252 : vector<7x1xi32> to vector<7x1xf32>
    %254 = vector.broadcast %253 : vector<7x1xf32> to vector<7x128xf32>
    %255 = arith.mulf %254, %0 : vector<7x128xf32>
    %cst_84 = arith.constant dense<0.000000e+00> : vector<128xf32>
    %256 = vector.multi_reduction <add>, %255, %cst_84 [0] : vector<7x128xf32> to vector<128xf32>
    %257 = vector.shape_cast %256 : vector<128xf32> to vector<1x128xf32>
    %258 = tpu.concatenate %257, %209 in 1 : vector<1x128xf32>, vector<1x128xf32> -> vector<1x256xf32>
    %cst_85 = arith.constant dense<0.000000e+00> : vector<1x512xf32>
    %259 = tpu.matmul %258, %1, %cst_85 {dimension_numbers = #tpu.dot_dimension_numbers<[1], [0], [0], [1], [0, 0, 1, 1], [], []>} : vector<1x256xf32>, vector<256x512xf32>, vector<1x512xf32> -> vector<1x512xf32>
    %260 = arith.addf %259, %2 : vector<1x512xf32>
    %261 = vector.extract_strided_slice %260 {offsets = [0, 0], sizes = [1, 128], strides = [1, 1]} : vector<1x512xf32> to vector<1x128xf32>
    %cst_86 = arith.constant 0.000000e+00 : f32
    %262 = vector.broadcast %cst_86 : f32 to vector<1x128xf32>
    %263 = arith.subf %262, %261 : vector<1x128xf32>
    %264 = math.exp %263 : vector<1x128xf32>
    %cst_87 = arith.constant 1.000000e+00 : f32
    %265 = vector.broadcast %cst_87 : f32 to vector<1x128xf32>
    %266 = arith.addf %265, %264 : vector<1x128xf32>
    %cst_88 = arith.constant 1.000000e+00 : f32
    %267 = vector.broadcast %cst_88 : f32 to vector<1x128xf32>
    %268 = arith.divf %267, %266 : vector<1x128xf32>
    %269 = vector.extract_strided_slice %260 {offsets = [0, 128], sizes = [1, 128], strides = [1, 1]} : vector<1x512xf32> to vector<1x128xf32>
    %cst_89 = arith.constant 0.000000e+00 : f32
    %270 = vector.broadcast %cst_89 : f32 to vector<1x128xf32>
    %271 = arith.subf %270, %269 : vector<1x128xf32>
    %272 = math.exp %271 : vector<1x128xf32>
    %cst_90 = arith.constant 1.000000e+00 : f32
    %273 = vector.broadcast %cst_90 : f32 to vector<1x128xf32>
    %274 = arith.addf %273, %272 : vector<1x128xf32>
    %cst_91 = arith.constant 1.000000e+00 : f32
    %275 = vector.broadcast %cst_91 : f32 to vector<1x128xf32>
    %276 = arith.divf %275, %274 : vector<1x128xf32>
    %277 = vector.extract_strided_slice %260 {offsets = [0, 256], sizes = [1, 128], strides = [1, 1]} : vector<1x512xf32> to vector<1x128xf32>
    %278 = math.tanh %277 : vector<1x128xf32>
    %279 = vector.extract_strided_slice %260 {offsets = [0, 384], sizes = [1, 128], strides = [1, 1]} : vector<1x512xf32> to vector<1x128xf32>
    %cst_92 = arith.constant 0.000000e+00 : f32
    %280 = vector.broadcast %cst_92 : f32 to vector<1x128xf32>
    %281 = arith.subf %280, %279 : vector<1x128xf32>
    %282 = math.exp %281 : vector<1x128xf32>
    %cst_93 = arith.constant 1.000000e+00 : f32
    %283 = vector.broadcast %cst_93 : f32 to vector<1x128xf32>
    %284 = arith.addf %283, %282 : vector<1x128xf32>
    %cst_94 = arith.constant 1.000000e+00 : f32
    %285 = vector.broadcast %cst_94 : f32 to vector<1x128xf32>
    %286 = arith.divf %285, %284 : vector<1x128xf32>
    %287 = arith.mulf %276, %207 : vector<1x128xf32>
    %288 = arith.mulf %268, %278 : vector<1x128xf32>
    %289 = arith.addf %287, %288 : vector<1x128xf32>
    %290 = math.tanh %289 : vector<1x128xf32>
    %291 = arith.mulf %286, %290 : vector<1x128xf32>
    %cst_95 = arith.constant dense<0.000000e+00> : vector<1x7xf32>
    %292 = tpu.matmul %291, %3, %cst_95 {dimension_numbers = #tpu.dot_dimension_numbers<[1], [0], [0], [1], [0, 0, 1, 1], [], []>} : vector<1x128xf32>, vector<128x7xf32>, vector<1x7xf32> -> vector<1x7xf32>
    %293 = arith.addf %292, %4 : vector<1x7xf32>
    %cst_96 = arith.constant dense<0xFF800000> : vector<1xf32>
    %294 = vector.multi_reduction <maximumf>, %293, %cst_96 [1] : vector<1x7xf32> to vector<1xf32>
    %295 = vector.shape_cast %294 : vector<1xf32> to vector<1x1xf32>
    %296 = vector.broadcast %295 : vector<1x1xf32> to vector<1x7xf32>
    %297 = arith.subf %293, %296 : vector<1x7xf32>
    %298 = math.exp %297 : vector<1x7xf32>
    %cst_97 = arith.constant dense<0.000000e+00> : vector<1xf32>
    %299 = vector.multi_reduction <add>, %298, %cst_97 [1] : vector<1x7xf32> to vector<1xf32>
    %300 = vector.shape_cast %299 : vector<1xf32> to vector<1x1xf32>
    %301 = vector.broadcast %300 : vector<1x1xf32> to vector<1x7xf32>
    %302 = arith.divf %298, %301 : vector<1x7xf32>
    %303 = vector.broadcast %295 : vector<1x1xf32> to vector<1x7xf32>
    %304 = arith.subf %293, %303 : vector<1x7xf32>
    %305 = math.log %300 : vector<1x1xf32>
    %306 = vector.broadcast %305 : vector<1x1xf32> to vector<1x7xf32>
    %307 = arith.subf %304, %306 : vector<1x7xf32>
    %c3 = arith.constant 3 : index
    %c0_98 = arith.constant 0 : index
    %308 = vector.load %arg0[%c3, %c0_98] : memref<6x7xf32, #tpu.memory_space<vmem>>, vector<1x7xf32>
    %309 = arith.addf %307, %308 : vector<1x7xf32>
    %cst_99 = arith.constant dense<0xFF800000> : vector<1xf32>
    %310 = vector.multi_reduction <maximumf>, %309, %cst_99 [1] : vector<1x7xf32> to vector<1xf32>
    %311 = vector.shape_cast %310 : vector<1xf32> to vector<1x1xf32>
    %312 = vector.broadcast %311 : vector<1x1xf32> to vector<1x7xf32>
    %313 = arith.cmpf oeq, %309, %312 : vector<1x7xf32>
    %c7_i32_100 = arith.constant 7 : i32
    %314 = vector.broadcast %c7_i32_100 : i32 to vector<1x7xi32>
    %315 = arith.select %313, %8, %314 : vector<1x7xi1>, vector<1x7xi32>
    %cst_101 = arith.constant dense<2147483647> : vector<1xi32>
    %316 = vector.multi_reduction <minsi>, %315, %cst_101 [1] : vector<1x7xi32> to vector<1xi32>
    %317 = vector.shape_cast %316 : vector<1xi32> to vector<1x1xi32>
    %318 = vector.broadcast %317 : vector<1x1xi32> to vector<1x7xi32>
    %319 = arith.cmpi eq, %8, %318 : vector<1x7xi32>
    %320 = arith.extui %319 : vector<1x7xi1> to vector<1x7xi32>
    %321 = arith.sitofp %320 : vector<1x7xi32> to vector<1x7xf32>
    %322 = arith.mulf %321, %307 : vector<1x7xf32>
    %cst_102 = arith.constant dense<0.000000e+00> : vector<1xf32>
    %323 = vector.multi_reduction <add>, %322, %cst_102 [1] : vector<1x7xf32> to vector<1xf32>
    %324 = vector.shape_cast %323 : vector<1xf32> to vector<1x1xf32>
    %325 = arith.addf %243, %324 : vector<1x1xf32>
    %326 = arith.mulf %302, %307 : vector<1x7xf32>
    %cst_103 = arith.constant dense<0.000000e+00> : vector<1xf32>
    %327 = vector.multi_reduction <add>, %326, %cst_103 [1] : vector<1x7xf32> to vector<1xf32>
    %328 = vector.shape_cast %327 : vector<1xf32> to vector<1x1xf32>
    %329 = arith.subf %247, %328 : vector<1x1xf32>
    %c3_104 = arith.constant 3 : index
    %c0_105 = arith.constant 0 : index
    %330 = vector.load %arg6[%c3_104, %c0_105] : memref<6x7xf32, #tpu.memory_space<vmem>>, vector<1x7xf32>
    tpu.vector_store %arg6[%c3_104, %c0_105], %302 {strides = array<i32>} : memref<6x7xf32, #tpu.memory_space<vmem>>, vector<1x7xf32>,
    %c3_106 = arith.constant 3 : index
    %c0_107 = arith.constant 0 : index
    %331 = vector.load %arg7[%c3_106, %c0_107] : memref<6x1xi32, #tpu.memory_space<vmem>>, vector<1x1xi32>
    tpu.vector_store %arg7[%c3_106, %c0_107], %317 {strides = array<i32>} : memref<6x1xi32, #tpu.memory_space<vmem>>, vector<1x1xi32>,
    %332 = vector.broadcast %317 : vector<1x1xi32> to vector<7x1xi32>
    %333 = arith.cmpi eq, %9, %332 : vector<7x1xi32>
    %334 = arith.extui %333 : vector<7x1xi1> to vector<7x1xi32>
    %335 = arith.sitofp %334 : vector<7x1xi32> to vector<7x1xf32>
    %336 = vector.broadcast %335 : vector<7x1xf32> to vector<7x128xf32>
    %337 = arith.mulf %336, %0 : vector<7x128xf32>
    %cst_108 = arith.constant dense<0.000000e+00> : vector<128xf32>
    %338 = vector.multi_reduction <add>, %337, %cst_108 [0] : vector<7x128xf32> to vector<128xf32>
    %339 = vector.shape_cast %338 : vector<128xf32> to vector<1x128xf32>
    %340 = tpu.concatenate %339, %291 in 1 : vector<1x128xf32>, vector<1x128xf32> -> vector<1x256xf32>
    %cst_109 = arith.constant dense<0.000000e+00> : vector<1x512xf32>
    %341 = tpu.matmul %340, %1, %cst_109 {dimension_numbers = #tpu.dot_dimension_numbers<[1], [0], [0], [1], [0, 0, 1, 1], [], []>} : vector<1x256xf32>, vector<256x512xf32>, vector<1x512xf32> -> vector<1x512xf32>
    %342 = arith.addf %341, %2 : vector<1x512xf32>
    %343 = vector.extract_strided_slice %342 {offsets = [0, 0], sizes = [1, 128], strides = [1, 1]} : vector<1x512xf32> to vector<1x128xf32>
    %cst_110 = arith.constant 0.000000e+00 : f32
    %344 = vector.broadcast %cst_110 : f32 to vector<1x128xf32>
    %345 = arith.subf %344, %343 : vector<1x128xf32>
    %346 = math.exp %345 : vector<1x128xf32>
    %cst_111 = arith.constant 1.000000e+00 : f32
    %347 = vector.broadcast %cst_111 : f32 to vector<1x128xf32>
    %348 = arith.addf %347, %346 : vector<1x128xf32>
    %cst_112 = arith.constant 1.000000e+00 : f32
    %349 = vector.broadcast %cst_112 : f32 to vector<1x128xf32>
    %350 = arith.divf %349, %348 : vector<1x128xf32>
    %351 = vector.extract_strided_slice %342 {offsets = [0, 128], sizes = [1, 128], strides = [1, 1]} : vector<1x512xf32> to vector<1x128xf32>
    %cst_113 = arith.constant 0.000000e+00 : f32
    %352 = vector.broadcast %cst_113 : f32 to vector<1x128xf32>
    %353 = arith.subf %352, %351 : vector<1x128xf32>
    %354 = math.exp %353 : vector<1x128xf32>
    %cst_114 = arith.constant 1.000000e+00 : f32
    %355 = vector.broadcast %cst_114 : f32 to vector<1x128xf32>
    %356 = arith.addf %355, %354 : vector<1x128xf32>
    %cst_115 = arith.constant 1.000000e+00 : f32
    %357 = vector.broadcast %cst_115 : f32 to vector<1x128xf32>
    %358 = arith.divf %357, %356 : vector<1x128xf32>
    %359 = vector.extract_strided_slice %342 {offsets = [0, 256], sizes = [1, 128], strides = [1, 1]} : vector<1x512xf32> to vector<1x128xf32>
    %360 = math.tanh %359 : vector<1x128xf32>
    %361 = vector.extract_strided_slice %342 {offsets = [0, 384], sizes = [1, 128], strides = [1, 1]} : vector<1x512xf32> to vector<1x128xf32>
    %cst_116 = arith.constant 0.000000e+00 : f32
    %362 = vector.broadcast %cst_116 : f32 to vector<1x128xf32>
    %363 = arith.subf %362, %361 : vector<1x128xf32>
    %364 = math.exp %363 : vector<1x128xf32>
    %cst_117 = arith.constant 1.000000e+00 : f32
    %365 = vector.broadcast %cst_117 : f32 to vector<1x128xf32>
    %366 = arith.addf %365, %364 : vector<1x128xf32>
    %cst_118 = arith.constant 1.000000e+00 : f32
    %367 = vector.broadcast %cst_118 : f32 to vector<1x128xf32>
    %368 = arith.divf %367, %366 : vector<1x128xf32>
    %369 = arith.mulf %358, %289 : vector<1x128xf32>
    %370 = arith.mulf %350, %360 : vector<1x128xf32>
    %371 = arith.addf %369, %370 : vector<1x128xf32>
    %372 = math.tanh %371 : vector<1x128xf32>
    %373 = arith.mulf %368, %372 : vector<1x128xf32>
    %cst_119 = arith.constant dense<0.000000e+00> : vector<1x7xf32>
    %374 = tpu.matmul %373, %3, %cst_119 {dimension_numbers = #tpu.dot_dimension_numbers<[1], [0], [0], [1], [0, 0, 1, 1], [], []>} : vector<1x128xf32>, vector<128x7xf32>, vector<1x7xf32> -> vector<1x7xf32>
    %375 = arith.addf %374, %4 : vector<1x7xf32>
    %cst_120 = arith.constant dense<0xFF800000> : vector<1xf32>
    %376 = vector.multi_reduction <maximumf>, %375, %cst_120 [1] : vector<1x7xf32> to vector<1xf32>
    %377 = vector.shape_cast %376 : vector<1xf32> to vector<1x1xf32>
    %378 = vector.broadcast %377 : vector<1x1xf32> to vector<1x7xf32>
    %379 = arith.subf %375, %378 : vector<1x7xf32>
    %380 = math.exp %379 : vector<1x7xf32>
    %cst_121 = arith.constant dense<0.000000e+00> : vector<1xf32>
    %381 = vector.multi_reduction <add>, %380, %cst_121 [1] : vector<1x7xf32> to vector<1xf32>
    %382 = vector.shape_cast %381 : vector<1xf32> to vector<1x1xf32>
    %383 = vector.broadcast %382 : vector<1x1xf32> to vector<1x7xf32>
    %384 = arith.divf %380, %383 : vector<1x7xf32>
    %385 = vector.broadcast %377 : vector<1x1xf32> to vector<1x7xf32>
    %386 = arith.subf %375, %385 : vector<1x7xf32>
    %387 = math.log %382 : vector<1x1xf32>
    %388 = vector.broadcast %387 : vector<1x1xf32> to vector<1x7xf32>
    %389 = arith.subf %386, %388 : vector<1x7xf32>
    %c4 = arith.constant 4 : index
    %c0_122 = arith.constant 0 : index
    %390 = vector.load %arg0[%c4, %c0_122] : memref<6x7xf32, #tpu.memory_space<vmem>>, vector<1x7xf32>
    %391 = arith.addf %389, %390 : vector<1x7xf32>
    %cst_123 = arith.constant dense<0xFF800000> : vector<1xf32>
    %392 = vector.multi_reduction <maximumf>, %391, %cst_123 [1] : vector<1x7xf32> to vector<1xf32>
    %393 = vector.shape_cast %392 : vector<1xf32> to vector<1x1xf32>
    %394 = vector.broadcast %393 : vector<1x1xf32> to vector<1x7xf32>
    %395 = arith.cmpf oeq, %391, %394 : vector<1x7xf32>
    %c7_i32_124 = arith.constant 7 : i32
    %396 = vector.broadcast %c7_i32_124 : i32 to vector<1x7xi32>
    %397 = arith.select %395, %8, %396 : vector<1x7xi1>, vector<1x7xi32>
    %cst_125 = arith.constant dense<2147483647> : vector<1xi32>
    %398 = vector.multi_reduction <minsi>, %397, %cst_125 [1] : vector<1x7xi32> to vector<1xi32>
    %399 = vector.shape_cast %398 : vector<1xi32> to vector<1x1xi32>
    %400 = vector.broadcast %399 : vector<1x1xi32> to vector<1x7xi32>
    %401 = arith.cmpi eq, %8, %400 : vector<1x7xi32>
    %402 = arith.extui %401 : vector<1x7xi1> to vector<1x7xi32>
    %403 = arith.sitofp %402 : vector<1x7xi32> to vector<1x7xf32>
    %404 = arith.mulf %403, %389 : vector<1x7xf32>
    %cst_126 = arith.constant dense<0.000000e+00> : vector<1xf32>
    %405 = vector.multi_reduction <add>, %404, %cst_126 [1] : vector<1x7xf32> to vector<1xf32>
    %406 = vector.shape_cast %405 : vector<1xf32> to vector<1x1xf32>
    %407 = arith.addf %325, %406 : vector<1x1xf32>
    %408 = arith.mulf %384, %389 : vector<1x7xf32>
    %cst_127 = arith.constant dense<0.000000e+00> : vector<1xf32>
    %409 = vector.multi_reduction <add>, %408, %cst_127 [1] : vector<1x7xf32> to vector<1xf32>
    %410 = vector.shape_cast %409 : vector<1xf32> to vector<1x1xf32>
    %411 = arith.subf %329, %410 : vector<1x1xf32>
    %c4_128 = arith.constant 4 : index
    %c0_129 = arith.constant 0 : index
    %412 = vector.load %arg6[%c4_128, %c0_129] : memref<6x7xf32, #tpu.memory_space<vmem>>, vector<1x7xf32>
    tpu.vector_store %arg6[%c4_128, %c0_129], %384 {strides = array<i32>} : memref<6x7xf32, #tpu.memory_space<vmem>>, vector<1x7xf32>,
    %c4_130 = arith.constant 4 : index
    %c0_131 = arith.constant 0 : index
    %413 = vector.load %arg7[%c4_130, %c0_131] : memref<6x1xi32, #tpu.memory_space<vmem>>, vector<1x1xi32>
    tpu.vector_store %arg7[%c4_130, %c0_131], %399 {strides = array<i32>} : memref<6x1xi32, #tpu.memory_space<vmem>>, vector<1x1xi32>,
    %414 = vector.broadcast %399 : vector<1x1xi32> to vector<7x1xi32>
    %415 = arith.cmpi eq, %9, %414 : vector<7x1xi32>
    %416 = arith.extui %415 : vector<7x1xi1> to vector<7x1xi32>
    %417 = arith.sitofp %416 : vector<7x1xi32> to vector<7x1xf32>
    %418 = vector.broadcast %417 : vector<7x1xf32> to vector<7x128xf32>
    %419 = arith.mulf %418, %0 : vector<7x128xf32>
    %cst_132 = arith.constant dense<0.000000e+00> : vector<128xf32>
    %420 = vector.multi_reduction <add>, %419, %cst_132 [0] : vector<7x128xf32> to vector<128xf32>
    %421 = vector.shape_cast %420 : vector<128xf32> to vector<1x128xf32>
    %422 = tpu.concatenate %421, %373 in 1 : vector<1x128xf32>, vector<1x128xf32> -> vector<1x256xf32>
    %cst_133 = arith.constant dense<0.000000e+00> : vector<1x512xf32>
    %423 = tpu.matmul %422, %1, %cst_133 {dimension_numbers = #tpu.dot_dimension_numbers<[1], [0], [0], [1], [0, 0, 1, 1], [], []>} : vector<1x256xf32>, vector<256x512xf32>, vector<1x512xf32> -> vector<1x512xf32>
    %424 = arith.addf %423, %2 : vector<1x512xf32>
    %425 = vector.extract_strided_slice %424 {offsets = [0, 0], sizes = [1, 128], strides = [1, 1]} : vector<1x512xf32> to vector<1x128xf32>
    %cst_134 = arith.constant 0.000000e+00 : f32
    %426 = vector.broadcast %cst_134 : f32 to vector<1x128xf32>
    %427 = arith.subf %426, %425 : vector<1x128xf32>
    %428 = math.exp %427 : vector<1x128xf32>
    %cst_135 = arith.constant 1.000000e+00 : f32
    %429 = vector.broadcast %cst_135 : f32 to vector<1x128xf32>
    %430 = arith.addf %429, %428 : vector<1x128xf32>
    %cst_136 = arith.constant 1.000000e+00 : f32
    %431 = vector.broadcast %cst_136 : f32 to vector<1x128xf32>
    %432 = arith.divf %431, %430 : vector<1x128xf32>
    %433 = vector.extract_strided_slice %424 {offsets = [0, 128], sizes = [1, 128], strides = [1, 1]} : vector<1x512xf32> to vector<1x128xf32>
    %cst_137 = arith.constant 0.000000e+00 : f32
    %434 = vector.broadcast %cst_137 : f32 to vector<1x128xf32>
    %435 = arith.subf %434, %433 : vector<1x128xf32>
    %436 = math.exp %435 : vector<1x128xf32>
    %cst_138 = arith.constant 1.000000e+00 : f32
    %437 = vector.broadcast %cst_138 : f32 to vector<1x128xf32>
    %438 = arith.addf %437, %436 : vector<1x128xf32>
    %cst_139 = arith.constant 1.000000e+00 : f32
    %439 = vector.broadcast %cst_139 : f32 to vector<1x128xf32>
    %440 = arith.divf %439, %438 : vector<1x128xf32>
    %441 = vector.extract_strided_slice %424 {offsets = [0, 256], sizes = [1, 128], strides = [1, 1]} : vector<1x512xf32> to vector<1x128xf32>
    %442 = math.tanh %441 : vector<1x128xf32>
    %443 = vector.extract_strided_slice %424 {offsets = [0, 384], sizes = [1, 128], strides = [1, 1]} : vector<1x512xf32> to vector<1x128xf32>
    %cst_140 = arith.constant 0.000000e+00 : f32
    %444 = vector.broadcast %cst_140 : f32 to vector<1x128xf32>
    %445 = arith.subf %444, %443 : vector<1x128xf32>
    %446 = math.exp %445 : vector<1x128xf32>
    %cst_141 = arith.constant 1.000000e+00 : f32
    %447 = vector.broadcast %cst_141 : f32 to vector<1x128xf32>
    %448 = arith.addf %447, %446 : vector<1x128xf32>
    %cst_142 = arith.constant 1.000000e+00 : f32
    %449 = vector.broadcast %cst_142 : f32 to vector<1x128xf32>
    %450 = arith.divf %449, %448 : vector<1x128xf32>
    %451 = arith.mulf %440, %371 : vector<1x128xf32>
    %452 = arith.mulf %432, %442 : vector<1x128xf32>
    %453 = arith.addf %451, %452 : vector<1x128xf32>
    %454 = math.tanh %453 : vector<1x128xf32>
    %455 = arith.mulf %450, %454 : vector<1x128xf32>
    %cst_143 = arith.constant dense<0.000000e+00> : vector<1x7xf32>
    %456 = tpu.matmul %455, %3, %cst_143 {dimension_numbers = #tpu.dot_dimension_numbers<[1], [0], [0], [1], [0, 0, 1, 1], [], []>} : vector<1x128xf32>, vector<128x7xf32>, vector<1x7xf32> -> vector<1x7xf32>
    %457 = arith.addf %456, %4 : vector<1x7xf32>
    %cst_144 = arith.constant dense<0xFF800000> : vector<1xf32>
    %458 = vector.multi_reduction <maximumf>, %457, %cst_144 [1] : vector<1x7xf32> to vector<1xf32>
    %459 = vector.shape_cast %458 : vector<1xf32> to vector<1x1xf32>
    %460 = vector.broadcast %459 : vector<1x1xf32> to vector<1x7xf32>
    %461 = arith.subf %457, %460 : vector<1x7xf32>
    %462 = math.exp %461 : vector<1x7xf32>
    %cst_145 = arith.constant dense<0.000000e+00> : vector<1xf32>
    %463 = vector.multi_reduction <add>, %462, %cst_145 [1] : vector<1x7xf32> to vector<1xf32>
    %464 = vector.shape_cast %463 : vector<1xf32> to vector<1x1xf32>
    %465 = vector.broadcast %464 : vector<1x1xf32> to vector<1x7xf32>
    %466 = arith.divf %462, %465 : vector<1x7xf32>
    %467 = vector.broadcast %459 : vector<1x1xf32> to vector<1x7xf32>
    %468 = arith.subf %457, %467 : vector<1x7xf32>
    %469 = math.log %464 : vector<1x1xf32>
    %470 = vector.broadcast %469 : vector<1x1xf32> to vector<1x7xf32>
    %471 = arith.subf %468, %470 : vector<1x7xf32>
    %c5 = arith.constant 5 : index
    %c0_146 = arith.constant 0 : index
    %472 = vector.load %arg0[%c5, %c0_146] : memref<6x7xf32, #tpu.memory_space<vmem>>, vector<1x7xf32>
    %473 = arith.addf %471, %472 : vector<1x7xf32>
    %cst_147 = arith.constant dense<0xFF800000> : vector<1xf32>
    %474 = vector.multi_reduction <maximumf>, %473, %cst_147 [1] : vector<1x7xf32> to vector<1xf32>
    %475 = vector.shape_cast %474 : vector<1xf32> to vector<1x1xf32>
    %476 = vector.broadcast %475 : vector<1x1xf32> to vector<1x7xf32>
    %477 = arith.cmpf oeq, %473, %476 : vector<1x7xf32>
    %c7_i32_148 = arith.constant 7 : i32
    %478 = vector.broadcast %c7_i32_148 : i32 to vector<1x7xi32>
    %479 = arith.select %477, %8, %478 : vector<1x7xi1>, vector<1x7xi32>
    %cst_149 = arith.constant dense<2147483647> : vector<1xi32>
    %480 = vector.multi_reduction <minsi>, %479, %cst_149 [1] : vector<1x7xi32> to vector<1xi32>
    %481 = vector.shape_cast %480 : vector<1xi32> to vector<1x1xi32>
    %482 = vector.broadcast %481 : vector<1x1xi32> to vector<1x7xi32>
    %483 = arith.cmpi eq, %8, %482 : vector<1x7xi32>
    %484 = arith.extui %483 : vector<1x7xi1> to vector<1x7xi32>
    %485 = arith.sitofp %484 : vector<1x7xi32> to vector<1x7xf32>
    %486 = arith.mulf %485, %471 : vector<1x7xf32>
    %cst_150 = arith.constant dense<0.000000e+00> : vector<1xf32>
    %487 = vector.multi_reduction <add>, %486, %cst_150 [1] : vector<1x7xf32> to vector<1xf32>
    %488 = vector.shape_cast %487 : vector<1xf32> to vector<1x1xf32>
    %489 = arith.addf %407, %488 : vector<1x1xf32>
    %490 = arith.mulf %466, %471 : vector<1x7xf32>
    %cst_151 = arith.constant dense<0.000000e+00> : vector<1xf32>
    %491 = vector.multi_reduction <add>, %490, %cst_151 [1] : vector<1x7xf32> to vector<1xf32>
    %492 = vector.shape_cast %491 : vector<1xf32> to vector<1x1xf32>
    %493 = arith.subf %411, %492 : vector<1x1xf32>
    %c5_152 = arith.constant 5 : index
    %c0_153 = arith.constant 0 : index
    %494 = vector.load %arg6[%c5_152, %c0_153] : memref<6x7xf32, #tpu.memory_space<vmem>>, vector<1x7xf32>
    tpu.vector_store %arg6[%c5_152, %c0_153], %466 {strides = array<i32>} : memref<6x7xf32, #tpu.memory_space<vmem>>, vector<1x7xf32>,
    %c5_154 = arith.constant 5 : index
    %c0_155 = arith.constant 0 : index
    %495 = vector.load %arg7[%c5_154, %c0_155] : memref<6x1xi32, #tpu.memory_space<vmem>>, vector<1x1xi32>
    tpu.vector_store %arg7[%c5_154, %c0_155], %481 {strides = array<i32>} : memref<6x1xi32, #tpu.memory_space<vmem>>, vector<1x1xi32>,
    %c0_156 = arith.constant 0 : index
    %c0_157 = arith.constant 0 : index
    %496 = vector.load %arg8[%c0_156, %c0_157] : memref<1x1xf32, #tpu.memory_space<vmem>>, vector<1x1xf32>
    tpu.vector_store %arg8[%c0_156, %c0_157], %489 {strides = array<i32>} : memref<1x1xf32, #tpu.memory_space<vmem>>, vector<1x1xf32>,
    %c0_158 = arith.constant 0 : index
    %c0_159 = arith.constant 0 : index
    %497 = vector.load %arg9[%c0_158, %c0_159] : memref<1x1xf32, #tpu.memory_space<vmem>>, vector<1x1xf32>
    tpu.vector_store %arg9[%c0_158, %c0_159], %493 {strides = array<i32>} : memref<1x1xf32, #tpu.memory_space<vmem>>, vector<1x1xf32>,
    return
  }
}

</mosaic_0001>

<bundles_post_ra>
// kernel: wabe_controller_forward.1
= control target key start
LH: loop header
LB: loop body
LE: loop exit
PB: predicated region body
PF: predicated region fallthrough
CT: control target
= control target key end

     0   :  { %15 = vsyncpa [#allocation3], 0  ;;  %s5047_s0 = inlined_call_operand.vmem [shape: f32[6,7], index: 0, kind: input, shape index: {}]   ;;  %s5048_s1 = inlined_call_operand.vmem [shape: f32[7,128], index: 1, kind: input, shape index: {}]   ;;  %s5049_s2 = inlined_call_operand.hbm [shape: f32[256,512], index: 2, kind: input, shape index: {}]   ;;  %s5050_s3 = inlined_call_operand.vmem [shape: f32[1,512], index: 3, kind: input, shape index: {}]   ;;  %s5051_s4 = inlined_call_operand.vmem [shape: f32[128,7], index: 4, kind: input, shape index: {}]   ;;  %s5052_s5 = inlined_call_operand.vmem [shape: f32[1,7], index: 5, kind: input, shape index: {}]   ;;  %s5053_s6 = inlined_call_operand.hbm [shape: f32[6,7], index: 6, kind: output, shape index: {0}]   ;;  %s5054_s7 = inlined_call_operand.vmem [shape: s32[6,1], index: 7, kind: output, shape index: {1}]   ;;  %s5055_s8 = inlined_call_operand.hbm [shape: f32[1,1], index: 8, kind: output, shape index: {2}]   ;;  %s5056_s9 = inlined_call_operand.hbm [shape: f32[1,1], index: 9, kind: output, shape index: {3}]  }
   0x1   :  { %16 = vsyncpa [#allocation4], 0 }
   0x2   :  { %17 = vsyncpa [#allocation7], 0  ;;  %s2891_s30 = smov [#allocation2]  }
   0x3   :  { %s27_s10 = sshll.u32 %s2891_s30, 4  ;;  %s28_s10 = int_to_ptr.vmem [resolvable:$true] %s27_s10 }
   0x4   :  { %s2813_s11 = scalar_lea.vmem %s28_s10, 16384  ;;  %p2818_p1 = scmp.lt.s32.totalorder %s28_s10, %s28_s10 }
   0x5   :  { %p2814_p0 = scmp.ne.s32.totalorder %s28_s10, %s2813_s11  ;;  %p2819_p2 = scmp.lt.s32.totalorder %s2813_s11, %s2813_s11 }
   0x7   :  { %p2820_p3 = por %p2819_p2, %p2818_p1 }
   0x9   :  { %p2821_p4 = pnand %p2820_p3, %p2814_p0 }
   0xb   :  { %2824 = shalt.err (!%p2821_p4)
}
   0xc   :  { %s2892_s12 = smov 512   ;;  %s2893_s13 = smov 32  }
   0xd   :  { %33 = dma.hbm_to_vmem [thread:$0]  %s5049_s2, 16384, %s28_s10, [#allocation3], %s2892_s12, %s2892_s12, %s2893_s13  }
   0xe   :  { %2885 = dma.done.wait [#allocation3], 16384  }
   0xf   :  { %2886 = vsyncadd [#allocation3], 4294950912  ;;  %v5057_v0 = vmov 0.0   ;;  %v2954_v1 = vld [vmem:[#allocation2 + $0x1e8] sm:$0xff]  ;;  %v2956_v2 = vld [vmem:[#allocation2 + $0x1e0] sm:$0xff]  ;;  %vm2895_vm0 = vmmov 0  }
  0x10   :  { %279 = vmatprep.mubr.f32.mxu0 %v5057_v0  ;;  %350 = vmatprep.mubr.f32.mxu1 %v5057_v0  ;;  %v2958_v3 = vld [vmem:[#allocation2 + $0x1c8] sm:$0xff]  ;;  %v2961_v4 = vld [vmem:[#allocation2 + $0x1c0] sm:$0xff]  ;;  %v2975_v9 = vld [vmem:[#allocation2 + $0x1f8] sm:$0xff]  ;;  %vm451_vm1 = vcmask 49152   ;;  %vm502_vm4 = vcmask 0   ;;  %vm512_vm6 = vcmask 1046528  }
  0x11   :  { %215 = vmatprep.subr.mxu0 %v2954_v1  ;;  %v2964_v5 = vld [vmem:[#allocation2 + $0x1a8] sm:$0xff]  ;;  %v2967_v6 = vld [vmem:[#allocation2 + $0x1a0] sm:$0xff]  ;;  %5301 = vst [vmem:[#allocation12_spill] sm:$0xff] %v2975_v9  ;;  %286 = vmatprep.subr.mxu1 %v2975_v9  ;;  %v2981_v11 = vld [vmem:[#allocation2 + $0x1f0] sm:$0xff]  ;;  %s2896_s27 = smov [#allocation5]  }
  0x12   :  { %216 = vmatpush1.msra.mxu0 %v2956_v2  ;;  %v2970_v7 = vld [vmem:[#allocation2 + $0x188] sm:$0xff]  ;;  %v2973_v8 = vld [vmem:[#allocation2 + $0x180] sm:$0xff]  ;;  %5302 = vst [vmem:[#allocation13_spill] sm:$0xff] %v2981_v11  ;;  %287 = vmatpush1.msra.mxu1 %v2981_v11  ;;  %v2987_v13 = vld [vmem:[#allocation2 + $0x1d8] sm:$0xff] }
  0x13   :  { %217 = vmatprep.subr.mxu0 %v2958_v3  ;;  %v2978_v10 = vld [vmem:[#allocation2 + $0x168] sm:$0xff]  ;;  %v2984_v12 = vld [vmem:[#allocation2 + $0x160] sm:$0xff]  ;;  %5303 = vst [vmem:[#allocation14_spill] sm:$0xff] %v2987_v13  ;;  %v2989_v14 = vld [vmem:[#allocation2 + $0x1d0] sm:$0xff]  ;;  %288 = vmatprep.subr.mxu1 %v2987_v13 }
  0x14   :  { %218 = vmatpush1.msra.mxu0 %v2961_v4  ;;  %5304 = vst [vmem:[#allocation15_spill] sm:$0xff] %v2989_v14  ;;  %v2992_v15 = vld [vmem:[#allocation2 + $0x148] sm:$0xff]  ;;  %v2995_v16 = vld [vmem:[#allocation2 + $0x1b8] sm:$0xff]  ;;  %v2998_v17 = vld [vmem:[#allocation2 + $0x140] sm:$0xff]  ;;  %289 = vmatpush1.msra.mxu1 %v2989_v14 }
  0x15   :  { %219 = vmatprep.subr.mxu0 %v2964_v5  ;;  %5305 = vst [vmem:[#allocation16_spill] sm:$0xff] %v2995_v16  ;;  %v3001_v18 = vld [vmem:[#allocation2 + $0x1b0] sm:$0xff]  ;;  %v3003_v19 = vld [vmem:[#allocation2 + $0x198] sm:$0xff]  ;;  %v3006_v20 = vld [vmem:[#allocation2 + $0x128] sm:$0xff]  ;;  %290 = vmatprep.subr.mxu1 %v2995_v16 }
  0x16   :  { %220 = vmatpush1.msra.mxu0 %v2967_v6  ;;  %5306 = vst [vmem:[#allocation17_spill] sm:$0xff] %v3001_v18  ;;  %5307 = vst [vmem:[#allocation18_spill] sm:$0xff] %v3003_v19  ;;  %v3009_v21 = vld [vmem:[#allocation2 + $0x190] sm:$0xff]  ;;  %v3012_v22 = vld [vmem:[#allocation2 + $0x120] sm:$0xff]  ;;  %291 = vmatpush1.msra.mxu1 %v3001_v18 }
  0x17   :  { %221 = vmatprep.subr.mxu0 %v2970_v7  ;;  %5308 = vst [vmem:[#allocation19_spill] sm:$0xff] %v3009_v21  ;;  %v3015_v23 = vld [vmem:[#allocation2 + $0x178] sm:$0xff]  ;;  %v3018_v24 = vld [vmem:[#allocation2 + $0x108] sm:$0xff]  ;;  %292 = vmatprep.subr.mxu1 %v3003_v19  ;;  %v3021_v25 = vld [vmem:[#allocation2 + $0x170] sm:$0xff] }
  0x18   :  { %222 = vmatpush1.msra.mxu0 %v2973_v8  ;;  %5309 = vst [vmem:[#allocation20_spill] sm:$0xff] %v3015_v23  ;;  %5310 = vst [vmem:[#allocation21_spill] sm:$0xff] %v3021_v25  ;;  %v3024_v26 = vld [vmem:[#allocation2 + $0x100] sm:$0xff]  ;;  %293 = vmatpush1.msra.mxu1 %v3009_v21  ;;  %v3027_v27 = vld [vmem:[#allocation2 + $0x158] sm:$0xff] }
  0x19   :  { %223 = vmatprep.subr.mxu0 %v2978_v10  ;;  %5311 = vst [vmem:[#allocation22_spill] sm:$0xff] %v3027_v27  ;;  %v3030_v28 = vld [vmem:[#allocation2 + $0xe8] sm:$0xff]  ;;  %294 = vmatprep.subr.mxu1 %v3015_v23  ;;  %v3033_v29 = vld [vmem:[#allocation2 + $0x150] sm:$0xff]  ;;  %v3036_v30 = vld [vmem:[#allocation2 + $0xe0] sm:$0xff] }
  0x1a   :  { %224 = vmatpush1.msra.mxu0 %v2984_v12  ;;  %5312 = vst [vmem:[#allocation23_spill] sm:$0xff] %v3033_v29  ;;  %295 = vmatpush1.msra.mxu1 %v3021_v25  ;;  %v3039_v31 = vld [vmem:[#allocation2 + $0x138] sm:$0xff]  ;;  %v3042_v32 = vld [vmem:[#allocation2 + $0xc8] sm:$0xff]  ;;  %v3045_v33 = vld [vmem:[#allocation2 + $0x130] sm:$0xff] }
  0x1b   :  { %225 = vmatprep.subr.mxu0 %v2992_v15  ;;  %5313 = vst [vmem:[#allocation24_spill] sm:$0xff] %v3039_v31  ;;  %296 = vmatprep.subr.mxu1 %v3027_v27  ;;  %5314 = vst [vmem:[#allocation25_spill] sm:$0xff] %v3045_v33  ;;  %v3048_v34 = vld [vmem:[#allocation2 + $0xc0] sm:$0xff]  ;;  %v3051_v35 = vld [vmem:[#allocation2 + $0x118] sm:$0xff] }
  0x1c   :  { %226 = vmatpush1.msra.mxu0 %v2998_v17  ;;  %297 = vmatpush1.msra.mxu1 %v3033_v29  ;;  %5315 = vst [vmem:[#allocation26_spill] sm:$0xff] %v3051_v35  ;;  %v3054_v36 = vld [vmem:[#allocation2 + $0xa8] sm:$0xff]  ;;  %v3057_v37 = vld [vmem:[#allocation2 + $0x110] sm:$0xff]  ;;  %v3060_v38 = vld [vmem:[#allocation2 + $0xa0] sm:$0xff] }
  0x1d   :  { %227 = vmatprep.subr.mxu0 %v3006_v20  ;;  %298 = vmatprep.subr.mxu1 %v3039_v31  ;;  %5316 = vst [vmem:[#allocation27_spill] sm:$0xff] %v3057_v37  ;;  %v3063_v39 = vld [vmem:[#allocation2 + $0xf8] sm:$0xff]  ;;  %v3066_v40 = vld [vmem:[#allocation2 + $0x88] sm:$0xff]  ;;  %v3069_v41 = vld [vmem:[#allocation2 + $0xf0] sm:$0xff] }
  0x1e   :  { %228 = vmatpush1.msra.mxu0 %v3012_v22  ;;  %299 = vmatpush1.msra.mxu1 %v3045_v33  ;;  %5317 = vst [vmem:[#allocation28_spill] sm:$0xff] %v3063_v39  ;;  %5318 = vst [vmem:[#allocation29_spill] sm:$0xff] %v3069_v41  ;;  %v3072_v42 = vld [vmem:[#allocation2 + $0x80] sm:$0xff]  ;;  %v3075_v43 = vld [vmem:[#allocation2 + $0xd8] sm:$0xff] }
  0x1f   :  { %229 = vmatprep.subr.mxu0 %v3018_v24  ;;  %300 = vmatprep.subr.mxu1 %v3051_v35  ;;  %5319 = vst [vmem:[#allocation30_spill] sm:$0xff] %v3075_v43  ;;  %v3078_v44 = vld [vmem:[#allocation2 + $0x68] sm:$0xff]  ;;  %v3081_v45 = vld [vmem:[#allocation2 + $0xd0] sm:$0xff]  ;;  %v3084_v46 = vld [vmem:[#allocation2 + $0x60] sm:$0xff] }
  0x20   :  { %230 = vmatpush1.msra.mxu0 %v3024_v26  ;;  %301 = vmatpush1.msra.mxu1 %v3057_v37  ;;  %5320 = vst [vmem:[#allocation31_spill] sm:$0xff] %v3081_v45  ;;  %v3087_v47 = vld [vmem:[#allocation2 + $0xb8] sm:$0xff]  ;;  %v3090_v48 = vld [vmem:[#allocation2 + $0x48] sm:$0xff]  ;;  %v3093_v49 = vld [vmem:[#allocation2 + $0xb0] sm:$0xff] }
  0x21   :  { %231 = vmatprep.subr.mxu0 %v3030_v28  ;;  %302 = vmatprep.subr.mxu1 %v3063_v39  ;;  %5321 = vst [vmem:[#allocation32_spill] sm:$0xff] %v3087_v47  ;;  %5322 = vst [vmem:[#allocation33_spill] sm:$0xff] %v3093_v49  ;;  %v3096_v50 = vld [vmem:[#allocation2 + $0x40] sm:$0xff]  ;;  %v3099_v51 = vld [vmem:[#allocation2 + $0x98] sm:$0xff] }
  0x22   :  { %232 = vmatpush1.msra.mxu0 %v3036_v30  ;;  %303 = vmatpush1.msra.mxu1 %v3069_v41  ;;  %5323 = vst [vmem:[#allocation34_spill] sm:$0xff] %v3099_v51  ;;  %v3102_v52 = vld [vmem:[#allocation2 + $0x28] sm:$0xff]  ;;  %v3105_v53 = vld [vmem:[#allocation2 + $0x90] sm:$0xff]  ;;  %v3108_v54 = vld [vmem:[#allocation2 + $0x20] sm:$0xff] }
  0x23   :  { %233 = vmatprep.subr.mxu0 %v3042_v32  ;;  %304 = vmatprep.subr.mxu1 %v3075_v43  ;;  %5324 = vst [vmem:[#allocation35_spill] sm:$0xff] %v3105_v53  ;;  %v3111_v55 = vld [vmem:[#allocation2 + $0x78] sm:$0xff]  ;;  %v3114_v56 = vld [vmem:[#allocation2 + $0x8] sm:$0xff]  ;;  %v3117_v57 = vld [vmem:[#allocation2 + $0x70] sm:$0xff] }
  0x24   :  { %234 = vmatpush1.msra.mxu0 %v3048_v34  ;;  %305 = vmatpush1.msra.mxu1 %v3081_v45  ;;  %5325 = vst [vmem:[#allocation36_spill] sm:$0xff] %v3111_v55  ;;  %5326 = vst [vmem:[#allocation37_spill] sm:$0xff] %v3117_v57  ;;  %v3120_v58 = vld [vmem:[#allocation2] sm:$0xff]  ;;  %v3123_v59 = vld [vmem:[#allocation2 + $0x58] sm:$0xff] }
  0x25   :  { %235 = vmatprep.subr.mxu0 %v3054_v36  ;;  %306 = vmatprep.subr.mxu1 %v3087_v47  ;;  %5327 = vst [vmem:[#allocation38_spill] sm:$0xff] %v3123_v59  ;;  %v3126_v60 = vld [vmem:[#allocation2 + $0x3e8] sm:$0xff]  ;;  %v3129_v61 = vld [vmem:[#allocation2 + $0x50] sm:$0xff]  ;;  %v3132_v62 = vld [vmem:[#allocation2 + $0x3e0] sm:$0xff] }
  0x26   :  { %236 = vmatpush1.msra.mxu0 %v3060_v38  ;;  %307 = vmatpush1.msra.mxu1 %v3093_v49  ;;  %5328 = vst [vmem:[#allocation39_spill] sm:$0xff] %v3129_v61  ;;  %v3135_v63 = vld [vmem:[#allocation2 + $0x38] sm:$0xff]  ;;  %v3138_v0 = vld [vmem:[#allocation2 + $0x3c8] sm:$0xff]  ;;  %v3153_v49 = vld [vmem:[#allocation2 + $0x10] sm:$0xff] }
  0x27   :  { %237 = vmatprep.subr.mxu0 %v3066_v40  ;;  %308 = vmatprep.subr.mxu1 %v3099_v51  ;;  %5329 = vst [vmem:[#allocation40_spill] sm:$0xff] %v3135_v63  ;;  %v3147_v51 = vld [vmem:[#allocation2 + $0x18] sm:$0xff]  ;;  %5332 = vst [vmem:[#allocation43_spill] sm:$0xff] %v3153_v49  ;;  %v3165_v45 = vld [vmem:[#allocation2 + $0x3f0] sm:$0xff] }
  0x28   :  { %238 = vmatpush1.msra.mxu0 %v3072_v42  ;;  %309 = vmatpush1.msra.mxu1 %v3105_v53  ;;  %v3141_v53 = vld [vmem:[#allocation2 + $0x30] sm:$0xff]  ;;  %5331 = vst [vmem:[#allocation42_spill] sm:$0xff] %v3147_v51  ;;  %v3159_v47 = vld [vmem:[#allocation2 + $0x3f8] sm:$0xff]  ;;  %5334 = vst [vmem:[#allocation45_spill] sm:$0xff] %v3165_v45 }
  0x29   :  { %239 = vmatprep.subr.mxu0 %v3078_v44  ;;  %310 = vmatprep.subr.mxu1 %v3111_v55  ;;  %5330 = vst [vmem:[#allocation41_spill] sm:$0xff] %v3141_v53  ;;  %v3144_v55 = vld [vmem:[#allocation2 + $0x3c0] sm:$0xff]  ;;  %5333 = vst [vmem:[#allocation44_spill] sm:$0xff] %v3159_v47  ;;  %v3171_v43 = vld [vmem:[#allocation2 + $0x3d8] sm:$0xff] }
  0x2a   :  { %240 = vmatpush1.msra.mxu0 %v3084_v46  ;;  %311 = vmatpush1.msra.mxu1 %v3117_v57  ;;  %v3150_v57 = vld [vmem:[#allocation2 + $0x3a8] sm:$0xff]  ;;  %5335 = vst [vmem:[#allocation46_spill] sm:$0xff] %v3171_v43  ;;  %v3177_v41 = vld [vmem:[#allocation2 + $0x3d0] sm:$0xff]  ;;  %v3183_v39 = vld [vmem:[#allocation2 + $0x3b8] sm:$0xff] }
  0x2b   :  { %241 = vmatprep.subr.mxu0 %v3090_v48  ;;  %312 = vmatprep.subr.mxu1 %v3123_v59  ;;  %v3156_v59 = vld [vmem:[#allocation2 + $0x3a0] sm:$0xff]  ;;  %5336 = vst [vmem:[#allocation47_spill] sm:$0xff] %v3177_v41  ;;  %5337 = vst [vmem:[#allocation48_spill] sm:$0xff] %v3183_v39  ;;  %v3189_v37 = vld [vmem:[#allocation2 + $0x3b0] sm:$0xff] }
  0x2c   :  { %242 = vmatpush1.msra.mxu0 %v3096_v50  ;;  %313 = vmatpush1.msra.mxu1 %v3129_v61  ;;  %v3162_v61 = vld [vmem:[#allocation2 + $0x388] sm:$0xff]  ;;  %5338 = vst [vmem:[#allocation49_spill] sm:$0xff] %v3189_v37  ;;  %v3195_v35 = vld [vmem:[#allocation2 + $0x398] sm:$0xff]  ;;  %v3201_v33 = vld [vmem:[#allocation2 + $0x390] sm:$0xff] }
  0x2d   :  { %243 = vmatprep.subr.mxu0 %v3102_v52  ;;  %314 = vmatprep.subr.mxu1 %v3135_v63  ;;  %v3168_v63 = vld [vmem:[#allocation2 + $0x380] sm:$0xff]  ;;  %5339 = vst [vmem:[#allocation50_spill] sm:$0xff] %v3195_v35  ;;  %5340 = vst [vmem:[#allocation51_spill] sm:$0xff] %v3201_v33  ;;  %v3207_v31 = vld [vmem:[#allocation2 + $0x378] sm:$0xff] }
  0x2e   :  { %244 = vmatpush1.msra.mxu0 %v3108_v54  ;;  %315 = vmatpush1.msra.mxu1 %v3141_v53  ;;  %v3174_v53 = vld [vmem:[#allocation2 + $0x368] sm:$0xff]  ;;  %5341 = vst [vmem:[#allocation52_spill] sm:$0xff] %v3207_v31  ;;  %v3213_v29 = vld [vmem:[#allocation2 + $0x370] sm:$0xff]  ;;  %v3219_v27 = vld [vmem:[#allocation2 + $0x358] sm:$0xff] }
  0x2f   :  { %245 = vmatprep.subr.mxu0 %v3114_v56  ;;  %316 = vmatprep.subr.mxu1 %v3147_v51  ;;  %v3180_v51 = vld [vmem:[#allocation2 + $0x360] sm:$0xff]  ;;  %5342 = vst [vmem:[#allocation53_spill] sm:$0xff] %v3213_v29  ;;  %5343 = vst [vmem:[#allocation54_spill] sm:$0xff] %v3219_v27  ;;  %v3225_v25 = vld [vmem:[#allocation2 + $0x350] sm:$0xff] }
  0x30   :  { %246 = vmatpush1.msra.mxu0 %v3120_v58  ;;  %317 = vmatpush1.msra.mxu1 %v3153_v49  ;;  %v3186_v49 = vld [vmem:[#allocation2 + $0x348] sm:$0xff]  ;;  %5345 = vst [vmem:[#allocation56_spill] sm:$0xff] %v3225_v25  ;;  %v3231_v23 = vld [vmem:[#allocation2 + $0x338] sm:$0xff]  ;;  %v3237_v21 = vld [vmem:[#allocation2 + $0x330] sm:$0xff] }
  0x31   :  { %247 = vmatprep.subr.mxu0 %v3126_v60  ;;  %318 = vmatprep.subr.mxu1 %v3159_v47  ;;  %v3192_v47 = vld [vmem:[#allocation2 + $0x340] sm:$0xff]  ;;  %5347 = vst [vmem:[#allocation58_spill] sm:$0xff] %v3231_v23  ;;  %5349 = vst [vmem:[#allocation60_spill] sm:$0xff] %v3237_v21  ;;  %v3243_v19 = vld [vmem:[#allocation2 + $0x318] sm:$0xff] }
  0x32   :  { %248 = vmatpush2.msra.mxu0 %v3132_v62  ;;  %319 = vmatpush2.msra.mxu1 %v3165_v45  ;;  %v3198_v45 = vld [vmem:[#allocation2 + $0x328] sm:$0xff]  ;;  %5351 = vst [vmem:[#allocation62_spill] sm:$0xff] %v3243_v19  ;;  %v3249_v18 = vld [vmem:[#allocation2 + $0x310] sm:$0xff]  ;;  %v3255_v16 = vld [vmem:[#allocation2 + $0x2f8] sm:$0xff] }
  0x33   :  { %249 = vmatprep.subr.mxu0 %v3138_v0  ;;  %320 = vmatprep.subr.mxu1 %v3171_v43  ;;  %v3204_v43 = vld [vmem:[#allocation2 + $0x320] sm:$0xff]  ;;  %5353 = vst [vmem:[#allocation64_spill] sm:$0xff] %v3249_v18  ;;  %5355 = vst [vmem:[#allocation66_spill] sm:$0xff] %v3255_v16  ;;  %v3261_v14 = vld [vmem:[#allocation2 + $0x2f0] sm:$0xff] }
  0x34   :  { %250 = vmatpush2.msra.mxu0 %v3144_v55  ;;  %321 = vmatpush2.msra.mxu1 %v3177_v41  ;;  %v3210_v41 = vld [vmem:[#allocation2 + $0x308] sm:$0xff]  ;;  %5357 = vst [vmem:[#allocation68_spill] sm:$0xff] %v3261_v14  ;;  %v3267_v13 = vld [vmem:[#allocation2 + $0x2d8] sm:$0xff]  ;;  %v3273_v11 = vld [vmem:[#allocation2 + $0x2d0] sm:$0xff] }
  0x35   :  { %251 = vmatprep.subr.mxu0 %v3150_v57  ;;  %322 = vmatprep.subr.mxu1 %v3183_v39  ;;  %v3216_v39 = vld [vmem:[#allocation2 + $0x300] sm:$0xff]  ;;  %5359 = vst [vmem:[#allocation70_spill] sm:$0xff] %v3267_v13  ;;  %5361 = vst [vmem:[#allocation72_spill] sm:$0xff] %v3273_v11  ;;  %v3279_v9 = vld [vmem:[#allocation2 + $0x2b8] sm:$0xff] }
  0x36   :  { %252 = vmatpush2.msra.mxu0 %v3156_v59  ;;  %323 = vmatpush2.msra.mxu1 %v3189_v37  ;;  %v3222_v37 = vld [vmem:[#allocation2 + $0x2e8] sm:$0xff]  ;;  %5363 = vst [vmem:[#allocation74_spill] sm:$0xff] %v3279_v9 }
  0x37   :  { %253 = vmatprep.subr.mxu0 %v3162_v61  ;;  %324 = vmatprep.subr.mxu1 %v3195_v35  ;;  %5344 = vst [vmem:[#allocation55_spill] sm:$0xff] %v3222_v37  ;;  %v3228_v35 = vld [vmem:[#allocation2 + $0x2e0] sm:$0xff] }
  0x38   :  { %254 = vmatpush2.msra.mxu0 %v3168_v63  ;;  %325 = vmatpush2.msra.mxu1 %v3201_v33  ;;  %5346 = vst [vmem:[#allocation57_spill] sm:$0xff] %v3228_v35  ;;  %v3234_v33 = vld [vmem:[#allocation2 + $0x2c8] sm:$0xff] }
  0x39   :  { %255 = vmatprep.subr.mxu0 %v3174_v53  ;;  %326 = vmatprep.subr.mxu1 %v3207_v31  ;;  %5348 = vst [vmem:[#allocation59_spill] sm:$0xff] %v3234_v33  ;;  %v3240_v31 = vld [vmem:[#allocation2 + $0x2c0] sm:$0xff] }
  0x3a   :  { %256 = vmatpush2.msra.mxu0 %v3180_v51  ;;  %327 = vmatpush2.msra.mxu1 %v3213_v29  ;;  %5350 = vst [vmem:[#allocation61_spill] sm:$0xff] %v3240_v31  ;;  %v3246_v29 = vld [vmem:[#allocation2 + $0x2a8] sm:$0xff] }
  0x3b   :  { %257 = vmatprep.subr.mxu0 %v3186_v49  ;;  %328 = vmatprep.subr.mxu1 %v3219_v27  ;;  %5352 = vst [vmem:[#allocation63_spill] sm:$0xff] %v3246_v29  ;;  %v3252_v27 = vld [vmem:[#allocation2 + $0x2a0] sm:$0xff] }
  0x3c   :  { %258 = vmatpush2.msra.mxu0 %v3192_v47  ;;  %329 = vmatpush2.msra.mxu1 %v3225_v25  ;;  %5354 = vst [vmem:[#allocation65_spill] sm:$0xff] %v3252_v27  ;;  %v3258_v25 = vld [vmem:[#allocation2 + $0x288] sm:$0xff] }
  0x3d   :  { %259 = vmatprep.subr.mxu0 %v3198_v45  ;;  %330 = vmatprep.subr.mxu1 %v3231_v23  ;;  %5356 = vst [vmem:[#allocation67_spill] sm:$0xff] %v3258_v25  ;;  %v3264_v23 = vld [vmem:[#allocation2 + $0x280] sm:$0xff] }
  0x3e   :  { %260 = vmatpush2.msra.mxu0 %v3204_v43  ;;  %331 = vmatpush2.msra.mxu1 %v3237_v21  ;;  %5358 = vst [vmem:[#allocation69_spill] sm:$0xff] %v3264_v23  ;;  %v3270_v21 = vld [vmem:[#allocation2 + $0x268] sm:$0xff] }
  0x3f   :  { %261 = vmatprep.subr.mxu0 %v3210_v41  ;;  %332 = vmatprep.subr.mxu1 %v3243_v19  ;;  %5360 = vst [vmem:[#allocation71_spill] sm:$0xff] %v3270_v21  ;;  %v3276_v19 = vld [vmem:[#allocation2 + $0x260] sm:$0xff] }
  0x40   :  { %262 = vmatpush2.msra.mxu0 %v3216_v39  ;;  %333 = vmatpush2.msra.mxu1 %v3249_v18  ;;  %5362 = vst [vmem:[#allocation73_spill] sm:$0xff] %v3276_v19  ;;  %v3282_v18 = vld [vmem:[#allocation2 + $0x248] sm:$0xff] }
  0x41   :  { %263 = vmatprep.subr.mxu0 %v3222_v37  ;;  %334 = vmatprep.subr.mxu1 %v3255_v16  ;;  %5364 = vst [vmem:[#allocation75_spill] sm:$0xff] %v3282_v18  ;;  %v3288_v16 = vld [vmem:[#allocation2 + $0x240] sm:$0xff] }
  0x42   :  { %264 = vmatpush2.msra.mxu0 %v3228_v35  ;;  %335 = vmatpush2.msra.mxu1 %v3261_v14  ;;  %5366 = vst [vmem:[#allocation77_spill] sm:$0xff] %v3288_v16  ;;  %v3294_v14 = vld [vmem:[#allocation2 + $0x228] sm:$0xff] }
  0x43   :  { %265 = vmatprep.subr.mxu0 %v3234_v33  ;;  %336 = vmatprep.subr.mxu1 %v3267_v13  ;;  %5368 = vst [vmem:[#allocation79_spill] sm:$0xff] %v3294_v14  ;;  %v3300_v13 = vld [vmem:[#allocation2 + $0x220] sm:$0xff] }
  0x44   :  { %266 = vmatpush2.msra.mxu0 %v3240_v31  ;;  %337 = vmatpush2.msra.mxu1 %v3273_v11  ;;  %5370 = vst [vmem:[#allocation81_spill] sm:$0xff] %v3300_v13  ;;  %v3306_v11 = vld [vmem:[#allocation2 + $0x208] sm:$0xff] }
  0x45   :  { %267 = vmatprep.subr.mxu0 %v3246_v29  ;;  %338 = vmatprep.subr.mxu1 %v3279_v9  ;;  %5372 = vst [vmem:[#allocation83_spill] sm:$0xff] %v3306_v11  ;;  %v3312_v9 = vld [vmem:[#allocation2 + $0x200] sm:$0xff] }
  0x46   :  { %268 = vmatpush2.msra.mxu0 %v3252_v27  ;;  %v3285_v27 = vld [vmem:[#allocation2 + $0x2b0] sm:$0xff]  ;;  %5373 = vst [vmem:[#allocation84_spill] sm:$0xff] %v3312_v9 }
  0x47   :  { %269 = vmatprep.subr.mxu0 %v3258_v25  ;;  %5365 = vst [vmem:[#allocation76_spill] sm:$0xff] %v3285_v27  ;;  %v3291_v25 = vld [vmem:[#allocation2 + $0x298] sm:$0xff]  ;;  %339 = vmatpush2.msra.mxu1 %v3285_v27  ;;  %v3319_v27 = vld [vmem:[#allocation2 + $0x250] sm:$0xff] }
  0x48   :  { %270 = vmatpush2.msra.mxu0 %v3264_v23  ;;  %5367 = vst [vmem:[#allocation78_spill] sm:$0xff] %v3291_v25  ;;  %v3297_v23 = vld [vmem:[#allocation2 + $0x290] sm:$0xff]  ;;  %340 = vmatprep.subr.mxu1 %v3291_v25  ;;  %v3323_v25 = vld [vmem:[#allocation2 + $0x238] sm:$0xff] }
  0x49   :  { %271 = vmatprep.subr.mxu0 %v3270_v21  ;;  %5369 = vst [vmem:[#allocation80_spill] sm:$0xff] %v3297_v23  ;;  %v3303_v21 = vld [vmem:[#allocation2 + $0x278] sm:$0xff]  ;;  %341 = vmatpush2.msra.mxu1 %v3297_v23  ;;  %v5374_v23 = vmov 0.0  }
  0x4a   :  { %272 = vmatpush2.msra.mxu0 %v3276_v19  ;;  %5371 = vst [vmem:[#allocation82_spill] sm:$0xff] %v3303_v21  ;;  %v3309_v19 = vld [vmem:[#allocation2 + $0x270] sm:$0xff]  ;;  %342 = vmatprep.subr.mxu1 %v3303_v21 }
  0x4b   :  { %273 = vmatprep.subr.mxu0 %v3282_v18  ;;  %v3315_v18 = vld [vmem:[#allocation2 + $0x258] sm:$0xff]  ;;  %343 = vmatpush2.msra.mxu1 %v3309_v19  ;;  %v3334_v21 = vld [vmem:[#allocation2 + $0x210] sm:$0xff] }
  0x4c   :  { %274 = vmatpush2.msra.mxu0 %v3288_v16  ;;  %344 = vmatprep.subr.mxu1 %v3315_v18 }
  0x4d   :  { %275 = vmatprep.subr.mxu0 %v3294_v14  ;;  %v3327_v14 = vld [vmem:[#allocation2 + $0x230] sm:$0xff]  ;;  %345 = vmatpush2.msra.mxu1 %v3319_v27 }
  0x4e   :  { %276 = vmatpush2.msra.mxu0 %v3300_v13  ;;  %v3331_v13 = vld [vmem:[#allocation2 + $0x218] sm:$0xff]  ;;  %346 = vmatprep.subr.mxu1 %v3323_v25 }
  0x4f   :  { %277 = vmatprep.subr.mxu0 %v3306_v11  ;;  %347 = vmatpush2.msra.mxu1 %v3327_v14 }
  0x50   :  { %278 = vmatpush2.msra.mxu0 %v3312_v9  ;;  %348 = vmatprep.subr.mxu1 %v3331_v13 }
  0x51   :  { %280 = vmatmul.mubr.f32.vlgmr.msra.gmra.mxu0 %v5374_v23  ;;  %2176 = vmatprep.subr.mxu0 %v5374_v23 }
  0x52   :  { %349 = vmatpush2.msra.mxu1 %v3334_v21  ;;  %2208 = vmatprep.mubr.msk.f32.mxu0 %vm2895_vm0, %v5374_v23 }
  0x53   :  { %351 = vmatmul.mubr.f32.vlgmr.msra.gmra.mxu1 %v5374_v23  ;;  %520 = vmatprep.subr.mxu1 %v2954_v1 }
  0x54   :  { %521 = vmatpush1.msra.mxu1 %v2956_v2  ;;  %v5375_v2 = vld [vmem:[#allocation65_spill] sm:$0xff] }
  0x55   :  { %522 = vmatprep.subr.mxu1 %v2958_v3  ;;  %v5376_v3 = vld [vmem:[#allocation67_spill] sm:$0xff] }
  0x56   :  { %523 = vmatpush1.msra.mxu1 %v2961_v4  ;;  %v5377_v4 = vld [vmem:[#allocation69_spill] sm:$0xff] }
  0x57   :  { %524 = vmatprep.subr.mxu1 %v2964_v5  ;;  %v5378_v5 = vld [vmem:[#allocation71_spill] sm:$0xff] }
  0x58   :  { %525 = vmatpush1.msra.mxu1 %v2967_v6  ;;  %v5379_v6 = vld [vmem:[#allocation73_spill] sm:$0xff] }
  0x59   :  { %526 = vmatprep.subr.mxu1 %v2970_v7  ;;  %v5380_v7 = vld [vmem:[#allocation75_spill] sm:$0xff] }
  0x5a   :  { %527 = vmatpush1.msra.mxu1 %v2973_v8  ;;  %v5381_v8 = vld [vmem:[#allocation79_spill] sm:$0xff] }
  0x5b   :  { %528 = vmatprep.subr.mxu1 %v2978_v10  ;;  %v5382_v10 = vld [vmem:[#allocation81_spill] sm:$0xff] }
  0x5c   :  { %529 = vmatpush1.msra.mxu1 %v2984_v12  ;;  %v3409_v12 = vld [vmem:[%s5051_s4 + $0x78] sm:$0xff] }
  0x5d   :  { %530 = vmatprep.subr.mxu1 %v2992_v15  ;;  %2177 = vmatpush3.msra.mxu0 %v3409_v12  ;;  %v3416_v15 = vld [vmem:[%s5051_s4 + $0x70] sm:$0xff] }
  0x5e   :  { %531 = vmatpush1.msra.mxu1 %v2998_v17  ;;  %2178 = vmatprep.subr.mxu0 %v5374_v23  ;;  %v3423_v17 = vld [vmem:[%s5051_s4 + $0x68] sm:$0xff] }
  0x5f   :  { %532 = vmatprep.subr.mxu1 %v3006_v20  ;;  %2179 = vmatpush3.msra.mxu0 %v3416_v15  ;;  %v3430_v20 = vld [vmem:[%s5051_s4 + $0x60] sm:$0xff] }
  0x60   :  { %533 = vmatpush1.msra.mxu1 %v3012_v22  ;;  %2180 = vmatprep.subr.mxu0 %v5374_v23  ;;  %v3437_v22 = vld [vmem:[%s5051_s4 + $0x58] sm:$0xff] }
  0x61   :  { %534 = vmatprep.subr.mxu1 %v3018_v24  ;;  %2181 = vmatpush3.msra.mxu0 %v3423_v17  ;;  %v3444_v24 = vld [vmem:[%s5051_s4 + $0x50] sm:$0xff] }
  0x62   :  { %535 = vmatpush1.msra.mxu1 %v3024_v26  ;;  %2182 = vmatprep.subr.mxu0 %v5374_v23  ;;  %v3451_v26 = vld [vmem:[%s5051_s4 + $0x48] sm:$0xff] }
  0x63   :  { %536 = vmatprep.subr.mxu1 %v3030_v28  ;;  %2183 = vmatpush3.msra.mxu0 %v3430_v20  ;;  %v3458_v28 = vld [vmem:[%s5051_s4 + $0x40] sm:$0xff] }
  0x64   :  { %537 = vmatpush1.msra.mxu1 %v3036_v30  ;;  %2184 = vmatprep.subr.mxu0 %v5374_v23  ;;  %v3465_v30 = vld [vmem:[%s5051_s4 + $0x38] sm:$0xff] }
  0x65   :  { %538 = vmatprep.subr.mxu1 %v3042_v32  ;;  %2185 = vmatpush3.msra.mxu0 %v3437_v22  ;;  %v3470_v32 = vld [vmem:[%s5051_s4 + $0x30] sm:$0xff] }
  0x66   :  { %539 = vmatpush1.msra.mxu1 %v3048_v34  ;;  %2186 = vmatprep.subr.mxu0 %v5374_v23  ;;  %v3479_v34 = vld [vmem:[%s5051_s4 + $0x28] sm:$0xff] }
  0x67   :  { %540 = vmatprep.subr.mxu1 %v3054_v36  ;;  %2187 = vmatpush3.msra.mxu0 %v3444_v24  ;;  %v3486_v36 = vld [vmem:[%s5051_s4 + $0x20] sm:$0xff] }
  0x68   :  { %541 = vmatpush1.msra.mxu1 %v3060_v38  ;;  %2188 = vmatprep.subr.mxu0 %v5374_v23  ;;  %v3493_v38 = vld [vmem:[%s5051_s4 + $0x18] sm:$0xff] }
  0x69   :  { %542 = vmatprep.subr.mxu1 %v3066_v40  ;;  %2189 = vmatpush3.msra.mxu0 %v3451_v26  ;;  %v3500_v40 = vld [vmem:[%s5051_s4 + $0x10] sm:$0xff] }
  0x6a   :  { %543 = vmatpush1.msra.mxu1 %v3072_v42  ;;  %2190 = vmatprep.subr.mxu0 %v5374_v23  ;;  %v3507_v42 = vld [vmem:[%s5051_s4 + $0x8] sm:$0xff] }
  0x6b   :  { %544 = vmatprep.subr.mxu1 %v3078_v44  ;;  %2191 = vmatpush3.msra.mxu0 %v3458_v28  ;;  %v3514_v44 = vld [vmem:[%s5051_s4] sm:$0xff] }
  0x6c   :  { %545 = vmatpush1.msra.mxu1 %v3084_v46  ;;  %2192 = vmatprep.subr.mxu0 %v5374_v23  ;;  %v5383_v46 = vld [vmem:[#allocation12_spill] sm:$0xff] }
  0x6d   :  { %546 = vmatprep.subr.mxu1 %v3090_v48  ;;  %2193 = vmatpush3.msra.mxu0 %v3465_v30  ;;  %v5135_v48 = vlaneseq }
  0x6e   :  { %547 = vmatpush1.msra.mxu1 %v3096_v50  ;;  %2194 = vmatprep.subr.mxu0 %v5374_v23 }
  0x6f   :  { %548 = vmatprep.subr.mxu1 %v3102_v52  ;;  %2195 = vmatpush3.msra.mxu0 %v3470_v32  ;;  %v3521_v50 = vshrl.u32 %v5135_v48, 7 }
  0x70   :  { %549 = vmatpush1.msra.mxu1 %v3108_v54  ;;  %2196 = vmatprep.subr.mxu0 %v5374_v23 }
  0x71   :  { %550 = vmatprep.subr.mxu1 %v3114_v56  ;;  %2197 = vmatpush3.msra.mxu0 %v3479_v34  ;;  %v3524_v52 = vsub.s32 0, %v3521_v50  ;;  %v209_v48 = vsub.s32 3, %v3521_v50 }
  0x72   :  { %551 = vmatpush1.msra.mxu1 %v3120_v58  ;;  %2198 = vmatprep.subr.mxu0 %v5374_v23 }
  0x73   :  { %552 = vmatprep.subr.mxu1 %v3126_v60  ;;  %2199 = vmatpush3.msra.mxu0 %v3486_v36 }
  0x74   :  { %553 = vmatpush2.msra.mxu1 %v3132_v62  ;;  %2200 = vmatprep.subr.mxu0 %v5374_v23 }
  0x75   :  { %554 = vmatprep.subr.mxu1 %v3138_v0  ;;  %2201 = vmatpush3.msra.mxu0 %v3493_v38 }
  0x76   :  { %555 = vmatpush2.msra.mxu1 %v3144_v55  ;;  %2202 = vmatprep.subr.mxu0 %v5374_v23 }
  0x77   :  { %556 = vmatprep.subr.mxu1 %v3150_v57  ;;  %2203 = vmatpush3.msra.mxu0 %v3500_v40 }
  0x78   :  { %557 = vmatpush2.msra.mxu1 %v3156_v59  ;;  %2204 = vmatprep.subr.mxu0 %v5374_v23 }
  0x79   :  { %558 = vmatprep.subr.mxu1 %v3162_v61  ;;  %2205 = vmatpush3.msra.mxu0 %v3507_v42 }
  0x7a   :  { %559 = vmatpush2.msra.mxu1 %v3168_v63  ;;  %2206 = vmatprep.subr.mxu0 %v5374_v23 }
  0x7b   :  { %560 = vmatprep.subr.mxu1 %v3174_v53  ;;  %2207 = vmatpush3.msra.mxu0 %v3514_v44 }
  0x7c   :  { %561 = vmatpush2.msra.mxu1 %v3180_v51  ;;  %591 = vmatprep.subr.mxu0 %v5383_v46 }
  0x7d   :  { %562 = vmatprep.subr.mxu1 %v3186_v49 }
  0x7e   :  { %563 = vmatpush2.msra.mxu1 %v3192_v47 }
  0x7f   :  { %564 = vmatprep.subr.mxu1 %v3198_v45 }
  0x80   :  { %565 = vmatpush2.msra.mxu1 %v3204_v43 }
  0x81   :  { %566 = vmatprep.subr.mxu1 %v3210_v41 }
  0x82   :  { %567 = vmatpush2.msra.mxu1 %v3216_v39 }
  0x83   :  { %568 = vmatprep.subr.mxu1 %v3222_v37 }
  0x84   :  { %569 = vmatpush2.msra.mxu1 %v3228_v35  ;;  %v205_v35 = vsub.s32 2, %v3521_v50 }
  0x85   :  { %570 = vmatprep.subr.mxu1 %v3234_v33 }
  0x86   :  { %571 = vmatpush2.msra.mxu1 %v3240_v31 }
  0x87   :  { %572 = vmatprep.subr.mxu1 %v3246_v29 }
  0x88   :  { %573 = vmatpush2.msra.mxu1 %v5375_v2 }
  0x89   :  { %574 = vmatprep.subr.mxu1 %v5376_v3 }
  0x8a   :  { %575 = vmatpush2.msra.mxu1 %v5377_v4 }
  0x8b   :  { %576 = vmatprep.subr.mxu1 %v5378_v5 }
  0x8c   :  { %577 = vmatpush2.msra.mxu1 %v5379_v6 }
  0x8d   :  { %578 = vmatprep.subr.mxu1 %v5380_v7 }
  0x8e   :  { %579 = vmatpush2.msra.mxu1 %v3288_v16 }
  0x8f   :  { %580 = vmatprep.subr.mxu1 %v5381_v8 }
  0x90   :  { %581 = vmatpush2.msra.mxu1 %v5382_v10 }
  0x91   :  { %582 = vmatprep.subr.mxu1 %v3306_v11  ;;  %v201_v11 = vsub.s32 1, %v3521_v50 }
  0x92   :  { %583 = vmatpush2.msra.mxu1 %v3312_v9  ;;  %v172_v9 = vld [vmem:[%s5050_s3] sm:$0xf] }
  0x93   :  { %2211 = vmatprep.subr.mxu1 %v5374_v23  ;;  %v3531_v10 = vrot.slane %v172_v9, %v3524_v52  ;;  %v3533_v8 = vrot.slane %v172_v9, %v201_v11  ;;  %v3538_v29 = vrot.slane %v172_v9, %v209_v48 }
  0x95   :  { %5384 = vst [vmem:[#allocation12_spill] sm:$0xff] %v3531_v10  ;;  %5385 = vst [vmem:[#allocation85_spill] sm:$0xff] %v3533_v8 }
  0x96   :  { %5386 = vst [vmem:[#allocation86_spill] sm:$0xff] %v3538_v29 }
 0x111   :  { %v281_v16 = vpop.f32.mrf.mxu0 }
 0x112   :  { %v282_v46 = vadd.f32 %v281_v16, %v3531_v10  ;;  %v3542_v10 = vrot.slane %v172_v9, %v205_v35 }
 0x113   :  { %v283_v7 = vpop.f32.mrf.mxu0  ;;  %v352_v2 = vpop.f32.mrf.mxu1 }
 0x114   :  { %v357_v6 = vsub.f32 0.0, %v282_v46  ;;  %v284_v5 = vadd.f32 %v283_v7, %v3533_v8  ;;  %v353_v7 = vadd.f32 %v352_v2, %v3542_v10 }
 0x115   :  { %v354_v33 = vpop.f32.mrf.mxu1 }
 0x116   :  { %v358_v4 = vmul.f32 1.442695, %v357_v6  ;;  %v363_v3 = vsub.f32 0.0, %v284_v5  ;;  %v355_v11 = vadd.f32 %v354_v33, %v3538_v29 }
 0x118   :  { %2394 = vpow2.f32 %v358_v4  ;;  %v364_v31 = vmul.f32 1.442695, %v363_v3  ;;  %v370_v16 = vsub.f32 0.0, %v355_v11 }
 0x11a   :  { %2396 = vpow2.f32 %v364_v31  ;;  %v371_v37 = vmul.f32 1.442695, %v370_v16 }
 0x11c   :  { %2398 = vpow2.f32 %v371_v37  ;;  %v5387_v37 = vld [vmem:[#allocation13_spill] sm:$0xff] }
 0x125   :  { %v2395_v46 = vpop.eup %2394 }
 0x126   :  { %v360_v6 = vadd.f32 1.0, %v2395_v46  ;;  %v5388_v46 = vld [vmem:[#allocation14_spill] sm:$0xff] }
 0x127   :  { %v2397_v5 = vpop.eup %2396 }
 0x128   :  { %2400 = vrcp.f32 %v360_v6  ;;  %v366_v48 = vadd.f32 1.0, %v2397_v5  ;;  %v5390_v6 = vld [vmem:[#allocation16_spill] sm:$0xff]  ;;  %v5391_v5 = vld [vmem:[#allocation17_spill] sm:$0xff] }
 0x129   :  { %2402 = vtanh.f32 %v353_v7  ;;  %v2399_v3 = vpop.eup %2398  ;;  %v5389_v7 = vld [vmem:[#allocation15_spill] sm:$0xff] }
 0x12a   :  { %2404 = vrcp.f32 %v366_v48  ;;  %v373_v29 = vadd.f32 1.0, %v2399_v3  ;;  %v5394_v48 = vld [vmem:[#allocation20_spill] sm:$0xff]  ;;  %v5395_v3 = vld [vmem:[#allocation21_spill] sm:$0xff] }
 0x12c   :  { %2406 = vrcp.f32 %v373_v29  ;;  %v5393_v29 = vld [vmem:[#allocation19_spill] sm:$0xff] }
 0x135   :  { %v2401_v31 = vpop.eup %2400 }
 0x136   :  { %v2403_v4 = vpop.eup %2402 }
 0x137   :  { %v2405_v33 = vpop.eup %2404  ;;  %v377_v11 = vmul.f32 %v2403_v4, %v2401_v31  ;;  %v5396_v31 = vld [vmem:[#allocation22_spill] sm:$0xff]  ;;  %v5397_v4 = vld [vmem:[#allocation23_spill] sm:$0xff] }
 0x138   :  { %v376_v8 = vmul.f32 0.0, %v2405_v33  ;;  %v5398_v33 = vld [vmem:[#allocation24_spill] sm:$0xff] }
 0x139   :  { %v2407_v35 = vpop.eup %2406 }
 0x13a   :  { %v3545_v9 = vadd.f32 %v377_v11, %v376_v8  ;;  %v5392_v8 = vld [vmem:[#allocation18_spill] sm:$0xff]  ;;  %v5399_v11 = vld [vmem:[#allocation25_spill] sm:$0xff] }
 0x13c   :  { %2408 = vtanh.f32 %v3545_v9 }
 0x149   :  { %v2409_v2 = vpop.eup %2408 }
 0x14a   :  { %v380_v16 = vmul.f32 %v2409_v2, %v2407_v35  ;;  %v5400_v35 = vld [vmem:[#allocation26_spill] sm:$0xff]  ;;  %v5401_v2 = vld [vmem:[#allocation27_spill] sm:$0xff] }
 0x14c   :  { %2209 = vmatmul.mubr.f32.vlgmr.msra.gmra.mxu0 %v380_v16  ;;  %584 = vmatprep.mubr.f32.mxu1 %v380_v16 }
 0x14d   :  { %655 = vmatprep.mubr.f32.mxu0 %v380_v16  ;;  %592 = vmatpush1.msra.mxu0 %v5387_v37  ;;  %v5402_v16 = vld [vmem:[#allocation28_spill] sm:$0xff]  ;;  %v5403_v37 = vld [vmem:[#allocation29_spill] sm:$0xff] }
 0x14e   :  { %593 = vmatprep.subr.mxu0 %v5388_v46  ;;  %v5404_v46 = vld [vmem:[#allocation30_spill] sm:$0xff] }
 0x14f   :  { %594 = vmatpush1.msra.mxu0 %v5389_v7  ;;  %v5405_v7 = vld [vmem:[#allocation31_spill] sm:$0xff] }
 0x150   :  { %595 = vmatprep.subr.mxu0 %v5390_v6  ;;  %v5406_v6 = vld [vmem:[#allocation32_spill] sm:$0xff] }
 0x151   :  { %596 = vmatpush1.msra.mxu0 %v5391_v5  ;;  %v5407_v5 = vld [vmem:[#allocation33_spill] sm:$0xff] }
 0x152   :  { %597 = vmatprep.subr.mxu0 %v5392_v8  ;;  %v5408_v8 = vld [vmem:[#allocation34_spill] sm:$0xff] }
 0x153   :  { %598 = vmatpush1.msra.mxu0 %v5393_v29  ;;  %v5409_v29 = vld [vmem:[#allocation35_spill] sm:$0xff] }
 0x154   :  { %599 = vmatprep.subr.mxu0 %v5394_v48  ;;  %v5410_v48 = vld [vmem:[#allocation36_spill] sm:$0xff] }
 0x155   :  { %600 = vmatpush1.msra.mxu0 %v5395_v3  ;;  %v5411_v3 = vld [vmem:[#allocation37_spill] sm:$0xff] }
 0x156   :  { %601 = vmatprep.subr.mxu0 %v5396_v31  ;;  %v5412_v31 = vld [vmem:[#allocation38_spill] sm:$0xff] }
 0x157   :  { %602 = vmatpush1.msra.mxu0 %v5397_v4  ;;  %v5413_v4 = vld [vmem:[#allocation39_spill] sm:$0xff] }
 0x158   :  { %603 = vmatprep.subr.mxu0 %v5398_v33  ;;  %v5414_v33 = vld [vmem:[#allocation40_spill] sm:$0xff] }
 0x159   :  { %604 = vmatpush1.msra.mxu0 %v5399_v11  ;;  %v5415_v11 = vld [vmem:[#allocation41_spill] sm:$0xff] }
 0x15a   :  { %605 = vmatprep.subr.mxu0 %v5400_v35  ;;  %v5416_v35 = vld [vmem:[#allocation42_spill] sm:$0xff] }
 0x15b   :  { %606 = vmatpush1.msra.mxu0 %v5401_v2  ;;  %v5417_v2 = vld [vmem:[#allocation43_spill] sm:$0xff] }
 0x15c   :  { %607 = vmatprep.subr.mxu0 %v5402_v16  ;;  %v5418_v16 = vld [vmem:[#allocation44_spill] sm:$0xff] }
 0x15d   :  { %608 = vmatpush1.msra.mxu0 %v5403_v37  ;;  %v5419_v37 = vld [vmem:[#allocation45_spill] sm:$0xff] }
 0x15e   :  { %609 = vmatprep.subr.mxu0 %v5404_v46  ;;  %v5420_v46 = vld [vmem:[#allocation46_spill] sm:$0xff] }
 0x15f   :  { %610 = vmatpush1.msra.mxu0 %v5405_v7  ;;  %v5421_v7 = vld [vmem:[#allocation47_spill] sm:$0xff] }
 0x160   :  { %611 = vmatprep.subr.mxu0 %v5406_v6  ;;  %v5422_v6 = vld [vmem:[#allocation48_spill] sm:$0xff] }
 0x161   :  { %612 = vmatpush1.msra.mxu0 %v5407_v5  ;;  %v5423_v5 = vld [vmem:[#allocation49_spill] sm:$0xff] }
 0x162   :  { %613 = vmatprep.subr.mxu0 %v5408_v8  ;;  %v5424_v8 = vld [vmem:[#allocation50_spill] sm:$0xff] }
 0x163   :  { %614 = vmatpush1.msra.mxu0 %v5409_v29  ;;  %v5425_v29 = vld [vmem:[#allocation51_spill] sm:$0xff] }
 0x164   :  { %615 = vmatprep.subr.mxu0 %v5410_v48  ;;  %v5426_v48 = vld [vmem:[#allocation52_spill] sm:$0xff] }
 0x165   :  { %616 = vmatpush1.msra.mxu0 %v5411_v3  ;;  %v5427_v3 = vld [vmem:[#allocation53_spill] sm:$0xff] }
 0x166   :  { %617 = vmatprep.subr.mxu0 %v5412_v31  ;;  %v5428_v31 = vld [vmem:[#allocation54_spill] sm:$0xff] }
 0x167   :  { %618 = vmatpush1.msra.mxu0 %v5413_v4  ;;  %v5429_v4 = vld [vmem:[#allocation56_spill] sm:$0xff] }
 0x168   :  { %619 = vmatprep.subr.mxu0 %v5414_v33  ;;  %v5430_v33 = vld [vmem:[#allocation58_spill] sm:$0xff] }
 0x169   :  { %620 = vmatpush1.msra.mxu0 %v5415_v11  ;;  %v5431_v11 = vld [vmem:[#allocation60_spill] sm:$0xff] }
 0x16a   :  { %621 = vmatprep.subr.mxu0 %v5416_v35  ;;  %v5432_v35 = vld [vmem:[#allocation62_spill] sm:$0xff] }
 0x16b   :  { %622 = vmatpush1.msra.mxu0 %v5417_v2  ;;  %v5433_v2 = vld [vmem:[#allocation64_spill] sm:$0xff] }
 0x16c   :  { %623 = vmatprep.subr.mxu0 %v5418_v16  ;;  %v5434_v16 = vld [vmem:[#allocation66_spill] sm:$0xff] }
 0x16d   :  { %624 = vmatpush2.msra.mxu0 %v5419_v37  ;;  %v5435_v37 = vld [vmem:[#allocation68_spill] sm:$0xff] }
 0x16e   :  { %625 = vmatprep.subr.mxu0 %v5420_v46  ;;  %v5436_v46 = vld [vmem:[#allocation70_spill] sm:$0xff] }
 0x16f   :  { %626 = vmatpush2.msra.mxu0 %v5421_v7  ;;  %v5437_v7 = vld [vmem:[#allocation72_spill] sm:$0xff] }
 0x170   :  { %627 = vmatprep.subr.mxu0 %v5422_v6  ;;  %v5438_v6 = vld [vmem:[#allocation74_spill] sm:$0xff] }
 0x171   :  { %628 = vmatpush2.msra.mxu0 %v5423_v5  ;;  %v5439_v5 = vld [vmem:[#allocation76_spill] sm:$0xff] }
 0x172   :  { %629 = vmatprep.subr.mxu0 %v5424_v8  ;;  %v5440_v8 = vld [vmem:[#allocation78_spill] sm:$0xff] }
 0x173   :  { %630 = vmatpush2.msra.mxu0 %v5425_v29  ;;  %v5441_v29 = vld [vmem:[#allocation80_spill] sm:$0xff] }
 0x174   :  { %631 = vmatprep.subr.mxu0 %v5426_v48  ;;  %v5442_v48 = vld [vmem:[#allocation82_spill] sm:$0xff] }
 0x175   :  { %632 = vmatpush2.msra.mxu0 %v5427_v3  ;;  %v3615_v3 = vld [vmem:[%s5052_s5] sm:$0x1] }
 0x176   :  { %633 = vmatprep.subr.mxu0 %v5428_v31 }
 0x177   :  { %634 = vmatpush2.msra.mxu0 %v5429_v4 }
 0x178   :  { %635 = vmatprep.subr.mxu0 %v5430_v33 }
 0x179   :  { %636 = vmatpush2.msra.mxu0 %v5431_v11 }
 0x17a   :  { %637 = vmatprep.subr.mxu0 %v5432_v35 }
 0x17b   :  { %638 = vmatpush2.msra.mxu0 %v5433_v2 }
 0x17c   :  { %639 = vmatprep.subr.mxu0 %v5434_v16 }
 0x17d   :  { %640 = vmatpush2.msra.mxu0 %v5435_v37 }
 0x17e   :  { %641 = vmatprep.subr.mxu0 %v5436_v46 }
 0x17f   :  { %642 = vmatpush2.msra.mxu0 %v5437_v7 }
 0x180   :  { %643 = vmatprep.subr.mxu0 %v5438_v6 }
 0x181   :  { %644 = vmatpush2.msra.mxu0 %v5439_v5 }
 0x182   :  { %645 = vmatprep.subr.mxu0 %v5440_v8 }
 0x183   :  { %646 = vmatpush2.msra.mxu0 %v5441_v29  ;;  %v466_v29 = vld [vmem:[%s5047_s0] sm:$0x1] }
 0x184   :  { %647 = vmatprep.subr.mxu0 %v5442_v48 }
 0x185   :  { %648 = vmatpush2.msra.mxu0 %v3309_v19 }
 0x186   :  { %649 = vmatprep.subr.mxu0 %v3315_v18 }
 0x187   :  { %650 = vmatpush2.msra.mxu0 %v3319_v27 }
 0x188   :  { %651 = vmatprep.subr.mxu0 %v3323_v25 }
 0x189   :  { %652 = vmatpush2.msra.mxu0 %v3327_v14 }
 0x18a   :  { %653 = vmatprep.subr.mxu0 %v3331_v13 }
 0x18b   :  { %654 = vmatpush2.msra.mxu0 %v3334_v21 }
 0x18c   :  { %822 = vmatprep.subr.mxu0 %v2954_v1 }
 0x20c   :  { %v447_v31 = vpop.f32.mrf.mxu0 }
 0x20d   :  { %v448_v4 = vadd.f32 %v447_v31, %v3615_v3 }
 0x20e   :  { %v2210_v33 = vpop.f32.mrf.mxu0 }
 0x20f   :  { %v452_v11 = vsel %vm451_vm1, %v448_v4, -inf  ;;  %v5445_v33 = vlaneseq }
 0x210   :  { %453 = vmax.xlane.f32.xlu0 %v452_v11 }
 0x211   :  { %v3632_v11 = vand.u32 127, %v5445_v33 }
 0x299   :  { %v454_v35 = vpop.xlane.xlu0 %453 }
 0x29a   :  { %v455_v2 = vsub.f32 %v448_v4, %v454_v35 }
 0x29c   :  { %v456_v16 = vmul.f32 1.442695, %v455_v2 }
 0x29e   :  { %2410 = vpow2.f32 %v456_v16 }
 0x2ab   :  { %v2411_v37 = vpop.eup %2410 }
 0x2ac   :  { %v458_v1 = vsel %vm451_vm1, %v2411_v37, 0.0 }
 0x2ad   :  { %459 = vadd.xlane.f32.xlu0 %v458_v1 }
 0x336   :  { %v460_v46 = vpop.xlane.xlu0 %459 }
 0x337   :  { %2412 = vrcp.f32 %v460_v46 }
 0x338   :  { %2414 = vlog2.f32 %v460_v46 }
 0x344   :  { %v2413_v7 = vpop.eup %2412 }
 0x345   :  { %v2415_v6 = vpop.eup %2414  ;;  %v3620_v5 = vmul.f32 %v2413_v7, %v2411_v37 }
 0x346   :  { %v464_v8 = vmul.f32 0.6931472, %v2415_v6 }
 0x347   :  { %5443 = vst [vmem:[#allocation13_spill] sm:$0xff] %v3620_v5  ;;  %501 = vst.msk [vmem:[#allocation5] sm:$0x1] %vm451_vm1, %v3620_v5 }
 0x348   :  { %v3627_v48 = vsub.f32 %v455_v2, %v464_v8 }
 0x34a   :  { %5444 = vst [vmem:[#allocation14_spill] sm:$0xff] %v3627_v48  ;;  %v467_v31 = vadd.f32 %v466_v29, %v3627_v48 }
 0x34c   :  { %v468_v4 = vsel %vm451_vm1, %v467_v31, -inf }
 0x34d   :  { %469 = vmax.xlane.f32.xlu1 %v468_v4 }
 0x3d6   :  { %v470_v35 = vpop.xlane.xlu1 %469 }
 0x3d7   :  { %vm471_vm2 = vcmp.eq.f32.partialorder %v467_v31, %v470_v35  ;;  %v3648_v35 = vld [vmem:[%s5048_s1] sm:$0x7f] }
 0x3d8   :  { %v472_v16 = vsel %vm471_vm2, %v3632_v11, 7 }
 0x3d9   :  { %v473_v37 = vsel %vm451_vm1, %v472_v16, 2147483647 }
 0x3da   :  { %v475_v1 = vshra.s32 %v473_v37, 16  ;;  %v474_v7 = vand.u32 65535, %v473_v37 }
 0x3dc   :  { %v477_v46 = vcvt.s32.f32 %v475_v1  ;;  %v476_v6 = vcvt.s32.f32 %v474_v7 }
 0x3de   :  { %478 = vmin.xlane.f32.xlu1 %v477_v46 }
 0x467   :  { %v479_v2 = vpop.xlane.xlu1 %478 }
 0x468   :  { %vm480_vm3 = vcmp.eq.f32.partialorder %v477_v46, %v479_v2  ;;  %v485_v29 = vcvt.f32.s32 %v479_v2 }
 0x469   :  { %v481_v8 = vsel %vm480_vm3, %v476_v6, inf }
 0x46a   :  { %482 = vmin.xlane.f32.xlu0 %v481_v8  ;;  %v486_v48 = vshll.u32 %v485_v29, 16  ;;  %v3658_v29 = vld [vmem:[#allocation2 + $0x1e0] sm:$0xff] }
 0x4f3   :  { %v483_v4 = vpop.xlane.xlu0 %482 }
 0x4f4   :  { %v484_v33 = vcvt.f32.s32 %v483_v4  ;;  %v3662_v4 = vld [vmem:[#allocation2 + $0x1c8] sm:$0xff] }
 0x4f6   :  { %v3636_v5 = vadd.s32 %v486_v48, %v484_v33  ;;  %v3666_v33 = vld [vmem:[#allocation2 + $0x1c0] sm:$0xff] }
 0x4f8   :  { %5446 = vst [vmem:[#allocation15_spill] sm:$0xff] %v3636_v5  ;;  %503 = vst.msk [vmem:[%s5054_s7] sm:$0x1] %vm502_vm4, %v3636_v5  ;;  %v507_v31 = vrot.slane %v3636_v5, %v3524_v52  ;;  %v3710_v5 = vld [vmem:[#allocation2 + $0x108] sm:$0xff] }
 0x4f9   :  { %5450 = vst [vmem:[#allocation19_spill] sm:$0xff] %v3710_v5 }
 0x4fa   :  { %vm508_vm5 = vcmp.eq.s32.totalorder %v3521_v50, %v507_v31  ;;  %v3670_v31 = vld [vmem:[#allocation2 + $0x1a8] sm:$0xff] }
 0x4fb   :  { %v2064_v16 = vsel %vm508_vm5, 1.0, %v5374_v23 }
 0x4fc   :  { %v511_v48 = vmul.f32 %v2064_v16, %v3648_v35  ;;  %v3674_v16 = vld [vmem:[#allocation2 + $0x1a0] sm:$0xff] }
 0x4fe   :  { %v513_v37 = vsel %vm512_vm6, %v511_v48, 0.0  ;;  %v3678_v48 = vld [vmem:[#allocation2 + $0x188] sm:$0xff] }
 0x4ff   :  { %v514_v1 = vrot.slane %v513_v37, 4 }
 0x501   :  { %v515_v46 = vadd.f32 %v514_v1, %v513_v37  ;;  %v3682_v37 = vld [vmem:[#allocation2 + $0x180] sm:$0xff]  ;;  %v3686_v1 = vld [vmem:[#allocation2 + $0x168] sm:$0xff] }
 0x503   :  { %v516_v7 = vrot.slane %v515_v46, 2 }
 0x505   :  { %v517_v2 = vadd.f32 %v516_v7, %v515_v46  ;;  %v3690_v46 = vld [vmem:[#allocation2 + $0x160] sm:$0xff]  ;;  %v3694_v7 = vld [vmem:[#allocation2 + $0x148] sm:$0xff] }
 0x507   :  { %v518_v6 = vrot.slane %v517_v2, 1 }
 0x509   :  { %v519_v8 = vadd.f32 %v518_v6, %v517_v2  ;;  %v3698_v2 = vld [vmem:[#allocation2 + $0x140] sm:$0xff]  ;;  %v3702_v6 = vld [vmem:[#allocation2 + $0x128] sm:$0xff] }
 0x50a   :  { %5447 = vst [vmem:[#allocation16_spill] sm:$0xff] %v3698_v2  ;;  %5448 = vst [vmem:[#allocation17_spill] sm:$0xff] %v3702_v6 }
 0x50b   :  { %585 = vmatmul.mubr.f32.vlgmr.msra.gmra.mxu1 %v519_v8  ;;  %656 = vmatmul.mubr.f32.vlgmr.msra.gmra.mxu0 %v519_v8  ;;  %v3706_v8 = vld [vmem:[#allocation2 + $0x120] sm:$0xff] }
 0x50c   :  { %2212 = vmatpush3.msra.mxu1 %v3409_v12  ;;  %2243 = vmatprep.mubr.msk.f32.mxu1 %vm2895_vm0, %v5374_v23  ;;  %5449 = vst [vmem:[#allocation18_spill] sm:$0xff] %v3706_v8 }
 0x50d   :  { %2213 = vmatprep.subr.mxu1 %v5374_v23  ;;  %823 = vmatpush1.msra.mxu0 %v3658_v29 }
 0x50e   :  { %2214 = vmatpush3.msra.mxu1 %v3416_v15  ;;  %824 = vmatprep.subr.mxu0 %v3662_v4 }
 0x50f   :  { %2215 = vmatprep.subr.mxu1 %v5374_v23  ;;  %825 = vmatpush1.msra.mxu0 %v3666_v33 }
 0x510   :  { %2216 = vmatpush3.msra.mxu1 %v3423_v17  ;;  %826 = vmatprep.subr.mxu0 %v3670_v31 }
 0x511   :  { %2217 = vmatprep.subr.mxu1 %v5374_v23  ;;  %827 = vmatpush1.msra.mxu0 %v3674_v16 }
 0x512   :  { %2218 = vmatpush3.msra.mxu1 %v3430_v20  ;;  %828 = vmatprep.subr.mxu0 %v3678_v48 }
 0x513   :  { %2219 = vmatprep.subr.mxu1 %v5374_v23  ;;  %829 = vmatpush1.msra.mxu0 %v3682_v37 }
 0x514   :  { %2220 = vmatpush3.msra.mxu1 %v3437_v22  ;;  %830 = vmatprep.subr.mxu0 %v3686_v1 }
 0x515   :  { %2221 = vmatprep.subr.mxu1 %v5374_v23  ;;  %831 = vmatpush1.msra.mxu0 %v3690_v46 }
 0x516   :  { %2222 = vmatpush3.msra.mxu1 %v3444_v24  ;;  %832 = vmatprep.subr.mxu0 %v3694_v7 }
 0x517   :  { %2223 = vmatprep.subr.mxu1 %v5374_v23  ;;  %833 = vmatpush1.msra.mxu0 %v3698_v2  ;;  %v3714_v2 = vld [vmem:[#allocation2 + $0x100] sm:$0xff] }
 0x518   :  { %2224 = vmatpush3.msra.mxu1 %v3451_v26  ;;  %834 = vmatprep.subr.mxu0 %v3702_v6  ;;  %5451 = vst [vmem:[#allocation20_spill] sm:$0xff] %v3714_v2  ;;  %v3718_v6 = vld [vmem:[#allocation2 + $0xe8] sm:$0xff] }
 0x519   :  { %2225 = vmatprep.subr.mxu1 %v5374_v23  ;;  %835 = vmatpush1.msra.mxu0 %v3706_v8  ;;  %5452 = vst [vmem:[#allocation21_spill] sm:$0xff] %v3718_v6  ;;  %v3722_v8 = vld [vmem:[#allocation2 + $0xe0] sm:$0xff] }
 0x51a   :  { %2226 = vmatpush3.msra.mxu1 %v3458_v28  ;;  %836 = vmatprep.subr.mxu0 %v3710_v5  ;;  %5453 = vst [vmem:[#allocation22_spill] sm:$0xff] %v3722_v8  ;;  %v3726_v5 = vld [vmem:[#allocation2 + $0xc8] sm:$0xff] }
 0x51b   :  { %2227 = vmatprep.subr.mxu1 %v5374_v23  ;;  %837 = vmatpush1.msra.mxu0 %v3714_v2  ;;  %5454 = vst [vmem:[#allocation23_spill] sm:$0xff] %v3726_v5  ;;  %v3730_v2 = vld [vmem:[#allocation2 + $0xc0] sm:$0xff] }
 0x51c   :  { %2228 = vmatpush3.msra.mxu1 %v3465_v30  ;;  %838 = vmatprep.subr.mxu0 %v3718_v6  ;;  %5455 = vst [vmem:[#allocation24_spill] sm:$0xff] %v3730_v2  ;;  %v3734_v6 = vld [vmem:[#allocation2 + $0xa8] sm:$0xff] }
 0x51d   :  { %2229 = vmatprep.subr.mxu1 %v5374_v23  ;;  %839 = vmatpush1.msra.mxu0 %v3722_v8  ;;  %5456 = vst [vmem:[#allocation25_spill] sm:$0xff] %v3734_v6  ;;  %v3738_v8 = vld [vmem:[#allocation2 + $0xa0] sm:$0xff] }
 0x51e   :  { %2230 = vmatpush3.msra.mxu1 %v3470_v32  ;;  %840 = vmatprep.subr.mxu0 %v3726_v5  ;;  %5457 = vst [vmem:[#allocation26_spill] sm:$0xff] %v3738_v8  ;;  %v3742_v5 = vld [vmem:[#allocation2 + $0x88] sm:$0xff] }
 0x51f   :  { %2231 = vmatprep.subr.mxu1 %v5374_v23  ;;  %841 = vmatpush1.msra.mxu0 %v3730_v2  ;;  %5458 = vst [vmem:[#allocation27_spill] sm:$0xff] %v3742_v5  ;;  %v3746_v2 = vld [vmem:[#allocation2 + $0x80] sm:$0xff] }
 0x520   :  { %2232 = vmatpush3.msra.mxu1 %v3479_v34  ;;  %842 = vmatprep.subr.mxu0 %v3734_v6  ;;  %5459 = vst [vmem:[#allocation28_spill] sm:$0xff] %v3746_v2  ;;  %v3750_v6 = vld [vmem:[#allocation2 + $0x68] sm:$0xff] }
 0x521   :  { %2233 = vmatprep.subr.mxu1 %v5374_v23  ;;  %843 = vmatpush1.msra.mxu0 %v3738_v8  ;;  %5460 = vst [vmem:[#allocation29_spill] sm:$0xff] %v3750_v6  ;;  %v3754_v8 = vld [vmem:[#allocation2 + $0x60] sm:$0xff] }
 0x522   :  { %2234 = vmatpush3.msra.mxu1 %v3486_v36  ;;  %844 = vmatprep.subr.mxu0 %v3742_v5  ;;  %v3758_v5 = vld [vmem:[#allocation2 + $0x48] sm:$0xff] }
 0x523   :  { %2235 = vmatprep.subr.mxu1 %v5374_v23  ;;  %845 = vmatpush1.msra.mxu0 %v3746_v2  ;;  %5461 = vst [vmem:[#allocation30_spill] sm:$0xff] %v3758_v5  ;;  %v3762_v2 = vld [vmem:[#allocation2 + $0x40] sm:$0xff] }
 0x524   :  { %2236 = vmatpush3.msra.mxu1 %v3493_v38  ;;  %846 = vmatprep.subr.mxu0 %v3750_v6  ;;  %v3766_v6 = vld [vmem:[#allocation2 + $0x28] sm:$0xff] }
 0x525   :  { %2237 = vmatprep.subr.mxu1 %v5374_v23  ;;  %847 = vmatpush1.msra.mxu0 %v3754_v8 }
 0x526   :  { %2238 = vmatpush3.msra.mxu1 %v3500_v40  ;;  %848 = vmatprep.subr.mxu0 %v3758_v5  ;;  %v3773_v5 = vld [vmem:[#allocation2 + $0x1f8] sm:$0xff] }
 0x527   :  { %2239 = vmatprep.subr.mxu1 %v5374_v23  ;;  %849 = vmatpush1.msra.mxu0 %v3762_v2 }
 0x528   :  { %2240 = vmatpush3.msra.mxu1 %v3507_v42  ;;  %850 = vmatprep.subr.mxu0 %v3766_v6 }
 0x529   :  { %2241 = vmatprep.subr.mxu1 %v5374_v23  ;;  %851 = vmatpush1.msra.mxu0 %v3108_v54  ;;  %v5463_v54 = vld [vmem:[#allocation57_spill] sm:$0xff] }
 0x52a   :  { %2242 = vmatpush3.msra.mxu1 %v3514_v44  ;;  %852 = vmatprep.subr.mxu0 %v3114_v56  ;;  %v5473_v56 = vld [vmem:[#allocation77_spill] sm:$0xff] }
 0x52b   :  { %893 = vmatprep.subr.mxu1 %v3773_v5  ;;  %853 = vmatpush1.msra.mxu0 %v3120_v58  ;;  %v5475_v58 = vld [vmem:[#allocation81_spill] sm:$0xff] }
 0x52c   :  { %854 = vmatprep.subr.mxu0 %v3126_v60  ;;  %v5477_v60 = vld [vmem:[#allocation84_spill] sm:$0xff] }
 0x52d   :  { %855 = vmatpush2.msra.mxu0 %v3132_v62  ;;  %v5478_v62 = vld [vmem:[#allocation12_spill] sm:$0xff] }
 0x52e   :  { %856 = vmatprep.subr.mxu0 %v3138_v0  ;;  %v5462_v0 = vld [vmem:[#allocation55_spill] sm:$0xff] }
 0x52f   :  { %857 = vmatpush2.msra.mxu0 %v3144_v55  ;;  %v5464_v55 = vld [vmem:[#allocation59_spill] sm:$0xff] }
 0x530   :  { %858 = vmatprep.subr.mxu0 %v3150_v57  ;;  %v5474_v57 = vld [vmem:[#allocation79_spill] sm:$0xff] }
 0x531   :  { %859 = vmatpush2.msra.mxu0 %v3156_v59  ;;  %v5476_v59 = vld [vmem:[#allocation83_spill] sm:$0xff] }
 0x532   :  { %860 = vmatprep.subr.mxu0 %v3162_v61 }
 0x533   :  { %861 = vmatpush2.msra.mxu0 %v3168_v63 }
 0x534   :  { %862 = vmatprep.subr.mxu0 %v3174_v53  ;;  %v5465_v53 = vld [vmem:[#allocation61_spill] sm:$0xff] }
 0x535   :  { %863 = vmatpush2.msra.mxu0 %v3180_v51  ;;  %v5466_v51 = vld [vmem:[#allocation63_spill] sm:$0xff] }
 0x536   :  { %864 = vmatprep.subr.mxu0 %v3186_v49  ;;  %v5467_v49 = vld [vmem:[#allocation65_spill] sm:$0xff] }
 0x537   :  { %865 = vmatpush2.msra.mxu0 %v3192_v47  ;;  %v5468_v47 = vld [vmem:[#allocation67_spill] sm:$0xff] }
 0x538   :  { %866 = vmatprep.subr.mxu0 %v3198_v45  ;;  %v5469_v45 = vld [vmem:[#allocation69_spill] sm:$0xff] }
 0x539   :  { %867 = vmatpush2.msra.mxu0 %v3204_v43  ;;  %v5470_v43 = vld [vmem:[#allocation71_spill] sm:$0xff] }
 0x53a   :  { %868 = vmatprep.subr.mxu0 %v3210_v41  ;;  %v5471_v41 = vld [vmem:[#allocation73_spill] sm:$0xff] }
 0x53b   :  { %869 = vmatpush2.msra.mxu0 %v3216_v39  ;;  %v5472_v39 = vld [vmem:[#allocation75_spill] sm:$0xff] }
 0x53c   :  { %870 = vmatprep.subr.mxu0 %v5462_v0 }
 0x53d   :  { %871 = vmatpush2.msra.mxu0 %v5463_v54 }
 0x53e   :  { %872 = vmatprep.subr.mxu0 %v5464_v55 }
 0x53f   :  { %873 = vmatpush2.msra.mxu0 %v5465_v53  ;;  %v5479_v53 = vld [vmem:[#allocation85_spill] sm:$0xff] }
 0x540   :  { %874 = vmatprep.subr.mxu0 %v5466_v51 }
 0x541   :  { %875 = vmatpush2.msra.mxu0 %v5467_v49 }
 0x542   :  { %876 = vmatprep.subr.mxu0 %v5468_v47 }
 0x543   :  { %877 = vmatpush2.msra.mxu0 %v5469_v45 }
 0x544   :  { %878 = vmatprep.subr.mxu0 %v5470_v43 }
 0x545   :  { %879 = vmatpush2.msra.mxu0 %v5471_v41  ;;  %v5480_v41 = vld [vmem:[#allocation86_spill] sm:$0xff] }
 0x546   :  { %880 = vmatprep.subr.mxu0 %v5472_v39 }
 0x547   :  { %881 = vmatpush2.msra.mxu0 %v5473_v56 }
 0x548   :  { %882 = vmatprep.subr.mxu0 %v5474_v57 }
 0x549   :  { %883 = vmatpush2.msra.mxu0 %v5475_v58 }
 0x54a   :  { %884 = vmatprep.subr.mxu0 %v5476_v59 }
 0x54b   :  { %885 = vmatpush2.msra.mxu0 %v5477_v60 }
 0x54c   :  { %2246 = vmatprep.subr.mxu0 %v5374_v23 }
 0x5cb   :  { %v586_v61 = vpop.f32.mrf.mxu1  ;;  %v657_v55 = vpop.f32.mrf.mxu0 }
 0x5cc   :  { %v587_v63 = vadd.f32 %v586_v61, %v5478_v62  ;;  %v658_v59 = vadd.f32 %v657_v55, %v3542_v10 }
 0x5cd   :  { %v588_v0 = vpop.f32.mrf.mxu1  ;;  %v659_v43 = vpop.f32.mrf.mxu0 }
 0x5ce   :  { %v662_v54 = vsub.f32 0.0, %v587_v63  ;;  %v589_v51 = vadd.f32 %v588_v0, %v5479_v53  ;;  %v660_v39 = vadd.f32 %v659_v43, %v5480_v41 }
 0x5d0   :  { %v663_v49 = vmul.f32 1.442695, %v662_v54  ;;  %v668_v47 = vsub.f32 0.0, %v589_v51  ;;  %v675_v56 = vsub.f32 0.0, %v660_v39 }
 0x5d2   :  { %2416 = vpow2.f32 %v663_v49  ;;  %v669_v45 = vmul.f32 1.442695, %v668_v47  ;;  %v676_v57 = vmul.f32 1.442695, %v675_v56 }
 0x5d4   :  { %2418 = vpow2.f32 %v669_v45 }
 0x5d5   :  { %2420 = vpow2.f32 %v676_v57 }
 0x5df   :  { %v2417_v58 = vpop.eup %2416 }
 0x5e0   :  { %v665_v60 = vadd.f32 1.0, %v2417_v58  ;;  %v3818_v58 = vld [vmem:[#allocation2 + $0x1f0] sm:$0xff] }
 0x5e1   :  { %v2419_v61 = vpop.eup %2418 }
 0x5e2   :  { %2422 = vrcp.f32 %v665_v60  ;;  %v671_v63 = vadd.f32 1.0, %v2419_v61  ;;  %v2421_v0 = vpop.eup %2420  ;;  %v3827_v60 = vld [vmem:[#allocation2 + $0x1b8] sm:$0xff]  ;;  %v3830_v61 = vld [vmem:[#allocation2 + $0x1b0] sm:$0xff] }
 0x5e3   :  { %2424 = vtanh.f32 %v658_v59  ;;  %v678_v47 = vadd.f32 1.0, %v2421_v0  ;;  %v3821_v59 = vld [vmem:[#allocation2 + $0x1d8] sm:$0xff]  ;;  %v3836_v0 = vld [vmem:[#allocation2 + $0x190] sm:$0xff] }
 0x5e4   :  { %2426 = vrcp.f32 %v671_v63  ;;  %v3833_v63 = vld [vmem:[#allocation2 + $0x198] sm:$0xff] }
 0x5e5   :  { %2428 = vrcp.f32 %v678_v47  ;;  %v3848_v47 = vld [vmem:[#allocation2 + $0x150] sm:$0xff] }
 0x5e6   :  { %5482 = vst [vmem:[#allocation32_spill] sm:$0xff] %v3848_v47 }
 0x5ef   :  { %v2423_v54 = vpop.eup %2422 }
 0x5f0   :  { %v2425_v51 = vpop.eup %2424 }
 0x5f1   :  { %v2427_v49 = vpop.eup %2426  ;;  %v682_v45 = vmul.f32 %v2425_v51, %v2423_v54  ;;  %v3839_v54 = vld [vmem:[#allocation2 + $0x178] sm:$0xff]  ;;  %v3842_v51 = vld [vmem:[#allocation2 + $0x170] sm:$0xff] }
 0x5f2   :  { %v681_v43 = vmul.f32 %v2427_v49, %v3545_v9  ;;  %v2429_v55 = vpop.eup %2428  ;;  %v3824_v9 = vld [vmem:[#allocation2 + $0x1d0] sm:$0xff]  ;;  %v3845_v49 = vld [vmem:[#allocation2 + $0x158] sm:$0xff] }
 0x5f3   :  { %5481 = vst [vmem:[#allocation31_spill] sm:$0xff] %v3845_v49 }
 0x5f4   :  { %v3815_v39 = vadd.f32 %v682_v45, %v681_v43  ;;  %v3851_v45 = vld [vmem:[#allocation2 + $0x138] sm:$0xff]  ;;  %v3854_v43 = vld [vmem:[#allocation2 + $0x130] sm:$0xff] }
 0x5f5   :  { %5483 = vst [vmem:[#allocation33_spill] sm:$0xff] %v3851_v45  ;;  %5484 = vst [vmem:[#allocation34_spill] sm:$0xff] %v3854_v43 }
 0x5f6   :  { %2430 = vtanh.f32 %v3815_v39 }
 0x603   :  { %v2431_v56 = vpop.eup %2430 }
 0x604   :  { %v685_v57 = vmul.f32 %v2431_v56, %v2429_v55  ;;  %v3857_v55 = vld [vmem:[#allocation2 + $0x118] sm:$0xff]  ;;  %v3860_v56 = vld [vmem:[#allocation2 + $0x110] sm:$0xff] }
 0x605   :  { %5485 = vst [vmem:[#allocation35_spill] sm:$0xff] %v3857_v55  ;;  %5486 = vst [vmem:[#allocation36_spill] sm:$0xff] %v3860_v56 }
 0x606   :  { %2244 = vmatmul.mubr.f32.vlgmr.msra.gmra.mxu1 %v685_v57  ;;  %886 = vmatprep.mubr.f32.mxu0 %v685_v57 }
 0x607   :  { %957 = vmatprep.mubr.f32.mxu1 %v685_v57  ;;  %894 = vmatpush1.msra.mxu1 %v3818_v58  ;;  %v3863_v57 = vld [vmem:[#allocation2 + $0xf8] sm:$0xff] }
 0x608   :  { %895 = vmatprep.subr.mxu1 %v3821_v59  ;;  %5487 = vst [vmem:[#allocation37_spill] sm:$0xff] %v3863_v57 }
 0x609   :  { %896 = vmatpush1.msra.mxu1 %v3824_v9 }
 0x60a   :  { %897 = vmatprep.subr.mxu1 %v3827_v60 }
 0x60b   :  { %898 = vmatpush1.msra.mxu1 %v3830_v61 }
 0x60c   :  { %899 = vmatprep.subr.mxu1 %v3833_v63 }
 0x60d   :  { %900 = vmatpush1.msra.mxu1 %v3836_v0 }
 0x60e   :  { %901 = vmatprep.subr.mxu1 %v3839_v54 }
 0x60f   :  { %902 = vmatpush1.msra.mxu1 %v3842_v51 }
 0x610   :  { %903 = vmatprep.subr.mxu1 %v3845_v49 }
 0x611   :  { %904 = vmatpush1.msra.mxu1 %v3848_v47  ;;  %v3866_v47 = vld [vmem:[#allocation2 + $0xf0] sm:$0xff] }
 0x612   :  { %905 = vmatprep.subr.mxu1 %v3851_v45  ;;  %5488 = vst [vmem:[#allocation38_spill] sm:$0xff] %v3866_v47  ;;  %v3869_v45 = vld [vmem:[#allocation2 + $0xd8] sm:$0xff] }
 0x613   :  { %906 = vmatpush1.msra.mxu1 %v3854_v43  ;;  %5489 = vst [vmem:[#allocation39_spill] sm:$0xff] %v3869_v45  ;;  %v3872_v43 = vld [vmem:[#allocation2 + $0xd0] sm:$0xff] }
 0x614   :  { %907 = vmatprep.subr.mxu1 %v3857_v55  ;;  %5490 = vst [vmem:[#allocation40_spill] sm:$0xff] %v3872_v43  ;;  %v3875_v55 = vld [vmem:[#allocation2 + $0xb8] sm:$0xff] }
 0x615   :  { %908 = vmatpush1.msra.mxu1 %v3860_v56  ;;  %5491 = vst [vmem:[#allocation41_spill] sm:$0xff] %v3875_v55  ;;  %v3878_v56 = vld [vmem:[#allocation2 + $0xb0] sm:$0xff] }
 0x616   :  { %909 = vmatprep.subr.mxu1 %v3863_v57  ;;  %5492 = vst [vmem:[#allocation42_spill] sm:$0xff] %v3878_v56  ;;  %v3881_v57 = vld [vmem:[#allocation2 + $0x98] sm:$0xff] }
 0x617   :  { %910 = vmatpush1.msra.mxu1 %v3866_v47  ;;  %5493 = vst [vmem:[#allocation43_spill] sm:$0xff] %v3881_v57  ;;  %v3884_v47 = vld [vmem:[#allocation2 + $0x90] sm:$0xff] }
 0x618   :  { %911 = vmatprep.subr.mxu1 %v3869_v45  ;;  %5494 = vst [vmem:[#allocation44_spill] sm:$0xff] %v3884_v47  ;;  %v3887_v45 = vld [vmem:[#allocation2 + $0x78] sm:$0xff] }
 0x619   :  { %912 = vmatpush1.msra.mxu1 %v3872_v43  ;;  %5495 = vst [vmem:[#allocation45_spill] sm:$0xff] %v3887_v45  ;;  %v3890_v43 = vld [vmem:[#allocation2 + $0x70] sm:$0xff] }
 0x61a   :  { %913 = vmatprep.subr.mxu1 %v3875_v55  ;;  %5496 = vst [vmem:[#allocation46_spill] sm:$0xff] %v3890_v43  ;;  %v3893_v55 = vld [vmem:[#allocation2 + $0x58] sm:$0xff] }
 0x61b   :  { %914 = vmatpush1.msra.mxu1 %v3878_v56  ;;  %5497 = vst [vmem:[#allocation47_spill] sm:$0xff] %v3893_v55  ;;  %v3896_v56 = vld [vmem:[#allocation2 + $0x50] sm:$0xff] }
 0x61c   :  { %915 = vmatprep.subr.mxu1 %v3881_v57  ;;  %5498 = vst [vmem:[#allocation48_spill] sm:$0xff] %v3896_v56  ;;  %v3899_v57 = vld [vmem:[#allocation2 + $0x38] sm:$0xff] }
 0x61d   :  { %916 = vmatpush1.msra.mxu1 %v3884_v47  ;;  %5499 = vst [vmem:[#allocation49_spill] sm:$0xff] %v3899_v57  ;;  %v3902_v47 = vld [vmem:[#allocation2 + $0x30] sm:$0xff] }
 0x61e   :  { %917 = vmatprep.subr.mxu1 %v3887_v45  ;;  %5500 = vst [vmem:[#allocation50_spill] sm:$0xff] %v3902_v47  ;;  %v3905_v45 = vld [vmem:[#allocation2 + $0x18] sm:$0xff] }
 0x61f   :  { %918 = vmatpush1.msra.mxu1 %v3890_v43  ;;  %5501 = vst [vmem:[#allocation51_spill] sm:$0xff] %v3905_v45  ;;  %v3908_v43 = vld [vmem:[#allocation2 + $0x10] sm:$0xff] }
 0x620   :  { %919 = vmatprep.subr.mxu1 %v3893_v55  ;;  %5502 = vst [vmem:[#allocation52_spill] sm:$0xff] %v3908_v43  ;;  %v3911_v55 = vld [vmem:[#allocation2 + $0x3f8] sm:$0xff] }
 0x621   :  { %920 = vmatpush1.msra.mxu1 %v3896_v56  ;;  %5503 = vst [vmem:[#allocation53_spill] sm:$0xff] %v3911_v55  ;;  %v3914_v56 = vld [vmem:[#allocation2 + $0x3f0] sm:$0xff] }
 0x622   :  { %921 = vmatprep.subr.mxu1 %v3899_v57  ;;  %5504 = vst [vmem:[#allocation54_spill] sm:$0xff] %v3914_v56  ;;  %v3917_v57 = vld [vmem:[#allocation2 + $0x3d8] sm:$0xff] }
 0x623   :  { %922 = vmatpush1.msra.mxu1 %v3902_v47  ;;  %5505 = vst [vmem:[#allocation56_spill] sm:$0xff] %v3917_v57  ;;  %v3920_v47 = vld [vmem:[#allocation2 + $0x3d0] sm:$0xff] }
 0x624   :  { %923 = vmatprep.subr.mxu1 %v3905_v45  ;;  %5506 = vst [vmem:[#allocation58_spill] sm:$0xff] %v3920_v47  ;;  %v3923_v45 = vld [vmem:[#allocation2 + $0x3b8] sm:$0xff] }
 0x625   :  { %924 = vmatpush1.msra.mxu1 %v3908_v43  ;;  %5507 = vst [vmem:[#allocation60_spill] sm:$0xff] %v3923_v45  ;;  %v3926_v43 = vld [vmem:[#allocation2 + $0x3b0] sm:$0xff] }
 0x626   :  { %925 = vmatprep.subr.mxu1 %v3911_v55  ;;  %5508 = vst [vmem:[#allocation62_spill] sm:$0xff] %v3926_v43  ;;  %v3929_v55 = vld [vmem:[#allocation2 + $0x398] sm:$0xff] }
 0x627   :  { %926 = vmatpush2.msra.mxu1 %v3914_v56  ;;  %5509 = vst [vmem:[#allocation64_spill] sm:$0xff] %v3929_v55  ;;  %v3932_v56 = vld [vmem:[#allocation2 + $0x390] sm:$0xff] }
 0x628   :  { %927 = vmatprep.subr.mxu1 %v3917_v57  ;;  %5510 = vst [vmem:[#allocation66_spill] sm:$0xff] %v3932_v56  ;;  %v3935_v57 = vld [vmem:[#allocation2 + $0x378] sm:$0xff] }
 0x629   :  { %928 = vmatpush2.msra.mxu1 %v3920_v47  ;;  %5511 = vst [vmem:[#allocation68_spill] sm:$0xff] %v3935_v57  ;;  %v3938_v47 = vld [vmem:[#allocation2 + $0x370] sm:$0xff] }
 0x62a   :  { %929 = vmatprep.subr.mxu1 %v3923_v45  ;;  %5512 = vst [vmem:[#allocation70_spill] sm:$0xff] %v3938_v47  ;;  %v3941_v45 = vld [vmem:[#allocation2 + $0x358] sm:$0xff] }
 0x62b   :  { %930 = vmatpush2.msra.mxu1 %v3926_v43  ;;  %5513 = vst [vmem:[#allocation72_spill] sm:$0xff] %v3941_v45  ;;  %v3944_v43 = vld [vmem:[#allocation2 + $0x350] sm:$0xff] }
 0x62c   :  { %931 = vmatprep.subr.mxu1 %v3929_v55  ;;  %5514 = vst [vmem:[#allocation74_spill] sm:$0xff] %v3944_v43  ;;  %v3947_v55 = vld [vmem:[#allocation2 + $0x338] sm:$0xff] }
 0x62d   :  { %932 = vmatpush2.msra.mxu1 %v3932_v56  ;;  %5515 = vst [vmem:[#allocation76_spill] sm:$0xff] %v3947_v55  ;;  %v3950_v56 = vld [vmem:[#allocation2 + $0x330] sm:$0xff] }
 0x62e   :  { %933 = vmatprep.subr.mxu1 %v3935_v57  ;;  %5516 = vst [vmem:[#allocation78_spill] sm:$0xff] %v3950_v56  ;;  %v3953_v57 = vld [vmem:[#allocation2 + $0x318] sm:$0xff] }
 0x62f   :  { %934 = vmatpush2.msra.mxu1 %v3938_v47  ;;  %5517 = vst [vmem:[#allocation80_spill] sm:$0xff] %v3953_v57  ;;  %v3956_v47 = vld [vmem:[#allocation2 + $0x310] sm:$0xff] }
 0x630   :  { %935 = vmatprep.subr.mxu1 %v3941_v45  ;;  %5518 = vst [vmem:[#allocation82_spill] sm:$0xff] %v3956_v47  ;;  %v3959_v45 = vld [vmem:[#allocation2 + $0x2f8] sm:$0xff] }
 0x631   :  { %936 = vmatpush2.msra.mxu1 %v3944_v43  ;;  %5519 = vst [vmem:[#allocation55_spill] sm:$0xff] %v3959_v45  ;;  %v3962_v43 = vld [vmem:[#allocation2 + $0x2f0] sm:$0xff] }
 0x632   :  { %937 = vmatprep.subr.mxu1 %v3947_v55  ;;  %5520 = vst [vmem:[#allocation57_spill] sm:$0xff] %v3962_v43  ;;  %v3965_v55 = vld [vmem:[#allocation2 + $0x2d8] sm:$0xff] }
 0x633   :  { %938 = vmatpush2.msra.mxu1 %v3950_v56  ;;  %5521 = vst [vmem:[#allocation59_spill] sm:$0xff] %v3965_v55  ;;  %v3968_v56 = vld [vmem:[#allocation2 + $0x2d0] sm:$0xff] }
 0x634   :  { %939 = vmatprep.subr.mxu1 %v3953_v57  ;;  %5522 = vst [vmem:[#allocation61_spill] sm:$0xff] %v3968_v56  ;;  %v3971_v57 = vld [vmem:[#allocation2 + $0x2b8] sm:$0xff] }
 0x635   :  { %940 = vmatpush2.msra.mxu1 %v3956_v47  ;;  %5523 = vst [vmem:[#allocation63_spill] sm:$0xff] %v3971_v57  ;;  %v3974_v47 = vld [vmem:[#allocation2 + $0x2b0] sm:$0xff] }
 0x636   :  { %941 = vmatprep.subr.mxu1 %v3959_v45  ;;  %5524 = vst [vmem:[#allocation65_spill] sm:$0xff] %v3974_v47  ;;  %v3977_v45 = vld [vmem:[#allocation2 + $0x298] sm:$0xff] }
 0x637   :  { %942 = vmatpush2.msra.mxu1 %v3962_v43  ;;  %5525 = vst [vmem:[#allocation67_spill] sm:$0xff] %v3977_v45  ;;  %v3980_v43 = vld [vmem:[#allocation2 + $0x290] sm:$0xff] }
 0x638   :  { %943 = vmatprep.subr.mxu1 %v3965_v55  ;;  %5526 = vst [vmem:[#allocation69_spill] sm:$0xff] %v3980_v43  ;;  %v3983_v55 = vld [vmem:[#allocation2 + $0x278] sm:$0xff] }
 0x639   :  { %944 = vmatpush2.msra.mxu1 %v3968_v56  ;;  %5527 = vst [vmem:[#allocation71_spill] sm:$0xff] %v3983_v55 }
 0x63a   :  { %945 = vmatprep.subr.mxu1 %v3971_v57 }
 0x63b   :  { %946 = vmatpush2.msra.mxu1 %v3974_v47 }
 0x63c   :  { %947 = vmatprep.subr.mxu1 %v3977_v45  ;;  %v3993_v45 = vld [vmem:[#allocation2 + $0x1e8] sm:$0xff] }
 0x63d   :  { %948 = vmatpush2.msra.mxu1 %v3980_v43  ;;  %5528 = vst [vmem:[#allocation73_spill] sm:$0xff] %v3993_v45 }
 0x63e   :  { %949 = vmatprep.subr.mxu1 %v3983_v55 }
 0x63f   :  { %950 = vmatpush2.msra.mxu1 %v3309_v19 }
 0x640   :  { %951 = vmatprep.subr.mxu1 %v3315_v18 }
 0x641   :  { %952 = vmatpush2.msra.mxu1 %v3319_v27 }
 0x642   :  { %953 = vmatprep.subr.mxu1 %v3323_v25 }
 0x643   :  { %954 = vmatpush2.msra.mxu1 %v3327_v14 }
 0x644   :  { %955 = vmatprep.subr.mxu1 %v3331_v13 }
 0x645   :  { %956 = vmatpush2.msra.mxu1 %v3334_v21 }
 0x646   :  { %1124 = vmatprep.subr.mxu1 %v3993_v45 }
 0x6c6   :  { %v752_v43 = vpop.f32.mrf.mxu1 }
 0x6c7   :  { %v753_v55 = vadd.f32 %v752_v43, %v3615_v3  ;;  %v770_v43 = vld [vmem:[%s5047_s0 + $0x1] sm:$0x1] }
 0x6c8   :  { %v2245_v19 = vpop.f32.mrf.mxu1 }
 0x6c9   :  { %v756_v18 = vsel %vm451_vm1, %v753_v55, -inf }
 0x6ca   :  { %757 = vmax.xlane.f32.xlu1 %v756_v18 }
 0x753   :  { %v758_v27 = vpop.xlane.xlu1 %757 }
 0x754   :  { %v759_v47 = vsub.f32 %v753_v55, %v758_v27 }
 0x756   :  { %v760_v25 = vmul.f32 1.442695, %v759_v47 }
 0x758   :  { %2432 = vpow2.f32 %v760_v25 }
 0x765   :  { %v2433_v14 = vpop.eup %2432 }
 0x766   :  { %v762_v13 = vsel %vm451_vm1, %v2433_v14, 0.0 }
 0x767   :  { %763 = vadd.xlane.f32.xlu0 %v762_v13 }
 0x7f0   :  { %v764_v21 = vpop.xlane.xlu0 %763 }
 0x7f1   :  { %2434 = vrcp.f32 %v764_v21 }
 0x7f2   :  { %2436 = vlog2.f32 %v764_v21 }
 0x7fe   :  { %v2435_v57 = vpop.eup %2434 }
 0x7ff   :  { %v2437_v45 = vpop.eup %2436  ;;  %v3999_v56 = vmul.f32 %v2435_v57, %v2433_v14 }
 0x800   :  { %v768_v3 = vmul.f32 0.6931472, %v2437_v45 }
 0x801   :  { %5529 = vst [vmem:[#allocation75_spill] sm:$0xff] %v3999_v56  ;;  %805 = vst.msk [vmem:[#allocation5 + $0x1] sm:$0x1] %vm451_vm1, %v3999_v56 }
 0x802   :  { %v4006_v55 = vsub.f32 %v759_v47, %v768_v3 }
 0x804   :  { %5530 = vst [vmem:[#allocation77_spill] sm:$0xff] %v4006_v55  ;;  %v771_v19 = vadd.f32 %v770_v43, %v4006_v55 }
 0x806   :  { %v772_v18 = vsel %vm451_vm1, %v771_v19, -inf }
 0x807   :  { %773 = vmax.xlane.f32.xlu1 %v772_v18 }
 0x890   :  { %v774_v27 = vpop.xlane.xlu1 %773 }
 0x891   :  { %vm775_vm7 = vcmp.eq.f32.partialorder %v771_v19, %v774_v27 }
 0x892   :  { %v776_v57 = vsel %vm775_vm7, %v3632_v11, 7 }
 0x893   :  { %v777_v45 = vsel %vm451_vm1, %v776_v57, 2147483647 }
 0x894   :  { %v779_v25 = vshra.s32 %v777_v45, 16  ;;  %v778_v13 = vand.u32 65535, %v777_v45 }
 0x896   :  { %v781_v14 = vcvt.s32.f32 %v779_v25  ;;  %v780_v49 = vcvt.s32.f32 %v778_v13 }
 0x898   :  { %782 = vmin.xlane.f32.xlu0 %v781_v14 }
 0x921   :  { %v783_v21 = vpop.xlane.xlu0 %782 }
 0x922   :  { %vm784_vm8 = vcmp.eq.f32.partialorder %v781_v14, %v783_v21  ;;  %v789_v3 = vcvt.f32.s32 %v783_v21  ;;  %v4135_v21 = vld [vmem:[#allocation2 + $0x320] sm:$0xff] }
 0x923   :  { %v785_v47 = vsel %vm784_vm8, %v780_v49, inf }
 0x924   :  { %786 = vmin.xlane.f32.xlu1 %v785_v47  ;;  %v790_v56 = vshll.u32 %v789_v3, 16  ;;  %v4138_v47 = vld [vmem:[#allocation2 + $0x308] sm:$0xff]  ;;  %v4141_v3 = vld [vmem:[#allocation2 + $0x300] sm:$0xff] }
 0x9ad   :  { %v787_v43 = vpop.xlane.xlu1 %786 }
 0x9ae   :  { %v788_v55 = vcvt.f32.s32 %v787_v43  ;;  %v4144_v43 = vld [vmem:[#allocation2 + $0x2e8] sm:$0xff] }
 0x9b0   :  { %v4012_v18 = vadd.s32 %v790_v56, %v788_v55 }
 0x9b2   :  { %5531 = vst [vmem:[#allocation79_spill] sm:$0xff] %v4012_v18  ;;  %806 = vst.msk [vmem:[%s5054_s7 + $0x1] sm:$0x1] %vm502_vm4, %v4012_v18  ;;  %v810_v19 = vrot.slane %v4012_v18, %v3524_v52 }
 0x9b4   :  { %vm811_vm9 = vcmp.eq.s32.totalorder %v3521_v50, %v810_v19  ;;  %v4147_v19 = vld [vmem:[#allocation2 + $0x2e0] sm:$0xff] }
 0x9b5   :  { %v2066_v49 = vsel %vm811_vm9, 1.0, %v5374_v23 }
 0x9b6   :  { %v814_v27 = vmul.f32 %v2066_v49, %v3648_v35  ;;  %v5539_v35 = vld [vmem:[#allocation23_spill] sm:$0xff] }
 0x9b7   :  { %v4150_v49 = vld [vmem:[#allocation2 + $0x2c8] sm:$0xff] }
 0x9b8   :  { %v815_v57 = vsel %vm512_vm6, %v814_v27, 0.0  ;;  %v4153_v27 = vld [vmem:[#allocation2 + $0x2c0] sm:$0xff] }
 0x9b9   :  { %v816_v45 = vrot.slane %v815_v57, 4 }
 0x9bb   :  { %v817_v56 = vadd.f32 %v816_v45, %v815_v57  ;;  %v4156_v57 = vld [vmem:[#allocation2 + $0x2a8] sm:$0xff]  ;;  %v4159_v45 = vld [vmem:[#allocation2 + $0x2a0] sm:$0xff] }
 0x9bd   :  { %v818_v55 = vrot.slane %v817_v56, 2 }
 0x9bf   :  { %v819_v25 = vadd.f32 %v818_v55, %v817_v56  ;;  %v4162_v56 = vld [vmem:[#allocation2 + $0x288] sm:$0xff]  ;;  %v4165_v55 = vld [vmem:[#allocation2 + $0x280] sm:$0xff] }
 0x9c1   :  { %v820_v14 = vrot.slane %v819_v25, 1 }
 0x9c3   :  { %v821_v13 = vadd.f32 %v820_v14, %v819_v25  ;;  %v4168_v25 = vld [vmem:[#allocation2 + $0x268] sm:$0xff]  ;;  %v4171_v14 = vld [vmem:[#allocation2 + $0x260] sm:$0xff] }
 0x9c5   :  { %887 = vmatmul.mubr.f32.vlgmr.msra.gmra.mxu0 %v821_v13  ;;  %958 = vmatmul.mubr.f32.vlgmr.msra.gmra.mxu1 %v821_v13  ;;  %v4174_v13 = vld [vmem:[#allocation2 + $0x248] sm:$0xff] }
 0x9c6   :  { %2247 = vmatpush3.msra.mxu0 %v3409_v12  ;;  %2278 = vmatprep.mubr.msk.f32.mxu0 %vm2895_vm0, %v5374_v23  ;;  %v5532_v12 = vld [vmem:[#allocation16_spill] sm:$0xff] }
 0x9c7   :  { %2248 = vmatprep.subr.mxu0 %v5374_v23  ;;  %1125 = vmatpush1.msra.mxu1 %v3658_v29  ;;  %v5541_v29 = vld [vmem:[#allocation25_spill] sm:$0xff] }
 0x9c8   :  { %2249 = vmatpush3.msra.mxu0 %v3416_v15  ;;  %1126 = vmatprep.subr.mxu1 %v3662_v4  ;;  %v5533_v15 = vld [vmem:[#allocation17_spill] sm:$0xff]  ;;  %v5543_v4 = vld [vmem:[#allocation27_spill] sm:$0xff] }
 0x9c9   :  { %2250 = vmatprep.subr.mxu0 %v5374_v23  ;;  %1127 = vmatpush1.msra.mxu1 %v3666_v33  ;;  %v5545_v33 = vld [vmem:[#allocation29_spill] sm:$0xff] }
 0x9ca   :  { %2251 = vmatpush3.msra.mxu0 %v3423_v17  ;;  %1128 = vmatprep.subr.mxu1 %v3670_v31  ;;  %v5534_v17 = vld [vmem:[#allocation18_spill] sm:$0xff] }
 0x9cb   :  { %2252 = vmatprep.subr.mxu0 %v5374_v23  ;;  %1129 = vmatpush1.msra.mxu1 %v3674_v16  ;;  %v4099_v31 = vld [vmem:[#allocation2 + $0x3e0] sm:$0xff]  ;;  %v4102_v16 = vld [vmem:[#allocation2 + $0x3c8] sm:$0xff] }
 0x9cc   :  { %2253 = vmatpush3.msra.mxu0 %v3430_v20  ;;  %1130 = vmatprep.subr.mxu1 %v3678_v48  ;;  %v5535_v20 = vld [vmem:[#allocation19_spill] sm:$0xff] }
 0x9cd   :  { %2254 = vmatprep.subr.mxu0 %v5374_v23  ;;  %1131 = vmatpush1.msra.mxu1 %v3682_v37  ;;  %v4111_v48 = vld [vmem:[#allocation2 + $0x3a0] sm:$0xff]  ;;  %v4114_v37 = vld [vmem:[#allocation2 + $0x388] sm:$0xff] }
 0x9ce   :  { %2255 = vmatpush3.msra.mxu0 %v3437_v22  ;;  %1132 = vmatprep.subr.mxu1 %v3686_v1  ;;  %v5536_v22 = vld [vmem:[#allocation20_spill] sm:$0xff]  ;;  %v4117_v1 = vld [vmem:[#allocation2 + $0x380] sm:$0xff] }
 0x9cf   :  { %2256 = vmatprep.subr.mxu0 %v5374_v23  ;;  %1133 = vmatpush1.msra.mxu1 %v3690_v46  ;;  %v4120_v46 = vld [vmem:[#allocation2 + $0x368] sm:$0xff] }
 0x9d0   :  { %2257 = vmatpush3.msra.mxu0 %v3444_v24  ;;  %1134 = vmatprep.subr.mxu1 %v3694_v7  ;;  %v5537_v24 = vld [vmem:[#allocation21_spill] sm:$0xff]  ;;  %v4123_v7 = vld [vmem:[#allocation2 + $0x360] sm:$0xff] }
 0x9d1   :  { %2258 = vmatprep.subr.mxu0 %v5374_v23  ;;  %1135 = vmatpush1.msra.mxu1 %v5532_v12  ;;  %v4177_v12 = vld [vmem:[#allocation2 + $0x240] sm:$0xff] }
 0x9d2   :  { %2259 = vmatpush3.msra.mxu0 %v3451_v26  ;;  %1136 = vmatprep.subr.mxu1 %v5533_v15  ;;  %v5538_v26 = vld [vmem:[#allocation22_spill] sm:$0xff]  ;;  %5547 = vst [vmem:[#allocation81_spill] sm:$0xff] %v4177_v12  ;;  %v4180_v15 = vld [vmem:[#allocation2 + $0x228] sm:$0xff] }
 0x9d3   :  { %2260 = vmatprep.subr.mxu0 %v5374_v23  ;;  %1137 = vmatpush1.msra.mxu1 %v5534_v17  ;;  %5548 = vst [vmem:[#allocation83_spill] sm:$0xff] %v4180_v15  ;;  %v4183_v17 = vld [vmem:[#allocation2 + $0x220] sm:$0xff] }
 0x9d4   :  { %2261 = vmatpush3.msra.mxu0 %v3458_v28  ;;  %1138 = vmatprep.subr.mxu1 %v5535_v20  ;;  %v5540_v28 = vld [vmem:[#allocation24_spill] sm:$0xff]  ;;  %5549 = vst [vmem:[#allocation84_spill] sm:$0xff] %v4183_v17 }
 0x9d5   :  { %2262 = vmatprep.subr.mxu0 %v5374_v23  ;;  %1139 = vmatpush1.msra.mxu1 %v5536_v22  ;;  %v4186_v20 = vld [vmem:[#allocation2 + $0x208] sm:$0xff]  ;;  %v4189_v22 = vld [vmem:[#allocation2 + $0x200] sm:$0xff] }
 0x9d6   :  { %2263 = vmatpush3.msra.mxu0 %v3465_v30  ;;  %1140 = vmatprep.subr.mxu1 %v5537_v24  ;;  %v5542_v30 = vld [vmem:[#allocation26_spill] sm:$0xff]  ;;  %5550 = vst [vmem:[#allocation12_spill] sm:$0xff] %v4186_v20  ;;  %5551 = vst [vmem:[#allocation85_spill] sm:$0xff] %v4189_v22 }
 0x9d7   :  { %2264 = vmatprep.subr.mxu0 %v5374_v23  ;;  %1141 = vmatpush1.msra.mxu1 %v5538_v26 }
 0x9d8   :  { %2265 = vmatpush3.msra.mxu0 %v3470_v32  ;;  %1142 = vmatprep.subr.mxu1 %v5539_v35  ;;  %v5544_v32 = vld [vmem:[#allocation28_spill] sm:$0xff] }
 0x9d9   :  { %2266 = vmatprep.subr.mxu0 %v5374_v23  ;;  %1143 = vmatpush1.msra.mxu1 %v5540_v28 }
 0x9da   :  { %2267 = vmatpush3.msra.mxu0 %v3479_v34  ;;  %1144 = vmatprep.subr.mxu1 %v5541_v29  ;;  %v5546_v34 = vld [vmem:[#allocation30_spill] sm:$0xff] }
 0x9db   :  { %2268 = vmatprep.subr.mxu0 %v5374_v23  ;;  %1145 = vmatpush1.msra.mxu1 %v5542_v30 }
 0x9dc   :  { %2269 = vmatpush3.msra.mxu0 %v3486_v36  ;;  %1146 = vmatprep.subr.mxu1 %v5543_v4  ;;  %v4085_v36 = vld [vmem:[#allocation2 + $0x20] sm:$0xff] }
 0x9dd   :  { %2270 = vmatprep.subr.mxu0 %v5374_v23  ;;  %1147 = vmatpush1.msra.mxu1 %v5544_v32 }
 0x9de   :  { %2271 = vmatpush3.msra.mxu0 %v3493_v38  ;;  %1148 = vmatprep.subr.mxu1 %v5545_v33  ;;  %v4089_v38 = vld [vmem:[#allocation2 + $0x8] sm:$0xff] }
 0x9df   :  { %2272 = vmatprep.subr.mxu0 %v5374_v23  ;;  %1149 = vmatpush1.msra.mxu1 %v3754_v8  ;;  %v4132_v8 = vld [vmem:[#allocation2 + $0x328] sm:$0xff] }
 0x9e0   :  { %2273 = vmatpush3.msra.mxu0 %v3500_v40  ;;  %1150 = vmatprep.subr.mxu1 %v5546_v34  ;;  %v4093_v40 = vld [vmem:[#allocation2] sm:$0xff] }
 0x9e1   :  { %2274 = vmatprep.subr.mxu0 %v5374_v23  ;;  %1151 = vmatpush1.msra.mxu1 %v3762_v2  ;;  %v4126_v2 = vld [vmem:[#allocation2 + $0x348] sm:$0xff] }
 0x9e2   :  { %2275 = vmatpush3.msra.mxu0 %v3507_v42  ;;  %1152 = vmatprep.subr.mxu1 %v3766_v6  ;;  %v4096_v42 = vld [vmem:[#allocation2 + $0x3e8] sm:$0xff]  ;;  %v4129_v6 = vld [vmem:[#allocation2 + $0x340] sm:$0xff] }
 0x9e3   :  { %2276 = vmatprep.subr.mxu0 %v5374_v23  ;;  %1153 = vmatpush1.msra.mxu1 %v4085_v36 }
 0x9e4   :  { %2277 = vmatpush3.msra.mxu0 %v3514_v44  ;;  %1154 = vmatprep.subr.mxu1 %v4089_v38  ;;  %v4105_v44 = vld [vmem:[#allocation2 + $0x3c0] sm:$0xff] }
 0x9e5   :  { %1195 = vmatprep.subr.mxu0 %v3773_v5  ;;  %1155 = vmatpush1.msra.mxu1 %v4093_v40  ;;  %v4108_v5 = vld [vmem:[#allocation2 + $0x3a8] sm:$0xff] }
 0x9e6   :  { %1156 = vmatprep.subr.mxu1 %v4096_v42 }
 0x9e7   :  { %1157 = vmatpush2.msra.mxu1 %v4099_v31 }
 0x9e8   :  { %1158 = vmatprep.subr.mxu1 %v4102_v16 }
 0x9e9   :  { %1159 = vmatpush2.msra.mxu1 %v4105_v44 }
 0x9ea   :  { %1160 = vmatprep.subr.mxu1 %v4108_v5 }
 0x9eb   :  { %1161 = vmatpush2.msra.mxu1 %v4111_v48 }
 0x9ec   :  { %1162 = vmatprep.subr.mxu1 %v4114_v37 }
 0x9ed   :  { %1163 = vmatpush2.msra.mxu1 %v4117_v1 }
 0x9ee   :  { %1164 = vmatprep.subr.mxu1 %v4120_v46 }
 0x9ef   :  { %1165 = vmatpush2.msra.mxu1 %v4123_v7 }
 0x9f0   :  { %1166 = vmatprep.subr.mxu1 %v4126_v2 }
 0x9f1   :  { %1167 = vmatpush2.msra.mxu1 %v4129_v6 }
 0x9f2   :  { %1168 = vmatprep.subr.mxu1 %v4132_v8 }
 0x9f3   :  { %1169 = vmatpush2.msra.mxu1 %v4135_v21 }
 0x9f4   :  { %1170 = vmatprep.subr.mxu1 %v4138_v47 }
 0x9f5   :  { %1171 = vmatpush2.msra.mxu1 %v4141_v3 }
 0x9f6   :  { %1172 = vmatprep.subr.mxu1 %v4144_v43 }
 0x9f7   :  { %1173 = vmatpush2.msra.mxu1 %v4147_v19 }
 0x9f8   :  { %1174 = vmatprep.subr.mxu1 %v4150_v49 }
 0x9f9   :  { %1175 = vmatpush2.msra.mxu1 %v4153_v27 }
 0x9fa   :  { %1176 = vmatprep.subr.mxu1 %v4156_v57 }
 0x9fb   :  { %1177 = vmatpush2.msra.mxu1 %v4159_v45 }
 0x9fc   :  { %1178 = vmatprep.subr.mxu1 %v4162_v56 }
 0x9fd   :  { %1179 = vmatpush2.msra.mxu1 %v4165_v55 }
 0x9fe   :  { %1180 = vmatprep.subr.mxu1 %v4168_v25 }
 0x9ff   :  { %1181 = vmatpush2.msra.mxu1 %v4171_v14 }
 0xa00   :  { %1182 = vmatprep.subr.mxu1 %v4174_v13 }
 0xa01   :  { %1183 = vmatpush2.msra.mxu1 %v4177_v12 }
 0xa02   :  { %1184 = vmatprep.subr.mxu1 %v4180_v15 }
 0xa03   :  { %1185 = vmatpush2.msra.mxu1 %v4183_v17 }
 0xa04   :  { %1186 = vmatprep.subr.mxu1 %v4186_v20 }
 0xa05   :  { %1187 = vmatpush2.msra.mxu1 %v4189_v22 }
 0xa06   :  { %2281 = vmatprep.subr.mxu1 %v5374_v23 }
 0xa85   :  { %v888_v24 = vpop.f32.mrf.mxu0  ;;  %v959_v29 = vpop.f32.mrf.mxu1 }
 0xa86   :  { %v889_v26 = vadd.f32 %v888_v24, %v5478_v62  ;;  %v960_v15 = vadd.f32 %v959_v29, %v3542_v10  ;;  %v5564_v29 = vld [vmem:[#allocation43_spill] sm:$0xff] }
 0xa87   :  { %v890_v35 = vpop.f32.mrf.mxu0  ;;  %v961_v34 = vpop.f32.mrf.mxu1 }
 0xa88   :  { %v964_v28 = vsub.f32 0.0, %v889_v26  ;;  %v891_v30 = vadd.f32 %v890_v35, %v5479_v53  ;;  %v962_v18 = vadd.f32 %v961_v34, %v5480_v41 }
 0xa8a   :  { %v965_v4 = vmul.f32 1.442695, %v964_v28  ;;  %v970_v32 = vsub.f32 0.0, %v891_v30  ;;  %v977_v20 = vsub.f32 0.0, %v962_v18 }
 0xa8c   :  { %2438 = vpow2.f32 %v965_v4  ;;  %v971_v33 = vmul.f32 1.442695, %v970_v32  ;;  %v978_v22 = vmul.f32 1.442695, %v977_v20 }
 0xa8e   :  { %2440 = vpow2.f32 %v971_v33 }
 0xa8f   :  { %2442 = vpow2.f32 %v978_v22 }
 0xa99   :  { %v2439_v17 = vpop.eup %2438 }
 0xa9a   :  { %v967_v12 = vadd.f32 1.0, %v2439_v17 }
 0xa9b   :  { %v2441_v24 = vpop.eup %2440 }
 0xa9c   :  { %2444 = vrcp.f32 %v967_v12  ;;  %v973_v26 = vadd.f32 1.0, %v2441_v24  ;;  %v2443_v35 = vpop.eup %2442  ;;  %v5553_v12 = vld [vmem:[#allocation32_spill] sm:$0xff] }
 0xa9d   :  { %2446 = vtanh.f32 %v960_v15  ;;  %v980_v32 = vadd.f32 1.0, %v2443_v35  ;;  %v5563_v15 = vld [vmem:[#allocation42_spill] sm:$0xff]  ;;  %v5565_v24 = vld [vmem:[#allocation44_spill] sm:$0xff] }
 0xa9e   :  { %2448 = vrcp.f32 %v973_v26  ;;  %v5566_v26 = vld [vmem:[#allocation45_spill] sm:$0xff]  ;;  %v5567_v35 = vld [vmem:[#allocation46_spill] sm:$0xff] }
 0xa9f   :  { %2450 = vrcp.f32 %v980_v32  ;;  %v5571_v32 = vld [vmem:[#allocation50_spill] sm:$0xff] }
 0xaa9   :  { %v2445_v28 = vpop.eup %2444 }
 0xaaa   :  { %v2447_v30 = vpop.eup %2446 }
 0xaab   :  { %v2449_v4 = vpop.eup %2448  ;;  %v984_v33 = vmul.f32 %v2447_v30, %v2445_v28  ;;  %v5568_v28 = vld [vmem:[#allocation47_spill] sm:$0xff]  ;;  %v5569_v30 = vld [vmem:[#allocation48_spill] sm:$0xff] }
 0xaac   :  { %v983_v34 = vmul.f32 %v2449_v4, %v3815_v39  ;;  %v2451_v17 = vpop.eup %2450  ;;  %v5552_v39 = vld [vmem:[#allocation31_spill] sm:$0xff]  ;;  %v5570_v4 = vld [vmem:[#allocation49_spill] sm:$0xff] }
 0xaae   :  { %v4198_v18 = vadd.f32 %v984_v33, %v983_v34  ;;  %v5572_v33 = vld [vmem:[#allocation51_spill] sm:$0xff]  ;;  %v5573_v34 = vld [vmem:[#allocation52_spill] sm:$0xff] }
 0xab0   :  { %2452 = vtanh.f32 %v4198_v18 }
 0xabd   :  { %v2453_v20 = vpop.eup %2452 }
 0xabe   :  { %v987_v22 = vmul.f32 %v2453_v20, %v2451_v17  ;;  %v5574_v17 = vld [vmem:[#allocation53_spill] sm:$0xff]  ;;  %v5575_v20 = vld [vmem:[#allocation54_spill] sm:$0xff] }
 0xac0   :  { %2279 = vmatmul.mubr.f32.vlgmr.msra.gmra.mxu0 %v987_v22  ;;  %1188 = vmatprep.mubr.f32.mxu1 %v987_v22 }
 0xac1   :  { %1259 = vmatprep.mubr.f32.mxu0 %v987_v22  ;;  %1196 = vmatpush1.msra.mxu0 %v3818_v58  ;;  %v5554_v58 = vld [vmem:[#allocation33_spill] sm:$0xff]  ;;  %v5576_v22 = vld [vmem:[#allocation56_spill] sm:$0xff] }
 0xac2   :  { %1197 = vmatprep.subr.mxu0 %v3821_v59  ;;  %v5555_v59 = vld [vmem:[#allocation34_spill] sm:$0xff] }
 0xac3   :  { %1198 = vmatpush1.msra.mxu0 %v3824_v9  ;;  %v5556_v9 = vld [vmem:[#allocation35_spill] sm:$0xff] }
 0xac4   :  { %1199 = vmatprep.subr.mxu0 %v3827_v60  ;;  %v5557_v60 = vld [vmem:[#allocation36_spill] sm:$0xff] }
 0xac5   :  { %1200 = vmatpush1.msra.mxu0 %v3830_v61  ;;  %v5558_v61 = vld [vmem:[#allocation37_spill] sm:$0xff] }
 0xac6   :  { %1201 = vmatprep.subr.mxu0 %v3833_v63  ;;  %v5559_v63 = vld [vmem:[#allocation38_spill] sm:$0xff] }
 0xac7   :  { %1202 = vmatpush1.msra.mxu0 %v3836_v0  ;;  %v5560_v0 = vld [vmem:[#allocation39_spill] sm:$0xff] }
 0xac8   :  { %1203 = vmatprep.subr.mxu0 %v3839_v54  ;;  %v5561_v54 = vld [vmem:[#allocation40_spill] sm:$0xff] }
 0xac9   :  { %1204 = vmatpush1.msra.mxu0 %v3842_v51  ;;  %v5562_v51 = vld [vmem:[#allocation41_spill] sm:$0xff] }
 0xaca   :  { %1205 = vmatprep.subr.mxu0 %v5552_v39  ;;  %v5577_v39 = vld [vmem:[#allocation58_spill] sm:$0xff] }
 0xacb   :  { %1206 = vmatpush1.msra.mxu0 %v5553_v12  ;;  %v5578_v12 = vld [vmem:[#allocation60_spill] sm:$0xff] }
 0xacc   :  { %1207 = vmatprep.subr.mxu0 %v5554_v58  ;;  %v5579_v58 = vld [vmem:[#allocation62_spill] sm:$0xff] }
 0xacd   :  { %1208 = vmatpush1.msra.mxu0 %v5555_v59  ;;  %v5580_v59 = vld [vmem:[#allocation64_spill] sm:$0xff] }
 0xace   :  { %1209 = vmatprep.subr.mxu0 %v5556_v9  ;;  %v5581_v9 = vld [vmem:[#allocation66_spill] sm:$0xff] }
 0xacf   :  { %1210 = vmatpush1.msra.mxu0 %v5557_v60  ;;  %v5582_v60 = vld [vmem:[#allocation68_spill] sm:$0xff] }
 0xad0   :  { %1211 = vmatprep.subr.mxu0 %v5558_v61  ;;  %v5583_v61 = vld [vmem:[#allocation70_spill] sm:$0xff] }
 0xad1   :  { %1212 = vmatpush1.msra.mxu0 %v5559_v63  ;;  %v5584_v63 = vld [vmem:[#allocation72_spill] sm:$0xff] }
 0xad2   :  { %1213 = vmatprep.subr.mxu0 %v5560_v0  ;;  %v5585_v0 = vld [vmem:[#allocation74_spill] sm:$0xff] }
 0xad3   :  { %1214 = vmatpush1.msra.mxu0 %v5561_v54  ;;  %v5586_v54 = vld [vmem:[#allocation76_spill] sm:$0xff] }
 0xad4   :  { %1215 = vmatprep.subr.mxu0 %v5562_v51  ;;  %v5587_v51 = vld [vmem:[#allocation78_spill] sm:$0xff] }
 0xad5   :  { %1216 = vmatpush1.msra.mxu0 %v5563_v15  ;;  %v5588_v15 = vld [vmem:[#allocation80_spill] sm:$0xff] }
 0xad6   :  { %1217 = vmatprep.subr.mxu0 %v5564_v29  ;;  %v5589_v29 = vld [vmem:[#allocation82_spill] sm:$0xff] }
 0xad7   :  { %1218 = vmatpush1.msra.mxu0 %v5565_v24  ;;  %v5590_v24 = vld [vmem:[#allocation55_spill] sm:$0xff] }
 0xad8   :  { %1219 = vmatprep.subr.mxu0 %v5566_v26  ;;  %v5591_v26 = vld [vmem:[#allocation57_spill] sm:$0xff] }
 0xad9   :  { %1220 = vmatpush1.msra.mxu0 %v5567_v35  ;;  %v5592_v35 = vld [vmem:[#allocation59_spill] sm:$0xff] }
 0xada   :  { %1221 = vmatprep.subr.mxu0 %v5568_v28  ;;  %v5593_v28 = vld [vmem:[#allocation61_spill] sm:$0xff] }
 0xadb   :  { %1222 = vmatpush1.msra.mxu0 %v5569_v30  ;;  %v5594_v30 = vld [vmem:[#allocation63_spill] sm:$0xff] }
 0xadc   :  { %1223 = vmatprep.subr.mxu0 %v5570_v4  ;;  %v5595_v4 = vld [vmem:[#allocation65_spill] sm:$0xff] }
 0xadd   :  { %1224 = vmatpush1.msra.mxu0 %v5571_v32  ;;  %v5596_v32 = vld [vmem:[#allocation67_spill] sm:$0xff] }
 0xade   :  { %1225 = vmatprep.subr.mxu0 %v5572_v33  ;;  %v5597_v33 = vld [vmem:[#allocation69_spill] sm:$0xff] }
 0xadf   :  { %1226 = vmatpush1.msra.mxu0 %v5573_v34  ;;  %v5598_v34 = vld [vmem:[#allocation71_spill] sm:$0xff] }
 0xae0   :  { %1227 = vmatprep.subr.mxu0 %v5574_v17  ;;  %v4257_v17 = vld [vmem:[#allocation2 + $0x270] sm:$0xff] }
 0xae1   :  { %1228 = vmatpush2.msra.mxu0 %v5575_v20  ;;  %v4260_v20 = vld [vmem:[#allocation2 + $0x258] sm:$0xff] }
 0xae2   :  { %1229 = vmatprep.subr.mxu0 %v5576_v22  ;;  %v4263_v22 = vld [vmem:[#allocation2 + $0x250] sm:$0xff] }
 0xae3   :  { %1230 = vmatpush2.msra.mxu0 %v5577_v39  ;;  %v4266_v39 = vld [vmem:[#allocation2 + $0x238] sm:$0xff] }
 0xae4   :  { %1231 = vmatprep.subr.mxu0 %v5578_v12  ;;  %v4269_v12 = vld [vmem:[#allocation2 + $0x230] sm:$0xff] }
 0xae5   :  { %1232 = vmatpush2.msra.mxu0 %v5579_v58  ;;  %v4272_v58 = vld [vmem:[#allocation2 + $0x218] sm:$0xff] }
 0xae6   :  { %1233 = vmatprep.subr.mxu0 %v5580_v59  ;;  %v4275_v59 = vld [vmem:[#allocation2 + $0x210] sm:$0xff] }
 0xae7   :  { %1234 = vmatpush2.msra.mxu0 %v5581_v9  ;;  %v5599_v9 = vld [vmem:[#allocation73_spill] sm:$0xff] }
 0xae8   :  { %1235 = vmatprep.subr.mxu0 %v5582_v60 }
 0xae9   :  { %1236 = vmatpush2.msra.mxu0 %v5583_v61  ;;  %v4282_v61 = vld [vmem:[%s5052_s5] sm:$0x1] }
 0xaea   :  { %1237 = vmatprep.subr.mxu0 %v5584_v63 }
 0xaeb   :  { %1238 = vmatpush2.msra.mxu0 %v5585_v0 }
 0xaec   :  { %1239 = vmatprep.subr.mxu0 %v5586_v54 }
 0xaed   :  { %1240 = vmatpush2.msra.mxu0 %v5587_v51 }
 0xaee   :  { %1241 = vmatprep.subr.mxu0 %v5588_v15 }
 0xaef   :  { %1242 = vmatpush2.msra.mxu0 %v5589_v29 }
 0xaf0   :  { %1243 = vmatprep.subr.mxu0 %v5590_v24 }
 0xaf1   :  { %1244 = vmatpush2.msra.mxu0 %v5591_v26 }
 0xaf2   :  { %1245 = vmatprep.subr.mxu0 %v5592_v35 }
 0xaf3   :  { %1246 = vmatpush2.msra.mxu0 %v5593_v28 }
 0xaf4   :  { %1247 = vmatprep.subr.mxu0 %v5594_v30 }
 0xaf5   :  { %1248 = vmatpush2.msra.mxu0 %v5595_v4 }
 0xaf6   :  { %1249 = vmatprep.subr.mxu0 %v5596_v32 }
 0xaf7   :  { %1250 = vmatpush2.msra.mxu0 %v5597_v33  ;;  %v1072_v33 = vld [vmem:[%s5047_s0 + $0x2] sm:$0x1] }
 0xaf8   :  { %1251 = vmatprep.subr.mxu0 %v5598_v34 }
 0xaf9   :  { %1252 = vmatpush2.msra.mxu0 %v4257_v17 }
 0xafa   :  { %1253 = vmatprep.subr.mxu0 %v4260_v20 }
 0xafb   :  { %1254 = vmatpush2.msra.mxu0 %v4263_v22 }
 0xafc   :  { %1255 = vmatprep.subr.mxu0 %v4266_v39 }
 0xafd   :  { %1256 = vmatpush2.msra.mxu0 %v4269_v12 }
 0xafe   :  { %1257 = vmatprep.subr.mxu0 %v4272_v58 }
 0xaff   :  { %1258 = vmatpush2.msra.mxu0 %v4275_v59 }
 0xb00   :  { %1426 = vmatprep.subr.mxu0 %v5599_v9 }
 0xb80   :  { %v1054_v60 = vpop.f32.mrf.mxu0 }
 0xb81   :  { %v1055_v63 = vadd.f32 %v4282_v61, %v1054_v60 }
 0xb82   :  { %v2280_v0 = vpop.f32.mrf.mxu0 }
 0xb83   :  { %v1058_v54 = vsel %vm451_vm1, %v1055_v63, -inf }
 0xb84   :  { %1059 = vmax.xlane.f32.xlu0 %v1058_v54 }
 0xc0d   :  { %v1060_v51 = vpop.xlane.xlu0 %1059 }
 0xc0e   :  { %v1061_v15 = vsub.f32 %v1055_v63, %v1060_v51 }
 0xc10   :  { %v1062_v29 = vmul.f32 1.442695, %v1061_v15 }
 0xc12   :  { %2454 = vpow2.f32 %v1062_v29 }
 0xc1f   :  { %v2455_v24 = vpop.eup %2454 }
 0xc20   :  { %v1064_v26 = vsel %vm451_vm1, %v2455_v24, 0.0 }
 0xc21   :  { %1065 = vadd.xlane.f32.xlu1 %v1064_v26 }
 0xcaa   :  { %v1066_v35 = vpop.xlane.xlu1 %1065 }
 0xcab   :  { %2456 = vrcp.f32 %v1066_v35 }
 0xcac   :  { %2458 = vlog2.f32 %v1066_v35 }
 0xcb8   :  { %v2457_v28 = vpop.eup %2456 }
 0xcb9   :  { %v2459_v30 = vpop.eup %2458  ;;  %v4287_v4 = vmul.f32 %v2457_v28, %v2455_v24 }
 0xcba   :  { %v1070_v32 = vmul.f32 0.6931472, %v2459_v30 }
 0xcbb   :  { %5600 = vst [vmem:[#allocation86_spill] sm:$0xff] %v4287_v4  ;;  %1107 = vst.msk [vmem:[#allocation5 + $0x2] sm:$0x1] %vm451_vm1, %v4287_v4  ;;  %v4379_v4 = vld [vmem:[#allocation2 + $0x160] sm:$0xff] }
 0xcbc   :  { %v4294_v34 = vsub.f32 %v1061_v15, %v1070_v32  ;;  %5605 = vst [vmem:[#allocation20_spill] sm:$0xff] %v4379_v4 }
 0xcbe   :  { %5601 = vst [vmem:[#allocation16_spill] sm:$0xff] %v4294_v34  ;;  %v1073_v9 = vadd.f32 %v1072_v33, %v4294_v34  ;;  %v4385_v34 = vld [vmem:[%s5051_s4 + $0x50] sm:$0xff] }
 0xcbf   :  { %5606 = vst [vmem:[#allocation21_spill] sm:$0xff] %v4385_v34 }
 0xcc0   :  { %v1074_v60 = vsel %vm451_vm1, %v1073_v9, -inf }
 0xcc1   :  { %1075 = vmax.xlane.f32.xlu0 %v1074_v60 }
 0xd4a   :  { %v1076_v63 = vpop.xlane.xlu0 %1075 }
 0xd4b   :  { %vm1077_vm10 = vcmp.eq.f32.partialorder %v1073_v9, %v1076_v63 }
 0xd4c   :  { %v1078_v0 = vsel %vm1077_vm10, %v3632_v11, 7 }
 0xd4d   :  { %v1079_v54 = vsel %vm451_vm1, %v1078_v0, 2147483647  ;;  %v4314_v0 = vld [vmem:[%s5048_s1] sm:$0x7f] }
 0xd4e   :  { %v1081_v51 = vshra.s32 %v1079_v54, 16  ;;  %v1080_v24 = vand.u32 65535, %v1079_v54 }
 0xd50   :  { %v1083_v29 = vcvt.s32.f32 %v1081_v51  ;;  %v1082_v35 = vcvt.s32.f32 %v1080_v24 }
 0xd52   :  { %1084 = vmin.xlane.f32.xlu1 %v1083_v29 }
 0xddb   :  { %v1085_v26 = vpop.xlane.xlu1 %1084 }
 0xddc   :  { %vm1086_vm11 = vcmp.eq.f32.partialorder %v1083_v29, %v1085_v26  ;;  %v1091_v28 = vcvt.f32.s32 %v1085_v26 }
 0xddd   :  { %v1087_v15 = vsel %vm1086_vm11, %v1082_v35, inf }
 0xdde   :  { %1088 = vmin.xlane.f32.xlu0 %v1087_v15  ;;  %v1092_v32 = vshll.u32 %v1091_v28, 16 }
 0xe67   :  { %v1089_v30 = vpop.xlane.xlu0 %1088 }
 0xe68   :  { %v1090_v33 = vcvt.f32.s32 %v1089_v30  ;;  %v4321_v30 = vld [vmem:[%s5051_s4 + $0x78] sm:$0xff] }
 0xe6a   :  { %v4300_v60 = vadd.s32 %v1092_v32, %v1090_v33  ;;  %v4327_v32 = vld [vmem:[#allocation2 + $0x1e0] sm:$0xff]  ;;  %v4333_v33 = vld [vmem:[%s5051_s4 + $0x70] sm:$0xff] }
 0xe6c   :  { %5602 = vst [vmem:[#allocation17_spill] sm:$0xff] %v4300_v60  ;;  %1108 = vst.msk [vmem:[%s5054_s7 + $0x2] sm:$0x1] %vm502_vm4, %v4300_v60  ;;  %v1112_v9 = vrot.slane %v4300_v60, %v3524_v52  ;;  %v4388_v60 = vld [vmem:[#allocation2 + $0x148] sm:$0xff] }
 0xe6d   :  { %5607 = vst [vmem:[#allocation22_spill] sm:$0xff] %v4388_v60 }
 0xe6e   :  { %vm1113_vm12 = vcmp.eq.s32.totalorder %v3521_v50, %v1112_v9  ;;  %v4336_v9 = vld [vmem:[#allocation2 + $0x1c8] sm:$0xff] }
 0xe6f   :  { %v2068_v63 = vsel %vm1113_vm12, 1.0, %v5374_v23 }
 0xe70   :  { %v1116_v54 = vmul.f32 %v4314_v0, %v2068_v63  ;;  %v4340_v63 = vld [vmem:[#allocation2 + $0x1c0] sm:$0xff] }
 0xe72   :  { %v1117_v51 = vsel %vm512_vm6, %v1116_v54, 0.0  ;;  %v4346_v54 = vld [vmem:[%s5051_s4 + $0x68] sm:$0xff] }
 0xe73   :  { %v1118_v29 = vrot.slane %v1117_v51, 4 }
 0xe75   :  { %v1119_v24 = vadd.f32 %v1118_v29, %v1117_v51  ;;  %v4349_v51 = vld [vmem:[#allocation2 + $0x1a8] sm:$0xff]  ;;  %v4353_v29 = vld [vmem:[#allocation2 + $0x1a0] sm:$0xff] }
 0xe77   :  { %v1120_v26 = vrot.slane %v1119_v24, 2 }
 0xe79   :  { %v1121_v35 = vadd.f32 %v1120_v26, %v1119_v24  ;;  %v4359_v24 = vld [vmem:[%s5051_s4 + $0x60] sm:$0xff]  ;;  %v4362_v26 = vld [vmem:[#allocation2 + $0x188] sm:$0xff] }
 0xe7b   :  { %v1122_v15 = vrot.slane %v1121_v35, 1 }
 0xe7d   :  { %v1123_v28 = vadd.f32 %v1122_v15, %v1121_v35  ;;  %v4366_v35 = vld [vmem:[#allocation2 + $0x180] sm:$0xff]  ;;  %v4372_v15 = vld [vmem:[%s5051_s4 + $0x58] sm:$0xff] }
 0xe7e   :  { %5603 = vst [vmem:[#allocation18_spill] sm:$0xff] %v4372_v15 }
 0xe7f   :  { %1189 = vmatmul.mubr.f32.vlgmr.msra.gmra.mxu1 %v1123_v28  ;;  %1260 = vmatmul.mubr.f32.vlgmr.msra.gmra.mxu0 %v1123_v28  ;;  %v4375_v28 = vld [vmem:[#allocation2 + $0x168] sm:$0xff] }
 0xe80   :  { %2282 = vmatpush3.msra.mxu1 %v4321_v30  ;;  %2313 = vmatprep.mubr.msk.f32.mxu1 %vm2895_vm0, %v5374_v23  ;;  %5604 = vst [vmem:[#allocation19_spill] sm:$0xff] %v4375_v28 }
 0xe81   :  { %2283 = vmatprep.subr.mxu1 %v5374_v23  ;;  %1427 = vmatpush1.msra.mxu0 %v4327_v32 }
 0xe82   :  { %2284 = vmatpush3.msra.mxu1 %v4333_v33  ;;  %1428 = vmatprep.subr.mxu0 %v4336_v9 }
 0xe83   :  { %2285 = vmatprep.subr.mxu1 %v5374_v23  ;;  %1429 = vmatpush1.msra.mxu0 %v4340_v63 }
 0xe84   :  { %2286 = vmatpush3.msra.mxu1 %v4346_v54  ;;  %1430 = vmatprep.subr.mxu0 %v4349_v51 }
 0xe85   :  { %2287 = vmatprep.subr.mxu1 %v5374_v23  ;;  %1431 = vmatpush1.msra.mxu0 %v4353_v29 }
 0xe86   :  { %2288 = vmatpush3.msra.mxu1 %v4359_v24  ;;  %1432 = vmatprep.subr.mxu0 %v4362_v26 }
 0xe87   :  { %2289 = vmatprep.subr.mxu1 %v5374_v23  ;;  %1433 = vmatpush1.msra.mxu0 %v4366_v35 }
 0xe88   :  { %2290 = vmatpush3.msra.mxu1 %v4372_v15  ;;  %1434 = vmatprep.subr.mxu0 %v4375_v28  ;;  %v4392_v28 = vld [vmem:[#allocation2 + $0x140] sm:$0xff]  ;;  %v4401_v15 = vld [vmem:[#allocation2 + $0x128] sm:$0xff] }
 0xe89   :  { %2291 = vmatprep.subr.mxu1 %v5374_v23  ;;  %1435 = vmatpush1.msra.mxu0 %v4379_v4  ;;  %5608 = vst [vmem:[#allocation23_spill] sm:$0xff] %v4392_v28  ;;  %v4398_v4 = vld [vmem:[%s5051_s4 + $0x48] sm:$0xff]  ;;  %5610 = vst [vmem:[#allocation25_spill] sm:$0xff] %v4401_v15 }
 0xe8a   :  { %2292 = vmatpush3.msra.mxu1 %v4385_v34  ;;  %1436 = vmatprep.subr.mxu0 %v4388_v60  ;;  %5609 = vst [vmem:[#allocation24_spill] sm:$0xff] %v4398_v4  ;;  %v4405_v60 = vld [vmem:[#allocation2 + $0x120] sm:$0xff]  ;;  %v4414_v34 = vld [vmem:[#allocation2 + $0x108] sm:$0xff] }
 0xe8b   :  { %2293 = vmatprep.subr.mxu1 %v5374_v23  ;;  %1437 = vmatpush1.msra.mxu0 %v4392_v28  ;;  %5611 = vst [vmem:[#allocation26_spill] sm:$0xff] %v4405_v60  ;;  %v4411_v28 = vld [vmem:[%s5051_s4 + $0x40] sm:$0xff]  ;;  %5613 = vst [vmem:[#allocation28_spill] sm:$0xff] %v4414_v34 }
 0xe8c   :  { %2294 = vmatpush3.msra.mxu1 %v4398_v4  ;;  %1438 = vmatprep.subr.mxu0 %v4401_v15  ;;  %5612 = vst [vmem:[#allocation27_spill] sm:$0xff] %v4411_v28  ;;  %v4418_v15 = vld [vmem:[#allocation2 + $0x100] sm:$0xff]  ;;  %v4427_v4 = vld [vmem:[#allocation2 + $0xe8] sm:$0xff] }
 0xe8d   :  { %2295 = vmatprep.subr.mxu1 %v5374_v23  ;;  %1439 = vmatpush1.msra.mxu0 %v4405_v60  ;;  %5614 = vst [vmem:[#allocation29_spill] sm:$0xff] %v4418_v15  ;;  %v4424_v60 = vld [vmem:[%s5051_s4 + $0x38] sm:$0xff]  ;;  %5616 = vst [vmem:[#allocation31_spill] sm:$0xff] %v4427_v4 }
 0xe8e   :  { %2296 = vmatpush3.msra.mxu1 %v4411_v28  ;;  %1440 = vmatprep.subr.mxu0 %v4414_v34  ;;  %5615 = vst [vmem:[#allocation30_spill] sm:$0xff] %v4424_v60  ;;  %v4431_v34 = vld [vmem:[#allocation2 + $0xe0] sm:$0xff]  ;;  %v4440_v28 = vld [vmem:[#allocation2 + $0xc8] sm:$0xff] }
 0xe8f   :  { %2297 = vmatprep.subr.mxu1 %v5374_v23  ;;  %1441 = vmatpush1.msra.mxu0 %v4418_v15  ;;  %5617 = vst [vmem:[#allocation32_spill] sm:$0xff] %v4431_v34  ;;  %v4437_v15 = vld [vmem:[%s5051_s4 + $0x30] sm:$0xff]  ;;  %5619 = vst [vmem:[#allocation34_spill] sm:$0xff] %v4440_v28 }
 0xe90   :  { %2298 = vmatpush3.msra.mxu1 %v4424_v60  ;;  %1442 = vmatprep.subr.mxu0 %v4427_v4  ;;  %5618 = vst [vmem:[#allocation33_spill] sm:$0xff] %v4437_v15  ;;  %v4444_v4 = vld [vmem:[#allocation2 + $0xc0] sm:$0xff]  ;;  %v4453_v60 = vld [vmem:[#allocation2 + $0xa8] sm:$0xff] }
 0xe91   :  { %2299 = vmatprep.subr.mxu1 %v5374_v23  ;;  %1443 = vmatpush1.msra.mxu0 %v4431_v34  ;;  %5620 = vst [vmem:[#allocation35_spill] sm:$0xff] %v4444_v4  ;;  %v4450_v34 = vld [vmem:[%s5051_s4 + $0x28] sm:$0xff]  ;;  %5622 = vst [vmem:[#allocation37_spill] sm:$0xff] %v4453_v60 }
 0xe92   :  { %2300 = vmatpush3.msra.mxu1 %v4437_v15  ;;  %1444 = vmatprep.subr.mxu0 %v4440_v28  ;;  %5621 = vst [vmem:[#allocation36_spill] sm:$0xff] %v4450_v34  ;;  %v4457_v28 = vld [vmem:[#allocation2 + $0xa0] sm:$0xff]  ;;  %v4466_v15 = vld [vmem:[#allocation2 + $0x88] sm:$0xff] }
 0xe93   :  { %2301 = vmatprep.subr.mxu1 %v5374_v23  ;;  %1445 = vmatpush1.msra.mxu0 %v4444_v4  ;;  %5623 = vst [vmem:[#allocation38_spill] sm:$0xff] %v4457_v28  ;;  %v4463_v4 = vld [vmem:[%s5051_s4 + $0x20] sm:$0xff]  ;;  %5625 = vst [vmem:[#allocation40_spill] sm:$0xff] %v4466_v15 }
 0xe94   :  { %2302 = vmatpush3.msra.mxu1 %v4450_v34  ;;  %1446 = vmatprep.subr.mxu0 %v4453_v60  ;;  %5624 = vst [vmem:[#allocation39_spill] sm:$0xff] %v4463_v4  ;;  %v4470_v60 = vld [vmem:[#allocation2 + $0x80] sm:$0xff]  ;;  %v4479_v34 = vld [vmem:[#allocation2 + $0x68] sm:$0xff] }
 0xe95   :  { %2303 = vmatprep.subr.mxu1 %v5374_v23  ;;  %1447 = vmatpush1.msra.mxu0 %v4457_v28  ;;  %5626 = vst [vmem:[#allocation41_spill] sm:$0xff] %v4470_v60  ;;  %v4476_v28 = vld [vmem:[%s5051_s4 + $0x18] sm:$0xff]  ;;  %5628 = vst [vmem:[#allocation43_spill] sm:$0xff] %v4479_v34 }
 0xe96   :  { %2304 = vmatpush3.msra.mxu1 %v4463_v4  ;;  %1448 = vmatprep.subr.mxu0 %v4466_v15  ;;  %5627 = vst [vmem:[#allocation42_spill] sm:$0xff] %v4476_v28  ;;  %v4483_v15 = vld [vmem:[#allocation2 + $0x60] sm:$0xff]  ;;  %v4492_v4 = vld [vmem:[#allocation2 + $0x48] sm:$0xff] }
 0xe97   :  { %2305 = vmatprep.subr.mxu1 %v5374_v23  ;;  %1449 = vmatpush1.msra.mxu0 %v4470_v60  ;;  %5629 = vst [vmem:[#allocation44_spill] sm:$0xff] %v4483_v15  ;;  %v4489_v60 = vld [vmem:[%s5051_s4 + $0x10] sm:$0xff]  ;;  %5630 = vst [vmem:[#allocation45_spill] sm:$0xff] %v4492_v4 }
 0xe98   :  { %2306 = vmatpush3.msra.mxu1 %v4476_v28  ;;  %1450 = vmatprep.subr.mxu0 %v4479_v34  ;;  %v4496_v34 = vld [vmem:[#allocation2 + $0x40] sm:$0xff]  ;;  %v4505_v28 = vld [vmem:[#allocation2 + $0x28] sm:$0xff] }
 0xe99   :  { %2307 = vmatprep.subr.mxu1 %v5374_v23  ;;  %1451 = vmatpush1.msra.mxu0 %v4483_v15  ;;  %5631 = vst [vmem:[#allocation46_spill] sm:$0xff] %v4496_v34  ;;  %v4502_v15 = vld [vmem:[%s5051_s4 + $0x8] sm:$0xff] }
 0xe9a   :  { %2308 = vmatpush3.msra.mxu1 %v4489_v60  ;;  %1452 = vmatprep.subr.mxu0 %v4492_v4  ;;  %v4513_v4 = vld [vmem:[%s5051_s4] sm:$0xff] }
 0xe9b   :  { %2309 = vmatprep.subr.mxu1 %v5374_v23  ;;  %1453 = vmatpush1.msra.mxu0 %v4496_v34  ;;  %v4517_v34 = vld [vmem:[#allocation2 + $0x1f8] sm:$0xff] }
 0xe9c   :  { %2310 = vmatpush3.msra.mxu1 %v4502_v15  ;;  %1454 = vmatprep.subr.mxu0 %v4505_v28 }
 0xe9d   :  { %2311 = vmatprep.subr.mxu1 %v5374_v23  ;;  %1455 = vmatpush1.msra.mxu0 %v4085_v36  ;;  %v5632_v36 = vld [vmem:[#allocation81_spill] sm:$0xff] }
 0xe9e   :  { %2312 = vmatpush3.msra.mxu1 %v4513_v4  ;;  %1456 = vmatprep.subr.mxu0 %v4089_v38  ;;  %v5633_v38 = vld [vmem:[#allocation83_spill] sm:$0xff] }
 0xe9f   :  { %1497 = vmatprep.subr.mxu1 %v4517_v34  ;;  %1457 = vmatpush1.msra.mxu0 %v4093_v40  ;;  %v5634_v40 = vld [vmem:[#allocation84_spill] sm:$0xff] }
 0xea0   :  { %1458 = vmatprep.subr.mxu0 %v4096_v42  ;;  %v5635_v42 = vld [vmem:[#allocation12_spill] sm:$0xff] }
 0xea1   :  { %1459 = vmatpush2.msra.mxu0 %v4099_v31  ;;  %v5636_v31 = vld [vmem:[#allocation85_spill] sm:$0xff] }
 0xea2   :  { %1460 = vmatprep.subr.mxu0 %v4102_v16 }
 0xea3   :  { %1461 = vmatpush2.msra.mxu0 %v4105_v44 }
 0xea4   :  { %1462 = vmatprep.subr.mxu0 %v4108_v5 }
 0xea5   :  { %1463 = vmatpush2.msra.mxu0 %v4111_v48 }
 0xea6   :  { %1464 = vmatprep.subr.mxu0 %v4114_v37 }
 0xea7   :  { %1465 = vmatpush2.msra.mxu0 %v4117_v1 }
 0xea8   :  { %1466 = vmatprep.subr.mxu0 %v4120_v46 }
 0xea9   :  { %1467 = vmatpush2.msra.mxu0 %v4123_v7 }
 0xeaa   :  { %1468 = vmatprep.subr.mxu0 %v4126_v2 }
 0xeab   :  { %1469 = vmatpush2.msra.mxu0 %v4129_v6 }
 0xeac   :  { %1470 = vmatprep.subr.mxu0 %v4132_v8 }
 0xead   :  { %1471 = vmatpush2.msra.mxu0 %v4135_v21 }
 0xeae   :  { %1472 = vmatprep.subr.mxu0 %v4138_v47 }
 0xeaf   :  { %1473 = vmatpush2.msra.mxu0 %v4141_v3 }
 0xeb0   :  { %1474 = vmatprep.subr.mxu0 %v4144_v43 }
 0xeb1   :  { %1475 = vmatpush2.msra.mxu0 %v4147_v19 }
 0xeb2   :  { %1476 = vmatprep.subr.mxu0 %v4150_v49 }
 0xeb3   :  { %1477 = vmatpush2.msra.mxu0 %v4153_v27 }
 0xeb4   :  { %1478 = vmatprep.subr.mxu0 %v4156_v57 }
 0xeb5   :  { %1479 = vmatpush2.msra.mxu0 %v4159_v45 }
 0xeb6   :  { %1480 = vmatprep.subr.mxu0 %v4162_v56 }
 0xeb7   :  { %1481 = vmatpush2.msra.mxu0 %v4165_v55 }
 0xeb8   :  { %1482 = vmatprep.subr.mxu0 %v4168_v25 }
 0xeb9   :  { %1483 = vmatpush2.msra.mxu0 %v4171_v14 }
 0xeba   :  { %1484 = vmatprep.subr.mxu0 %v4174_v13 }
 0xebb   :  { %1485 = vmatpush2.msra.mxu0 %v5632_v36 }
 0xebc   :  { %1486 = vmatprep.subr.mxu0 %v5633_v38 }
 0xebd   :  { %1487 = vmatpush2.msra.mxu0 %v5634_v40 }
 0xebe   :  { %1488 = vmatprep.subr.mxu0 %v5635_v42 }
 0xebf   :  { %1489 = vmatpush2.msra.mxu0 %v5636_v31  ;;  %v4562_v31 = vld [vmem:[#allocation2 + $0x1f0] sm:$0xff] }
 0xec0   :  { %2316 = vmatprep.subr.mxu0 %v5374_v23 }
 0xf3f   :  { %v1190_v16 = vpop.f32.mrf.mxu1  ;;  %v1261_v37 = vpop.f32.mrf.mxu0 }
 0xf40   :  { %v1191_v44 = vadd.f32 %v1190_v16, %v5478_v62  ;;  %v1262_v43 = vadd.f32 %v1261_v37, %v3542_v10  ;;  %v4565_v16 = vld [vmem:[#allocation2 + $0x1d8] sm:$0xff]  ;;  %v4580_v37 = vld [vmem:[#allocation2 + $0x190] sm:$0xff] }
 0xf41   :  { %v1192_v5 = vpop.f32.mrf.mxu1  ;;  %v1263_v6 = vpop.f32.mrf.mxu0 }
 0xf42   :  { %v1266_v48 = vsub.f32 0.0, %v1191_v44  ;;  %v1193_v1 = vadd.f32 %v1192_v5, %v5479_v53  ;;  %v1264_v8 = vadd.f32 %v1263_v6, %v5480_v41  ;;  %v4571_v44 = vld [vmem:[#allocation2 + $0x1b8] sm:$0xff]  ;;  %v4574_v5 = vld [vmem:[#allocation2 + $0x1b0] sm:$0xff] }
 0xf43   :  { %v4595_v6 = vld [vmem:[#allocation2 + $0x138] sm:$0xff] }
 0xf44   :  { %v1267_v46 = vmul.f32 1.442695, %v1266_v48  ;;  %v1272_v7 = vsub.f32 0.0, %v1193_v1  ;;  %v1279_v21 = vsub.f32 0.0, %v1264_v8  ;;  %v4577_v48 = vld [vmem:[#allocation2 + $0x198] sm:$0xff]  ;;  %v4598_v8 = vld [vmem:[#allocation2 + $0x130] sm:$0xff] }
 0xf45   :  { %v4583_v1 = vld [vmem:[#allocation2 + $0x178] sm:$0xff] }
 0xf46   :  { %2460 = vpow2.f32 %v1267_v46  ;;  %v1273_v2 = vmul.f32 1.442695, %v1272_v7  ;;  %v1280_v47 = vmul.f32 1.442695, %v1279_v21  ;;  %v4586_v46 = vld [vmem:[#allocation2 + $0x170] sm:$0xff]  ;;  %v4589_v7 = vld [vmem:[#allocation2 + $0x158] sm:$0xff] }
 0xf47   :  { %v4601_v21 = vld [vmem:[#allocation2 + $0x118] sm:$0xff] }
 0xf48   :  { %2462 = vpow2.f32 %v1273_v2  ;;  %v4592_v2 = vld [vmem:[#allocation2 + $0x150] sm:$0xff] }
 0xf49   :  { %2464 = vpow2.f32 %v1280_v47  ;;  %v4604_v47 = vld [vmem:[#allocation2 + $0x110] sm:$0xff] }
 0xf53   :  { %v2461_v3 = vpop.eup %2460 }
 0xf54   :  { %v1269_v19 = vadd.f32 1.0, %v2461_v3  ;;  %v4607_v3 = vld [vmem:[#allocation2 + $0xf8] sm:$0xff] }
 0xf55   :  { %v2463_v49 = vpop.eup %2462 }
 0xf56   :  { %2466 = vrcp.f32 %v1269_v19  ;;  %v1275_v27 = vadd.f32 1.0, %v2463_v49  ;;  %v2465_v57 = vpop.eup %2464  ;;  %v4613_v19 = vld [vmem:[#allocation2 + $0xd8] sm:$0xff]  ;;  %v4616_v49 = vld [vmem:[#allocation2 + $0xd0] sm:$0xff] }
 0xf57   :  { %2468 = vtanh.f32 %v1262_v43  ;;  %v1282_v25 = vadd.f32 1.0, %v2465_v57  ;;  %v4610_v43 = vld [vmem:[#allocation2 + $0xf0] sm:$0xff] }
 0xf58   :  { %2470 = vrcp.f32 %v1275_v27  ;;  %v4619_v27 = vld [vmem:[#allocation2 + $0xb8] sm:$0xff]  ;;  %v4622_v57 = vld [vmem:[#allocation2 + $0xb0] sm:$0xff] }
 0xf59   :  { %2472 = vrcp.f32 %v1282_v25  ;;  %v4634_v25 = vld [vmem:[#allocation2 + $0x70] sm:$0xff] }
 0xf5a   :  { %5638 = vst [vmem:[#allocation48_spill] sm:$0xff] %v4634_v25 }
 0xf63   :  { %v2467_v45 = vpop.eup %2466 }
 0xf64   :  { %v2469_v56 = vpop.eup %2468 }
 0xf65   :  { %v2471_v55 = vpop.eup %2470  ;;  %v1286_v14 = vmul.f32 %v2469_v56, %v2467_v45  ;;  %v4625_v45 = vld [vmem:[#allocation2 + $0x98] sm:$0xff]  ;;  %v4628_v56 = vld [vmem:[#allocation2 + $0x90] sm:$0xff] }
 0xf66   :  { %v1285_v13 = vmul.f32 %v2471_v55, %v4198_v18  ;;  %v2473_v38 = vpop.eup %2472  ;;  %v4568_v18 = vld [vmem:[#allocation2 + $0x1d0] sm:$0xff]  ;;  %v4631_v55 = vld [vmem:[#allocation2 + $0x78] sm:$0xff] }
 0xf67   :  { %5637 = vst [vmem:[#allocation47_spill] sm:$0xff] %v4631_v55 }
 0xf68   :  { %v4559_v36 = vadd.f32 %v1286_v14, %v1285_v13  ;;  %v4637_v14 = vld [vmem:[#allocation2 + $0x58] sm:$0xff]  ;;  %v4640_v13 = vld [vmem:[#allocation2 + $0x50] sm:$0xff] }
 0xf69   :  { %5639 = vst [vmem:[#allocation49_spill] sm:$0xff] %v4637_v14  ;;  %5640 = vst [vmem:[#allocation50_spill] sm:$0xff] %v4640_v13 }
 0xf6a   :  { %2474 = vtanh.f32 %v4559_v36 }
 0xf77   :  { %v2475_v40 = vpop.eup %2474 }
 0xf78   :  { %v1289_v42 = vmul.f32 %v2475_v40, %v2473_v38  ;;  %v4643_v38 = vld [vmem:[#allocation2 + $0x38] sm:$0xff]  ;;  %v4646_v40 = vld [vmem:[#allocation2 + $0x30] sm:$0xff] }
 0xf79   :  { %5641 = vst [vmem:[#allocation51_spill] sm:$0xff] %v4643_v38  ;;  %5642 = vst [vmem:[#allocation52_spill] sm:$0xff] %v4646_v40 }
 0xf7a   :  { %2314 = vmatmul.mubr.f32.vlgmr.msra.gmra.mxu1 %v1289_v42  ;;  %1490 = vmatprep.mubr.f32.mxu0 %v1289_v42 }
 0xf7b   :  { %1561 = vmatprep.mubr.f32.mxu1 %v1289_v42  ;;  %1498 = vmatpush1.msra.mxu1 %v4562_v31  ;;  %v4649_v42 = vld [vmem:[#allocation2 + $0x18] sm:$0xff] }
 0xf7c   :  { %1499 = vmatprep.subr.mxu1 %v4565_v16  ;;  %5643 = vst [vmem:[#allocation53_spill] sm:$0xff] %v4649_v42 }
 0xf7d   :  { %1500 = vmatpush1.msra.mxu1 %v4568_v18 }
 0xf7e   :  { %1501 = vmatprep.subr.mxu1 %v4571_v44 }
 0xf7f   :  { %1502 = vmatpush1.msra.mxu1 %v4574_v5 }
 0xf80   :  { %1503 = vmatprep.subr.mxu1 %v4577_v48 }
 0xf81   :  { %1504 = vmatpush1.msra.mxu1 %v4580_v37 }
 0xf82   :  { %1505 = vmatprep.subr.mxu1 %v4583_v1 }
 0xf83   :  { %1506 = vmatpush1.msra.mxu1 %v4586_v46 }
 0xf84   :  { %1507 = vmatprep.subr.mxu1 %v4589_v7 }
 0xf85   :  { %1508 = vmatpush1.msra.mxu1 %v4592_v2 }
 0xf86   :  { %1509 = vmatprep.subr.mxu1 %v4595_v6 }
 0xf87   :  { %1510 = vmatpush1.msra.mxu1 %v4598_v8 }
 0xf88   :  { %1511 = vmatprep.subr.mxu1 %v4601_v21 }
 0xf89   :  { %1512 = vmatpush1.msra.mxu1 %v4604_v47 }
 0xf8a   :  { %1513 = vmatprep.subr.mxu1 %v4607_v3 }
 0xf8b   :  { %1514 = vmatpush1.msra.mxu1 %v4610_v43 }
 0xf8c   :  { %1515 = vmatprep.subr.mxu1 %v4613_v19 }
 0xf8d   :  { %1516 = vmatpush1.msra.mxu1 %v4616_v49 }
 0xf8e   :  { %1517 = vmatprep.subr.mxu1 %v4619_v27 }
 0xf8f   :  { %1518 = vmatpush1.msra.mxu1 %v4622_v57 }
 0xf90   :  { %1519 = vmatprep.subr.mxu1 %v4625_v45 }
 0xf91   :  { %1520 = vmatpush1.msra.mxu1 %v4628_v56 }
 0xf92   :  { %1521 = vmatprep.subr.mxu1 %v4631_v55 }
 0xf93   :  { %1522 = vmatpush1.msra.mxu1 %v4634_v25  ;;  %v4652_v25 = vld [vmem:[#allocation2 + $0x10] sm:$0xff] }
 0xf94   :  { %1523 = vmatprep.subr.mxu1 %v4637_v14  ;;  %5644 = vst [vmem:[#allocation54_spill] sm:$0xff] %v4652_v25  ;;  %v4655_v14 = vld [vmem:[#allocation2 + $0x3f8] sm:$0xff] }
 0xf95   :  { %1524 = vmatpush1.msra.mxu1 %v4640_v13  ;;  %5645 = vst [vmem:[#allocation56_spill] sm:$0xff] %v4655_v14  ;;  %v4658_v13 = vld [vmem:[#allocation2 + $0x3f0] sm:$0xff] }
 0xf96   :  { %1525 = vmatprep.subr.mxu1 %v4643_v38  ;;  %5646 = vst [vmem:[#allocation58_spill] sm:$0xff] %v4658_v13  ;;  %v4661_v38 = vld [vmem:[#allocation2 + $0x3d8] sm:$0xff] }
 0xf97   :  { %1526 = vmatpush1.msra.mxu1 %v4646_v40  ;;  %5647 = vst [vmem:[#allocation60_spill] sm:$0xff] %v4661_v38  ;;  %v4664_v40 = vld [vmem:[#allocation2 + $0x3d0] sm:$0xff] }
 0xf98   :  { %1527 = vmatprep.subr.mxu1 %v4649_v42  ;;  %5648 = vst [vmem:[#allocation62_spill] sm:$0xff] %v4664_v40  ;;  %v4667_v42 = vld [vmem:[#allocation2 + $0x3b8] sm:$0xff] }
 0xf99   :  { %1528 = vmatpush1.msra.mxu1 %v4652_v25  ;;  %5649 = vst [vmem:[#allocation64_spill] sm:$0xff] %v4667_v42  ;;  %v4670_v25 = vld [vmem:[#allocation2 + $0x3b0] sm:$0xff] }
 0xf9a   :  { %1529 = vmatprep.subr.mxu1 %v4655_v14  ;;  %5650 = vst [vmem:[#allocation66_spill] sm:$0xff] %v4670_v25  ;;  %v4673_v14 = vld [vmem:[#allocation2 + $0x398] sm:$0xff] }
 0xf9b   :  { %1530 = vmatpush2.msra.mxu1 %v4658_v13  ;;  %5651 = vst [vmem:[#allocation68_spill] sm:$0xff] %v4673_v14  ;;  %v4676_v13 = vld [vmem:[#allocation2 + $0x390] sm:$0xff] }
 0xf9c   :  { %1531 = vmatprep.subr.mxu1 %v4661_v38  ;;  %5652 = vst [vmem:[#allocation70_spill] sm:$0xff] %v4676_v13  ;;  %v4679_v38 = vld [vmem:[#allocation2 + $0x378] sm:$0xff] }
 0xf9d   :  { %1532 = vmatpush2.msra.mxu1 %v4664_v40  ;;  %5653 = vst [vmem:[#allocation72_spill] sm:$0xff] %v4679_v38  ;;  %v4682_v40 = vld [vmem:[#allocation2 + $0x370] sm:$0xff] }
 0xf9e   :  { %1533 = vmatprep.subr.mxu1 %v4667_v42  ;;  %5654 = vst [vmem:[#allocation74_spill] sm:$0xff] %v4682_v40  ;;  %v4685_v42 = vld [vmem:[#allocation2 + $0x358] sm:$0xff] }
 0xf9f   :  { %1534 = vmatpush2.msra.mxu1 %v4670_v25  ;;  %5655 = vst [vmem:[#allocation76_spill] sm:$0xff] %v4685_v42  ;;  %v4688_v25 = vld [vmem:[#allocation2 + $0x350] sm:$0xff] }
 0xfa0   :  { %1535 = vmatprep.subr.mxu1 %v4673_v14  ;;  %5656 = vst [vmem:[#allocation78_spill] sm:$0xff] %v4688_v25  ;;  %v4691_v14 = vld [vmem:[#allocation2 + $0x338] sm:$0xff] }
 0xfa1   :  { %1536 = vmatpush2.msra.mxu1 %v4676_v13  ;;  %5657 = vst [vmem:[#allocation80_spill] sm:$0xff] %v4691_v14  ;;  %v4694_v13 = vld [vmem:[#allocation2 + $0x330] sm:$0xff] }
 0xfa2   :  { %1537 = vmatprep.subr.mxu1 %v4679_v38  ;;  %5658 = vst [vmem:[#allocation82_spill] sm:$0xff] %v4694_v13  ;;  %v4697_v38 = vld [vmem:[#allocation2 + $0x318] sm:$0xff] }
 0xfa3   :  { %1538 = vmatpush2.msra.mxu1 %v4682_v40  ;;  %5659 = vst [vmem:[#allocation55_spill] sm:$0xff] %v4697_v38  ;;  %v4700_v40 = vld [vmem:[#allocation2 + $0x310] sm:$0xff] }
 0xfa4   :  { %1539 = vmatprep.subr.mxu1 %v4685_v42  ;;  %5660 = vst [vmem:[#allocation57_spill] sm:$0xff] %v4700_v40  ;;  %v4703_v42 = vld [vmem:[#allocation2 + $0x2f8] sm:$0xff] }
 0xfa5   :  { %1540 = vmatpush2.msra.mxu1 %v4688_v25  ;;  %5661 = vst [vmem:[#allocation59_spill] sm:$0xff] %v4703_v42  ;;  %v4706_v25 = vld [vmem:[#allocation2 + $0x2f0] sm:$0xff] }
 0xfa6   :  { %1541 = vmatprep.subr.mxu1 %v4691_v14  ;;  %5662 = vst [vmem:[#allocation61_spill] sm:$0xff] %v4706_v25  ;;  %v4709_v14 = vld [vmem:[#allocation2 + $0x2d8] sm:$0xff] }
 0xfa7   :  { %1542 = vmatpush2.msra.mxu1 %v4694_v13  ;;  %5663 = vst [vmem:[#allocation63_spill] sm:$0xff] %v4709_v14  ;;  %v4712_v13 = vld [vmem:[#allocation2 + $0x2d0] sm:$0xff] }
 0xfa8   :  { %1543 = vmatprep.subr.mxu1 %v4697_v38  ;;  %5664 = vst [vmem:[#allocation65_spill] sm:$0xff] %v4712_v13  ;;  %v4715_v38 = vld [vmem:[#allocation2 + $0x2b8] sm:$0xff] }
 0xfa9   :  { %1544 = vmatpush2.msra.mxu1 %v4700_v40  ;;  %5665 = vst [vmem:[#allocation67_spill] sm:$0xff] %v4715_v38  ;;  %v4718_v40 = vld [vmem:[#allocation2 + $0x2b0] sm:$0xff] }
 0xfaa   :  { %1545 = vmatprep.subr.mxu1 %v4703_v42  ;;  %5666 = vst [vmem:[#allocation69_spill] sm:$0xff] %v4718_v40  ;;  %v4721_v42 = vld [vmem:[#allocation2 + $0x298] sm:$0xff] }
 0xfab   :  { %1546 = vmatpush2.msra.mxu1 %v4706_v25  ;;  %5667 = vst [vmem:[#allocation71_spill] sm:$0xff] %v4721_v42  ;;  %v4724_v25 = vld [vmem:[#allocation2 + $0x290] sm:$0xff] }
 0xfac   :  { %1547 = vmatprep.subr.mxu1 %v4709_v14  ;;  %5668 = vst [vmem:[#allocation73_spill] sm:$0xff] %v4724_v25  ;;  %v4727_v14 = vld [vmem:[#allocation2 + $0x278] sm:$0xff] }
 0xfad   :  { %1548 = vmatpush2.msra.mxu1 %v4712_v13  ;;  %5669 = vst [vmem:[#allocation81_spill] sm:$0xff] %v4727_v14 }
 0xfae   :  { %1549 = vmatprep.subr.mxu1 %v4715_v38 }
 0xfaf   :  { %1550 = vmatpush2.msra.mxu1 %v4718_v40 }
 0xfb0   :  { %1551 = vmatprep.subr.mxu1 %v4721_v42  ;;  %v2757_v42 = vld [vmem:[#allocation2 + $0x1e8] sm:$0xff] }
 0xfb1   :  { %1552 = vmatpush2.msra.mxu1 %v4724_v25 }
 0xfb2   :  { %1553 = vmatprep.subr.mxu1 %v4727_v14 }
 0xfb3   :  { %1554 = vmatpush2.msra.mxu1 %v4257_v17 }
 0xfb4   :  { %1555 = vmatprep.subr.mxu1 %v4260_v20 }
 0xfb5   :  { %1556 = vmatpush2.msra.mxu1 %v4263_v22 }
 0xfb6   :  { %1557 = vmatprep.subr.mxu1 %v4266_v39 }
 0xfb7   :  { %1558 = vmatpush2.msra.mxu1 %v4269_v12 }
 0xfb8   :  { %1559 = vmatprep.subr.mxu1 %v4272_v58 }
 0xfb9   :  { %1560 = vmatpush2.msra.mxu1 %v4275_v59 }
 0xfba   :  { %1728 = vmatprep.subr.mxu1 %v2757_v42 }
0x103a   :  { %v1356_v25 = vpop.f32.mrf.mxu1 }
0x103b   :  { %v1357_v40 = vadd.f32 %v4282_v61, %v1356_v25  ;;  %v1374_v25 = vld [vmem:[%s5047_s0 + $0x3] sm:$0x1] }
0x103c   :  { %v2315_v14 = vpop.f32.mrf.mxu1 }
0x103d   :  { %v1360_v17 = vsel %vm451_vm1, %v1357_v40, -inf }
0x103e   :  { %1361 = vmax.xlane.f32.xlu1 %v1360_v17 }
0x10c7   :  { %v1362_v20 = vpop.xlane.xlu1 %1361 }
0x10c8   :  { %v1363_v38 = vsub.f32 %v1357_v40, %v1362_v20 }
0x10ca   :  { %v1364_v22 = vmul.f32 1.442695, %v1363_v38 }
0x10cc   :  { %2476 = vpow2.f32 %v1364_v22 }
0x10d9   :  { %v2477_v39 = vpop.eup %2476 }
0x10da   :  { %v1366_v12 = vsel %vm451_vm1, %v2477_v39, 0.0 }
0x10db   :  { %1367 = vadd.xlane.f32.xlu0 %v1366_v12 }
0x1164   :  { %v1368_v58 = vpop.xlane.xlu0 %1367 }
0x1165   :  { %2478 = vrcp.f32 %v1368_v58 }
0x1166   :  { %2480 = vlog2.f32 %v1368_v58 }
0x1172   :  { %v2479_v59 = vpop.eup %2478 }
0x1173   :  { %v2481_v42 = vpop.eup %2480  ;;  %v4740_v13 = vmul.f32 %v2479_v59, %v2477_v39 }
0x1174   :  { %v1372_v61 = vmul.f32 0.6931472, %v2481_v42 }
0x1175   :  { %5670 = vst [vmem:[#allocation83_spill] sm:$0xff] %v4740_v13  ;;  %1409 = vst.msk [vmem:[#allocation5 + $0x3] sm:$0x1] %vm451_vm1, %v4740_v13 }
0x1176   :  { %v4747_v14 = vsub.f32 %v1363_v38, %v1372_v61 }
0x1178   :  { %5671 = vst [vmem:[#allocation84_spill] sm:$0xff] %v4747_v14  ;;  %v1375_v40 = vadd.f32 %v1374_v25, %v4747_v14 }
0x117a   :  { %v1376_v17 = vsel %vm451_vm1, %v1375_v40, -inf }
0x117b   :  { %1377 = vmax.xlane.f32.xlu1 %v1376_v17 }
0x1204   :  { %v1378_v20 = vpop.xlane.xlu1 %1377 }
0x1205   :  { %vm1379_vm13 = vcmp.eq.f32.partialorder %v1375_v40, %v1378_v20 }
0x1206   :  { %v1380_v22 = vsel %vm1379_vm13, %v3632_v11, 7 }
0x1207   :  { %v1381_v39 = vsel %vm451_vm1, %v1380_v22, 2147483647 }
0x1208   :  { %v1383_v12 = vshra.s32 %v1381_v39, 16  ;;  %v1382_v59 = vand.u32 65535, %v1381_v39 }
0x120a   :  { %v1385_v58 = vcvt.s32.f32 %v1383_v12  ;;  %v1384_v55 = vcvt.s32.f32 %v1382_v59 }
0x120c   :  { %1386 = vmin.xlane.f32.xlu0 %v1385_v58 }
0x1295   :  { %v1387_v42 = vpop.xlane.xlu0 %1386 }
0x1296   :  { %vm1388_vm14 = vcmp.eq.f32.partialorder %v1385_v58, %v1387_v42  ;;  %v1393_v61 = vcvt.f32.s32 %v1387_v42  ;;  %v5683_v42 = vld [vmem:[#allocation29_spill] sm:$0xff] }
0x1297   :  { %v1389_v38 = vsel %vm1388_vm14, %v1384_v55, inf }
0x1298   :  { %1390 = vmin.xlane.f32.xlu1 %v1389_v38  ;;  %v1394_v13 = vshll.u32 %v1393_v61, 16  ;;  %v5684_v38 = vld [vmem:[#allocation30_spill] sm:$0xff]  ;;  %v5685_v61 = vld [vmem:[#allocation31_spill] sm:$0xff] }
0x1321   :  { %v1391_v25 = vpop.xlane.xlu1 %1390 }
0x1322   :  { %v1392_v14 = vcvt.f32.s32 %v1391_v25  ;;  %v5686_v25 = vld [vmem:[#allocation32_spill] sm:$0xff] }
0x1324   :  { %v4753_v17 = vadd.s32 %v1394_v13, %v1392_v14 }
0x1326   :  { %1410 = vst.msk [vmem:[%s5054_s7 + $0x3] sm:$0x1] %vm502_vm4, %v4753_v17  ;;  %v1414_v40 = vrot.slane %v4753_v17, %v3524_v52  ;;  %vm1396_vm8 = vcmp.eq.s32.totalorder %v3632_v11, %v4753_v17 }
0x1328   :  { %vm1415_vm15 = vcmp.eq.s32.totalorder %v3521_v50, %v1414_v40  ;;  %v5687_v40 = vld [vmem:[#allocation33_spill] sm:$0xff] }
0x1329   :  { %v2070_v55 = vsel %vm1415_vm15, 1.0, %v5374_v23 }
0x132a   :  { %v1418_v20 = vmul.f32 %v4314_v0, %v2070_v55  ;;  %v5672_v0 = vld [vmem:[#allocation18_spill] sm:$0xff] }
0x132b   :  { %v5688_v55 = vld [vmem:[#allocation34_spill] sm:$0xff] }
0x132c   :  { %v1419_v22 = vsel %vm512_vm6, %v1418_v20, 0.0  ;;  %v5689_v20 = vld [vmem:[#allocation35_spill] sm:$0xff] }
0x132d   :  { %v1420_v39 = vrot.slane %v1419_v22, 4 }
0x132f   :  { %v1421_v13 = vadd.f32 %v1420_v39, %v1419_v22  ;;  %v5690_v22 = vld [vmem:[#allocation36_spill] sm:$0xff]  ;;  %v5691_v39 = vld [vmem:[#allocation37_spill] sm:$0xff] }
0x1331   :  { %v1422_v14 = vrot.slane %v1421_v13, 2 }
0x1333   :  { %v1423_v12 = vadd.f32 %v1422_v14, %v1421_v13  ;;  %v5692_v13 = vld [vmem:[#allocation38_spill] sm:$0xff]  ;;  %v5693_v14 = vld [vmem:[#allocation39_spill] sm:$0xff] }
0x1335   :  { %v1424_v58 = vrot.slane %v1423_v12, 1 }
0x1337   :  { %v1425_v59 = vadd.f32 %v1424_v58, %v1423_v12  ;;  %v5694_v12 = vld [vmem:[#allocation40_spill] sm:$0xff]  ;;  %v5695_v58 = vld [vmem:[#allocation41_spill] sm:$0xff] }
0x1339   :  { %1491 = vmatmul.mubr.f32.vlgmr.msra.gmra.mxu0 %v1425_v59  ;;  %1562 = vmatmul.mubr.f32.vlgmr.msra.gmra.mxu1 %v1425_v59  ;;  %v5696_v59 = vld [vmem:[#allocation42_spill] sm:$0xff] }
0x133a   :  { %2317 = vmatpush3.msra.mxu0 %v4321_v30  ;;  %2348 = vmatprep.mubr.msk.f32.mxu0 %vm2895_vm0, %v5374_v23  ;;  %v5673_v30 = vld [vmem:[#allocation19_spill] sm:$0xff] }
0x133b   :  { %2318 = vmatprep.subr.mxu0 %v5374_v23  ;;  %1729 = vmatpush1.msra.mxu1 %v4327_v32  ;;  %v5674_v32 = vld [vmem:[#allocation20_spill] sm:$0xff] }
0x133c   :  { %2319 = vmatpush3.msra.mxu0 %v4333_v33  ;;  %1730 = vmatprep.subr.mxu1 %v4336_v9  ;;  %v5675_v33 = vld [vmem:[#allocation21_spill] sm:$0xff]  ;;  %v5676_v9 = vld [vmem:[#allocation22_spill] sm:$0xff] }
0x133d   :  { %2320 = vmatprep.subr.mxu0 %v5374_v23  ;;  %1731 = vmatpush1.msra.mxu1 %v4340_v63  ;;  %v5677_v63 = vld [vmem:[#allocation23_spill] sm:$0xff] }
0x133e   :  { %2321 = vmatpush3.msra.mxu0 %v4346_v54  ;;  %1732 = vmatprep.subr.mxu1 %v4349_v51  ;;  %v5678_v54 = vld [vmem:[#allocation24_spill] sm:$0xff]  ;;  %v5679_v51 = vld [vmem:[#allocation25_spill] sm:$0xff] }
0x133f   :  { %2322 = vmatprep.subr.mxu0 %v5374_v23  ;;  %1733 = vmatpush1.msra.mxu1 %v4353_v29  ;;  %v5680_v29 = vld [vmem:[#allocation26_spill] sm:$0xff] }
0x1340   :  { %2323 = vmatpush3.msra.mxu0 %v4359_v24  ;;  %1734 = vmatprep.subr.mxu1 %v4362_v26  ;;  %v5681_v26 = vld [vmem:[#allocation27_spill] sm:$0xff] }
0x1341   :  { %2324 = vmatprep.subr.mxu0 %v5374_v23  ;;  %1735 = vmatpush1.msra.mxu1 %v4366_v35  ;;  %v5682_v35 = vld [vmem:[#allocation28_spill] sm:$0xff] }
0x1342   :  { %2325 = vmatpush3.msra.mxu0 %v5672_v0  ;;  %1736 = vmatprep.subr.mxu1 %v5673_v30  ;;  %v5697_v30 = vld [vmem:[#allocation43_spill] sm:$0xff] }
0x1343   :  { %2326 = vmatprep.subr.mxu0 %v5374_v23  ;;  %1737 = vmatpush1.msra.mxu1 %v5674_v32  ;;  %v5698_v32 = vld [vmem:[#allocation44_spill] sm:$0xff] }
0x1344   :  { %2327 = vmatpush3.msra.mxu0 %v5675_v33  ;;  %1738 = vmatprep.subr.mxu1 %v5676_v9  ;;  %v5699_v9 = vld [vmem:[#allocation45_spill] sm:$0xff] }
0x1345   :  { %2328 = vmatprep.subr.mxu0 %v5374_v23  ;;  %1739 = vmatpush1.msra.mxu1 %v5677_v63  ;;  %v5700_v63 = vld [vmem:[#allocation46_spill] sm:$0xff] }
0x1346   :  { %2329 = vmatpush3.msra.mxu0 %v5678_v54  ;;  %1740 = vmatprep.subr.mxu1 %v5679_v51  ;;  %v2758_v51 = vld [vmem:[#allocation2 + $0x20] sm:$0xff] }
0x1347   :  { %2330 = vmatprep.subr.mxu0 %v5374_v23  ;;  %1741 = vmatpush1.msra.mxu1 %v5680_v29  ;;  %v2759_v29 = vld [vmem:[#allocation2 + $0x8] sm:$0xff] }
0x1348   :  { %2331 = vmatpush3.msra.mxu0 %v5681_v26  ;;  %1742 = vmatprep.subr.mxu1 %v5682_v35  ;;  %v2760_v35 = vld [vmem:[#allocation2] sm:$0xff] }
0x1349   :  { %2332 = vmatprep.subr.mxu0 %v5374_v23  ;;  %1743 = vmatpush1.msra.mxu1 %v5683_v42  ;;  %v2761_v42 = vld [vmem:[#allocation2 + $0x3e8] sm:$0xff] }
0x134a   :  { %2333 = vmatpush3.msra.mxu0 %v5684_v38  ;;  %1744 = vmatprep.subr.mxu1 %v5685_v61  ;;  %v2762_v61 = vld [vmem:[#allocation2 + $0x3e0] sm:$0xff] }
0x134b   :  { %2334 = vmatprep.subr.mxu0 %v5374_v23  ;;  %1745 = vmatpush1.msra.mxu1 %v5686_v25  ;;  %v2763_v25 = vld [vmem:[#allocation2 + $0x3c8] sm:$0xff] }
0x134c   :  { %2335 = vmatpush3.msra.mxu0 %v5687_v40  ;;  %1746 = vmatprep.subr.mxu1 %v5688_v55  ;;  %v2764_v55 = vld [vmem:[#allocation2 + $0x3c0] sm:$0xff] }
0x134d   :  { %2336 = vmatprep.subr.mxu0 %v5374_v23  ;;  %1747 = vmatpush1.msra.mxu1 %v5689_v20  ;;  %v2766_v20 = vld [vmem:[#allocation2 + $0x3a0] sm:$0xff] }
0x134e   :  { %2337 = vmatpush3.msra.mxu0 %v5690_v22  ;;  %1748 = vmatprep.subr.mxu1 %v5691_v39  ;;  %v2767_v39 = vld [vmem:[#allocation2 + $0x388] sm:$0xff] }
0x134f   :  { %2338 = vmatprep.subr.mxu0 %v5374_v23  ;;  %1749 = vmatpush1.msra.mxu1 %v5692_v13  ;;  %v2768_v13 = vld [vmem:[#allocation2 + $0x380] sm:$0xff] }
0x1350   :  { %2339 = vmatpush3.msra.mxu0 %v5693_v14  ;;  %1750 = vmatprep.subr.mxu1 %v5694_v12  ;;  %v2769_v12 = vld [vmem:[#allocation2 + $0x368] sm:$0xff] }
0x1351   :  { %2340 = vmatprep.subr.mxu0 %v5374_v23  ;;  %1751 = vmatpush1.msra.mxu1 %v5695_v58  ;;  %v2771_v58 = vld [vmem:[#allocation2 + $0x348] sm:$0xff] }
0x1352   :  { %2341 = vmatpush3.msra.mxu0 %v5696_v59  ;;  %1752 = vmatprep.subr.mxu1 %v5697_v30  ;;  %v2772_v30 = vld [vmem:[#allocation2 + $0x340] sm:$0xff] }
0x1353   :  { %2342 = vmatprep.subr.mxu0 %v5374_v23  ;;  %1753 = vmatpush1.msra.mxu1 %v5698_v32  ;;  %v2773_v32 = vld [vmem:[#allocation2 + $0x328] sm:$0xff] }
0x1354   :  { %2343 = vmatpush3.msra.mxu0 %v4489_v60  ;;  %1754 = vmatprep.subr.mxu1 %v5699_v9  ;;  %v2774_v9 = vld [vmem:[#allocation2 + $0x320] sm:$0xff] }
0x1355   :  { %2344 = vmatprep.subr.mxu0 %v5374_v23  ;;  %1755 = vmatpush1.msra.mxu1 %v5700_v63  ;;  %v2775_v63 = vld [vmem:[#allocation2 + $0x308] sm:$0xff] }
0x1356   :  { %2345 = vmatpush3.msra.mxu0 %v4502_v15  ;;  %1756 = vmatprep.subr.mxu1 %v4505_v28  ;;  %v2765_v28 = vld [vmem:[#allocation2 + $0x3a8] sm:$0xff] }
0x1357   :  { %2346 = vmatprep.subr.mxu0 %v5374_v23  ;;  %1757 = vmatpush1.msra.mxu1 %v2758_v51  ;;  %v2776_v51 = vld [vmem:[#allocation2 + $0x300] sm:$0xff] }
0x1358   :  { %2347 = vmatpush3.msra.mxu0 %v4513_v4  ;;  %1758 = vmatprep.subr.mxu1 %v2759_v29  ;;  %v2777_v29 = vld [vmem:[#allocation2 + $0x2e8] sm:$0xff] }
0x1359   :  { %1799 = vmatprep.subr.mxu0 %v4517_v34  ;;  %1759 = vmatpush1.msra.mxu1 %v2760_v35  ;;  %v2770_v34 = vld [vmem:[#allocation2 + $0x360] sm:$0xff] }
0x135a   :  { %1760 = vmatprep.subr.mxu1 %v2761_v42  ;;  %v2778_v35 = vld [vmem:[#allocation2 + $0x2e0] sm:$0xff]  ;;  %v2779_v42 = vld [vmem:[#allocation2 + $0x2c8] sm:$0xff] }
0x135b   :  { %1761 = vmatpush2.msra.mxu1 %v2762_v61  ;;  %v2780_v61 = vld [vmem:[#allocation2 + $0x2c0] sm:$0xff] }
0x135c   :  { %1762 = vmatprep.subr.mxu1 %v2763_v25  ;;  %v2781_v25 = vld [vmem:[#allocation2 + $0x2a8] sm:$0xff] }
0x135d   :  { %1763 = vmatpush2.msra.mxu1 %v2764_v55  ;;  %v2782_v55 = vld [vmem:[#allocation2 + $0x2a0] sm:$0xff] }
0x135e   :  { %1764 = vmatprep.subr.mxu1 %v2765_v28  ;;  %v2783_v28 = vld [vmem:[#allocation2 + $0x288] sm:$0xff] }
0x135f   :  { %1765 = vmatpush2.msra.mxu1 %v2766_v20  ;;  %v2784_v20 = vld [vmem:[#allocation2 + $0x280] sm:$0xff] }
0x1360   :  { %1766 = vmatprep.subr.mxu1 %v2767_v39  ;;  %v2785_v39 = vld [vmem:[#allocation2 + $0x268] sm:$0xff] }
0x1361   :  { %1767 = vmatpush2.msra.mxu1 %v2768_v13  ;;  %v2786_v13 = vld [vmem:[#allocation2 + $0x260] sm:$0xff] }
0x1362   :  { %1768 = vmatprep.subr.mxu1 %v2769_v12  ;;  %v2787_v12 = vld [vmem:[#allocation2 + $0x248] sm:$0xff] }
0x1363   :  { %1769 = vmatpush2.msra.mxu1 %v2770_v34  ;;  %v2788_v34 = vld [vmem:[#allocation2 + $0x240] sm:$0xff] }
0x1364   :  { %1770 = vmatprep.subr.mxu1 %v2771_v58  ;;  %v2789_v58 = vld [vmem:[#allocation2 + $0x228] sm:$0xff] }
0x1365   :  { %1771 = vmatpush2.msra.mxu1 %v2772_v30  ;;  %v2790_v30 = vld [vmem:[#allocation2 + $0x220] sm:$0xff] }
0x1366   :  { %1772 = vmatprep.subr.mxu1 %v2773_v32  ;;  %v2791_v32 = vld [vmem:[#allocation2 + $0x208] sm:$0xff] }
0x1367   :  { %1773 = vmatpush2.msra.mxu1 %v2774_v9  ;;  %v2792_v9 = vld [vmem:[#allocation2 + $0x200] sm:$0xff] }
0x1368   :  { %1774 = vmatprep.subr.mxu1 %v2775_v63 }
0x1369   :  { %1775 = vmatpush2.msra.mxu1 %v2776_v51 }
0x136a   :  { %1776 = vmatprep.subr.mxu1 %v2777_v29 }
0x136b   :  { %1777 = vmatpush2.msra.mxu1 %v2778_v35 }
0x136c   :  { %1778 = vmatprep.subr.mxu1 %v2779_v42 }
0x136d   :  { %1779 = vmatpush2.msra.mxu1 %v2780_v61 }
0x136e   :  { %1780 = vmatprep.subr.mxu1 %v2781_v25 }
0x136f   :  { %1781 = vmatpush2.msra.mxu1 %v2782_v55 }
0x1370   :  { %1782 = vmatprep.subr.mxu1 %v2783_v28 }
0x1371   :  { %1783 = vmatpush2.msra.mxu1 %v2784_v20 }
0x1372   :  { %1784 = vmatprep.subr.mxu1 %v2785_v39 }
0x1373   :  { %1785 = vmatpush2.msra.mxu1 %v2786_v13 }
0x1374   :  { %1786 = vmatprep.subr.mxu1 %v2787_v12 }
0x1375   :  { %1787 = vmatpush2.msra.mxu1 %v2788_v34 }
0x1376   :  { %1788 = vmatprep.subr.mxu1 %v2789_v58 }
0x1377   :  { %1789 = vmatpush2.msra.mxu1 %v2790_v30 }
0x1378   :  { %1790 = vmatprep.subr.mxu1 %v2791_v32 }
0x1379   :  { %1791 = vmatpush2.msra.mxu1 %v2792_v9 }
0x137a   :  { %2351 = vmatprep.subr.mxu1 %v5374_v23 }
0x13f9   :  { %v1492_v63 = vpop.f32.mrf.mxu0  ;;  %v1563_v42 = vpop.f32.mrf.mxu1 }
0x13fa   :  { %v1493_v51 = vadd.f32 %v1492_v63, %v5478_v62  ;;  %v1564_v58 = vadd.f32 %v1563_v42, %v3542_v10 }
0x13fb   :  { %v1494_v29 = vpop.f32.mrf.mxu0  ;;  %v1565_v20 = vpop.f32.mrf.mxu1 }
0x13fc   :  { %v1568_v35 = vsub.f32 0.0, %v1493_v51  ;;  %v1495_v61 = vadd.f32 %v1494_v29, %v5479_v53  ;;  %v1566_v39 = vadd.f32 %v1565_v20, %v5480_v41 }
0x13fe   :  { %v1569_v25 = vmul.f32 1.442695, %v1568_v35  ;;  %v1574_v55 = vsub.f32 0.0, %v1495_v61  ;;  %v1581_v13 = vsub.f32 0.0, %v1566_v39 }
0x1400   :  { %2482 = vpow2.f32 %v1569_v25  ;;  %v1575_v28 = vmul.f32 1.442695, %v1574_v55  ;;  %v1582_v12 = vmul.f32 1.442695, %v1581_v13  ;;  %v5725_v13 = vld [vmem:[#allocation59_spill] sm:$0xff] }
0x1402   :  { %2484 = vpow2.f32 %v1575_v28 }
0x1403   :  { %2486 = vpow2.f32 %v1582_v12  ;;  %v5726_v12 = vld [vmem:[#allocation61_spill] sm:$0xff] }
0x140d   :  { %v2483_v34 = vpop.eup %2482 }
0x140e   :  { %v1571_v30 = vadd.f32 1.0, %v2483_v34  ;;  %v5727_v34 = vld [vmem:[#allocation63_spill] sm:$0xff] }
0x140f   :  { %v2485_v32 = vpop.eup %2484 }
0x1410   :  { %2488 = vrcp.f32 %v1571_v30  ;;  %v1577_v9 = vadd.f32 1.0, %v2485_v32  ;;  %v2487_v63 = vpop.eup %2486  ;;  %v5729_v30 = vld [vmem:[#allocation67_spill] sm:$0xff]  ;;  %v5730_v32 = vld [vmem:[#allocation69_spill] sm:$0xff] }
0x1411   :  { %2490 = vtanh.f32 %v1564_v58  ;;  %v1584_v61 = vadd.f32 1.0, %v2487_v63  ;;  %v5728_v58 = vld [vmem:[#allocation65_spill] sm:$0xff] }
0x1412   :  { %2492 = vrcp.f32 %v1577_v9  ;;  %v5731_v9 = vld [vmem:[#allocation71_spill] sm:$0xff]  ;;  %v5732_v63 = vld [vmem:[#allocation73_spill] sm:$0xff] }
0x1413   :  { %2494 = vrcp.f32 %v1584_v61  ;;  %v2795_v61 = vld [vmem:[#allocation2 + $0x250] sm:$0xff] }
0x141d   :  { %v2489_v51 = vpop.eup %2488 }
0x141e   :  { %v2491_v29 = vpop.eup %2490 }
0x141f   :  { %v2493_v35 = vpop.eup %2492  ;;  %v1588_v25 = vmul.f32 %v2491_v29, %v2489_v51  ;;  %v5733_v51 = vld [vmem:[#allocation81_spill] sm:$0xff] }
0x1420   :  { %v1587_v55 = vmul.f32 %v2493_v35, %v4559_v36  ;;  %v2495_v42 = vpop.eup %2494  ;;  %v5701_v36 = vld [vmem:[#allocation47_spill] sm:$0xff]  ;;  %v2793_v29 = vld [vmem:[#allocation2 + $0x270] sm:$0xff]  ;;  %v2794_v35 = vld [vmem:[#allocation2 + $0x258] sm:$0xff] }
0x1422   :  { %v4834_v28 = vadd.f32 %v1588_v25, %v1587_v55  ;;  %v2796_v25 = vld [vmem:[#allocation2 + $0x238] sm:$0xff]  ;;  %v2797_v55 = vld [vmem:[#allocation2 + $0x230] sm:$0xff] }
0x1424   :  { %2496 = vtanh.f32 %v4834_v28 }
0x1431   :  { %v2497_v20 = vpop.eup %2496 }
0x1432   :  { %v1591_v39 = vmul.f32 %v2497_v20, %v2495_v42  ;;  %v2798_v42 = vld [vmem:[#allocation2 + $0x218] sm:$0xff]  ;;  %v2799_v20 = vld [vmem:[#allocation2 + $0x210] sm:$0xff] }
0x1434   :  { %2349 = vmatmul.mubr.f32.vlgmr.msra.gmra.mxu0 %v1591_v39  ;;  %1792 = vmatprep.mubr.f32.mxu1 %v1591_v39 }
0x1435   :  { %1863 = vmatprep.mubr.f32.mxu0 %v1591_v39  ;;  %1800 = vmatpush1.msra.mxu0 %v4562_v31  ;;  %v5702_v31 = vld [vmem:[#allocation48_spill] sm:$0xff] }
0x1436   :  { %1801 = vmatprep.subr.mxu0 %v4565_v16  ;;  %v5703_v16 = vld [vmem:[#allocation49_spill] sm:$0xff] }
0x1437   :  { %1802 = vmatpush1.msra.mxu0 %v4568_v18  ;;  %v5704_v18 = vld [vmem:[#allocation50_spill] sm:$0xff] }
0x1438   :  { %1803 = vmatprep.subr.mxu0 %v4571_v44  ;;  %v5705_v44 = vld [vmem:[#allocation51_spill] sm:$0xff] }
0x1439   :  { %1804 = vmatpush1.msra.mxu0 %v4574_v5  ;;  %v5706_v5 = vld [vmem:[#allocation52_spill] sm:$0xff] }
0x143a   :  { %1805 = vmatprep.subr.mxu0 %v4577_v48  ;;  %v5707_v48 = vld [vmem:[#allocation53_spill] sm:$0xff] }
0x143b   :  { %1806 = vmatpush1.msra.mxu0 %v4580_v37  ;;  %v5708_v37 = vld [vmem:[#allocation54_spill] sm:$0xff] }
0x143c   :  { %1807 = vmatprep.subr.mxu0 %v4583_v1  ;;  %v5709_v1 = vld [vmem:[#allocation56_spill] sm:$0xff] }
0x143d   :  { %1808 = vmatpush1.msra.mxu0 %v4586_v46  ;;  %v5710_v46 = vld [vmem:[#allocation58_spill] sm:$0xff] }
0x143e   :  { %1809 = vmatprep.subr.mxu0 %v4589_v7  ;;  %v5711_v7 = vld [vmem:[#allocation60_spill] sm:$0xff] }
0x143f   :  { %1810 = vmatpush1.msra.mxu0 %v4592_v2  ;;  %v5712_v2 = vld [vmem:[#allocation62_spill] sm:$0xff] }
0x1440   :  { %1811 = vmatprep.subr.mxu0 %v4595_v6  ;;  %v5713_v6 = vld [vmem:[#allocation64_spill] sm:$0xff] }
0x1441   :  { %1812 = vmatpush1.msra.mxu0 %v4598_v8  ;;  %v5714_v8 = vld [vmem:[#allocation66_spill] sm:$0xff] }
0x1442   :  { %1813 = vmatprep.subr.mxu0 %v4601_v21  ;;  %v5715_v21 = vld [vmem:[#allocation68_spill] sm:$0xff] }
0x1443   :  { %1814 = vmatpush1.msra.mxu0 %v4604_v47  ;;  %v5716_v47 = vld [vmem:[#allocation70_spill] sm:$0xff] }
0x1444   :  { %1815 = vmatprep.subr.mxu0 %v4607_v3  ;;  %v5717_v3 = vld [vmem:[#allocation72_spill] sm:$0xff] }
0x1445   :  { %1816 = vmatpush1.msra.mxu0 %v4610_v43  ;;  %v5718_v43 = vld [vmem:[#allocation74_spill] sm:$0xff] }
0x1446   :  { %1817 = vmatprep.subr.mxu0 %v4613_v19  ;;  %v5719_v19 = vld [vmem:[#allocation76_spill] sm:$0xff] }
0x1447   :  { %1818 = vmatpush1.msra.mxu0 %v4616_v49  ;;  %v5720_v49 = vld [vmem:[#allocation78_spill] sm:$0xff] }
0x1448   :  { %1819 = vmatprep.subr.mxu0 %v4619_v27  ;;  %v5721_v27 = vld [vmem:[#allocation80_spill] sm:$0xff] }
0x1449   :  { %1820 = vmatpush1.msra.mxu0 %v4622_v57  ;;  %v5722_v57 = vld [vmem:[#allocation82_spill] sm:$0xff] }
0x144a   :  { %1821 = vmatprep.subr.mxu0 %v4625_v45  ;;  %v5723_v45 = vld [vmem:[#allocation55_spill] sm:$0xff] }
0x144b   :  { %1822 = vmatpush1.msra.mxu0 %v4628_v56  ;;  %v5724_v56 = vld [vmem:[#allocation57_spill] sm:$0xff] }
0x144c   :  { %1823 = vmatprep.subr.mxu0 %v5701_v36  ;;  %v4896_v36 = vld [vmem:[%s5052_s5] sm:$0x1] }
0x144d   :  { %1824 = vmatpush1.msra.mxu0 %v5702_v31 }
0x144e   :  { %1825 = vmatprep.subr.mxu0 %v5703_v16 }
0x144f   :  { %1826 = vmatpush1.msra.mxu0 %v5704_v18 }
0x1450   :  { %1827 = vmatprep.subr.mxu0 %v5705_v44 }
0x1451   :  { %1828 = vmatpush1.msra.mxu0 %v5706_v5 }
0x1452   :  { %1829 = vmatprep.subr.mxu0 %v5707_v48 }
0x1453   :  { %1830 = vmatpush1.msra.mxu0 %v5708_v37 }
0x1454   :  { %1831 = vmatprep.subr.mxu0 %v5709_v1 }
0x1455   :  { %1832 = vmatpush2.msra.mxu0 %v5710_v46 }
0x1456   :  { %1833 = vmatprep.subr.mxu0 %v5711_v7 }
0x1457   :  { %1834 = vmatpush2.msra.mxu0 %v5712_v2 }
0x1458   :  { %1835 = vmatprep.subr.mxu0 %v5713_v6 }
0x1459   :  { %1836 = vmatpush2.msra.mxu0 %v5714_v8 }
0x145a   :  { %1837 = vmatprep.subr.mxu0 %v5715_v21  ;;  %v1676_v21 = vld [vmem:[%s5047_s0 + $0x4] sm:$0x1] }
0x145b   :  { %1838 = vmatpush2.msra.mxu0 %v5716_v47 }
0x145c   :  { %1839 = vmatprep.subr.mxu0 %v5717_v3 }
0x145d   :  { %1840 = vmatpush2.msra.mxu0 %v5718_v43 }
0x145e   :  { %1841 = vmatprep.subr.mxu0 %v5719_v19 }
0x145f   :  { %1842 = vmatpush2.msra.mxu0 %v5720_v49 }
0x1460   :  { %1843 = vmatprep.subr.mxu0 %v5721_v27 }
0x1461   :  { %1844 = vmatpush2.msra.mxu0 %v5722_v57 }
0x1462   :  { %1845 = vmatprep.subr.mxu0 %v5723_v45 }
0x1463   :  { %1846 = vmatpush2.msra.mxu0 %v5724_v56 }
0x1464   :  { %1847 = vmatprep.subr.mxu0 %v5725_v13 }
0x1465   :  { %1848 = vmatpush2.msra.mxu0 %v5726_v12 }
0x1466   :  { %1849 = vmatprep.subr.mxu0 %v5727_v34 }
0x1467   :  { %1850 = vmatpush2.msra.mxu0 %v5728_v58 }
0x1468   :  { %1851 = vmatprep.subr.mxu0 %v5729_v30 }
0x1469   :  { %1852 = vmatpush2.msra.mxu0 %v5730_v32 }
0x146a   :  { %1853 = vmatprep.subr.mxu0 %v5731_v9 }
0x146b   :  { %1854 = vmatpush2.msra.mxu0 %v5732_v63 }
0x146c   :  { %1855 = vmatprep.subr.mxu0 %v5733_v51 }
0x146d   :  { %1856 = vmatpush2.msra.mxu0 %v2793_v29 }
0x146e   :  { %1857 = vmatprep.subr.mxu0 %v2794_v35  ;;  %v2801_v35 = vld [vmem:[%s5048_s1] sm:$0x7f] }
0x146f   :  { %1858 = vmatpush2.msra.mxu0 %v2795_v61 }
0x1470   :  { %1859 = vmatprep.subr.mxu0 %v2796_v25 }
0x1471   :  { %1860 = vmatpush2.msra.mxu0 %v2797_v55 }
0x1472   :  { %1861 = vmatprep.subr.mxu0 %v2798_v42 }
0x1473   :  { %1862 = vmatpush2.msra.mxu0 %v2799_v20 }
0x14f4   :  { %v1658_v39 = vpop.f32.mrf.mxu0 }
0x14f5   :  { %v1659_v31 = vadd.f32 %v4896_v36, %v1658_v39 }
0x14f6   :  { %v2350_v16 = vpop.f32.mrf.mxu0 }
0x14f7   :  { %v1662_v18 = vsel %vm451_vm1, %v1659_v31, -inf }
0x14f8   :  { %1663 = vmax.xlane.f32.xlu0 %v1662_v18  ;;  %v2804_v18 = vld [vmem:[%s5051_s4 + $0x68] sm:$0xff] }
0x1581   :  { %v1664_v44 = vpop.xlane.xlu0 %1663 }
0x1582   :  { %v1665_v5 = vsub.f32 %v1659_v31, %v1664_v44 }
0x1584   :  { %v1666_v48 = vmul.f32 1.442695, %v1665_v5 }
0x1586   :  { %2498 = vpow2.f32 %v1666_v48 }
0x1593   :  { %v2499_v37 = vpop.eup %2498 }
0x1594   :  { %v1668_v1 = vsel %vm451_vm1, %v2499_v37, 0.0 }
0x1595   :  { %1669 = vadd.xlane.f32.xlu1 %v1668_v1 }
0x161e   :  { %v1670_v46 = vpop.xlane.xlu1 %1669 }
0x161f   :  { %2500 = vrcp.f32 %v1670_v46 }
0x1620   :  { %2502 = vlog2.f32 %v1670_v46 }
0x162c   :  { %v2501_v7 = vpop.eup %2500 }
0x162d   :  { %v2503_v2 = vpop.eup %2502  ;;  %v4901_v6 = vmul.f32 %v2501_v7, %v2499_v37 }
0x162e   :  { %v1674_v8 = vmul.f32 0.6931472, %v2503_v2 }
0x162f   :  { %1711 = vst.msk [vmem:[#allocation5 + $0x4] sm:$0x1] %vm451_vm1, %v4901_v6 }
0x1630   :  { %v4908_v47 = vsub.f32 %v1665_v5, %v1674_v8 }
0x1632   :  { %v1677_v3 = vadd.f32 %v1676_v21, %v4908_v47 }
0x1634   :  { %v1678_v43 = vsel %vm451_vm1, %v1677_v3, -inf }
0x1635   :  { %1679 = vmax.xlane.f32.xlu0 %v1678_v43 }
0x16be   :  { %v1680_v19 = vpop.xlane.xlu0 %1679 }
0x16bf   :  { %vm1681_vm2 = vcmp.eq.f32.partialorder %v1677_v3, %v1680_v19 }
0x16c0   :  { %v1682_v49 = vsel %vm1681_vm2, %v3632_v11, 7 }
0x16c1   :  { %v1683_v27 = vsel %vm451_vm1, %v1682_v49, 2147483647 }
0x16c2   :  { %v1685_v57 = vshra.s32 %v1683_v27, 16  ;;  %v1684_v56 = vand.u32 65535, %v1683_v27 }
0x16c4   :  { %v1687_v45 = vcvt.s32.f32 %v1685_v57  ;;  %v1686_v12 = vcvt.s32.f32 %v1684_v56 }
0x16c6   :  { %1688 = vmin.xlane.f32.xlu1 %v1687_v45 }
0x174f   :  { %v1689_v13 = vpop.xlane.xlu1 %1688 }
0x1750   :  { %vm1690_vm3 = vcmp.eq.f32.partialorder %v1687_v45, %v1689_v13  ;;  %v1695_v58 = vcvt.f32.s32 %v1689_v13 }
0x1751   :  { %v1691_v34 = vsel %vm1690_vm3, %v1686_v12, inf }
0x1752   :  { %1692 = vmin.xlane.f32.xlu0 %v1691_v34  ;;  %v1696_v32 = vshll.u32 %v1695_v58, 16 }
0x17db   :  { %v1693_v30 = vpop.xlane.xlu0 %1692 }
0x17dc   :  { %v1694_v9 = vcvt.f32.s32 %v1693_v30 }
0x17de   :  { %v4914_v63 = vadd.s32 %v1696_v32, %v1694_v9 }
0x17e0   :  { %1712 = vst.msk [vmem:[%s5054_s7 + $0x4] sm:$0x1] %vm502_vm4, %v4914_v63  ;;  %v1716_v51 = vrot.slane %v4914_v63, %v3524_v52  ;;  %v2803_v52 = vld [vmem:[%s5051_s4 + $0x70] sm:$0xff]  ;;  %vm1698_vm9 = vcmp.eq.s32.totalorder %v3632_v11, %v4914_v63 }
0x17e2   :  { %vm1717_vm5 = vcmp.eq.s32.totalorder %v3521_v50, %v1716_v51  ;;  %v2802_v50 = vld [vmem:[%s5051_s4 + $0x78] sm:$0xff] }
0x17e3   :  { %v2072_v29 = vsel %vm1717_vm5, 1.0, %v5374_v23 }
0x17e4   :  { %v1720_v61 = vmul.f32 %v2801_v35, %v2072_v29 }
0x17e6   :  { %v1721_v25 = vsel %vm512_vm6, %v1720_v61, 0.0 }
0x17e7   :  { %v1722_v55 = vrot.slane %v1721_v25, 4 }
0x17e9   :  { %v1723_v42 = vadd.f32 %v1722_v55, %v1721_v25 }
0x17eb   :  { %v1724_v20 = vrot.slane %v1723_v42, 2 }
0x17ed   :  { %v1725_v39 = vadd.f32 %v1724_v20, %v1723_v42  ;;  %v5734_v20 = vld [vmem:[#allocation79_spill] sm:$0xff] }
0x17ee   :  { %vm792_vm6 = vcmp.eq.s32.totalorder %v3632_v11, %v5734_v20 }
0x17ef   :  { %v1726_v31 = vrot.slane %v1725_v39, 1 }
0x17f1   :  { %v1727_v16 = vadd.f32 %v1726_v31, %v1725_v39  ;;  %v5735_v31 = vld [vmem:[#allocation13_spill] sm:$0xff] }
0x17f3   :  { %1793 = vmatmul.mubr.f32.vlgmr.msra.gmra.mxu1 %v1727_v16  ;;  %1864 = vmatmul.mubr.f32.vlgmr.msra.gmra.mxu0 %v1727_v16  ;;  %v5736_v16 = vld [vmem:[#allocation14_spill] sm:$0xff] }
0x17f4   :  { %2352 = vmatpush3.msra.mxu1 %v2802_v50  ;;  %2383 = vmatprep.mubr.msk.f32.mxu1 %vm2895_vm0, %v5374_v23  ;;  %v496_v50 = vmul.f32 %v5736_v16, %v5735_v31 }
0x17f5   :  { %2353 = vmatprep.subr.mxu1 %v5374_v23 }
0x17f6   :  { %2354 = vmatpush3.msra.mxu1 %v2803_v52  ;;  %v2065_v52 = vsel %vm792_vm6, 1.0, %v5374_v23 }
0x17f7   :  { %2355 = vmatprep.subr.mxu1 %v5374_v23 }
0x17f8   :  { %2356 = vmatpush3.msra.mxu1 %v2804_v18  ;;  %v5737_v18 = vld [vmem:[#allocation17_spill] sm:$0xff] }
0x17f9   :  { %2357 = vmatprep.subr.mxu1 %v5374_v23  ;;  %vm1094_vm7 = vcmp.eq.s32.totalorder %v3632_v11, %v5737_v18 }
0x17fa   :  { %2358 = vmatpush3.msra.mxu1 %v4359_v24 }
0x17fb   :  { %2359 = vmatprep.subr.mxu1 %v5374_v23 }
0x17fc   :  { %2360 = vmatpush3.msra.mxu1 %v5672_v0 }
0x17fd   :  { %2361 = vmatprep.subr.mxu1 %v5374_v23 }
0x17fe   :  { %2362 = vmatpush3.msra.mxu1 %v5675_v33 }
0x17ff   :  { %2363 = vmatprep.subr.mxu1 %v5374_v23 }
0x1800   :  { %2364 = vmatpush3.msra.mxu1 %v5678_v54 }
0x1801   :  { %2365 = vmatprep.subr.mxu1 %v5374_v23 }
0x1802   :  { %2366 = vmatpush3.msra.mxu1 %v5681_v26 }
0x1803   :  { %2367 = vmatprep.subr.mxu1 %v5374_v23 }
0x1804   :  { %2368 = vmatpush3.msra.mxu1 %v5684_v38 }
0x1805   :  { %2369 = vmatprep.subr.mxu1 %v5374_v23 }
0x1806   :  { %2370 = vmatpush3.msra.mxu1 %v5687_v40 }
0x1807   :  { %2371 = vmatprep.subr.mxu1 %v5374_v23 }
0x1808   :  { %2372 = vmatpush3.msra.mxu1 %v5690_v22 }
0x1809   :  { %2373 = vmatprep.subr.mxu1 %v5374_v23 }
0x180a   :  { %2374 = vmatpush3.msra.mxu1 %v5693_v14 }
0x180b   :  { %2375 = vmatprep.subr.mxu1 %v5374_v23 }
0x180c   :  { %2376 = vmatpush3.msra.mxu1 %v5696_v59 }
0x180d   :  { %2377 = vmatprep.subr.mxu1 %v5374_v23 }
0x180e   :  { %2378 = vmatpush3.msra.mxu1 %v4489_v60 }
0x180f   :  { %2379 = vmatprep.subr.mxu1 %v5374_v23 }
0x1810   :  { %2380 = vmatpush3.msra.mxu1 %v4502_v15 }
0x1811   :  { %2381 = vmatprep.subr.mxu1 %v5374_v23 }
0x1812   :  { %2382 = vmatpush3.msra.mxu1 %v4513_v4 }
0x18b3   :  { %v1794_v24 = vpop.f32.mrf.mxu1  ;;  %v1865_v26 = vpop.f32.mrf.mxu0 }
0x18b4   :  { %v1795_v0 = vadd.f32 %v1794_v24, %v5478_v62  ;;  %v1866_v4 = vadd.f32 %v1865_v26, %v3542_v10  ;;  %v497_v24 = vsel %vm451_vm1, %v496_v50, 0.0 }
0x18b5   :  { %v1796_v33 = vpop.f32.mrf.mxu1  ;;  %v1867_v14 = vpop.f32.mrf.mxu0 }
0x18b6   :  { %v1870_v54 = vsub.f32 0.0, %v1795_v0  ;;  %v1797_v38 = vadd.f32 %v1796_v33, %v5479_v53  ;;  %v1868_v15 = vadd.f32 %v1867_v14, %v5480_v41  ;;  %v5738_v0 = vld [vmem:[#allocation77_spill] sm:$0xff]  ;;  %v5740_v14 = vld [vmem:[#allocation84_spill] sm:$0xff] }
0x18b7   :  { %v795_v33 = vmul.f32 %v2065_v52, %v5738_v0 }
0x18b8   :  { %v1871_v40 = vmul.f32 1.442695, %v1870_v54  ;;  %v1876_v22 = vsub.f32 0.0, %v1797_v38  ;;  %v1883_v59 = vsub.f32 0.0, %v1868_v15  ;;  %v2067_v54 = vsel %vm1094_vm7, 1.0, %v5374_v23  ;;  %v5739_v38 = vld [vmem:[#allocation16_spill] sm:$0xff] }
0x18b9   :  { %v796_v26 = vsel %vm451_vm1, %v795_v33, 0.0 }
0x18ba   :  { %2504 = vpow2.f32 %v1871_v40  ;;  %v1877_v60 = vmul.f32 1.442695, %v1876_v22  ;;  %v1884_v44 = vmul.f32 1.442695, %v1883_v59  ;;  %v1097_v40 = vmul.f32 %v2067_v54, %v5739_v38 }
0x18bb   :  { %v2069_v22 = vsel %vm1396_vm8, 1.0, %v5374_v23  ;;  %v2071_v59 = vsel %vm1698_vm9, 1.0, %v5374_v23 }
0x18bc   :  { %2506 = vpow2.f32 %v1877_v60  ;;  %v1098_v60 = vsel %vm451_vm1, %v1097_v40, 0.0  ;;  %v1399_v15 = vmul.f32 %v2069_v22, %v5740_v14  ;;  %v1701_v17 = vmul.f32 %v2071_v59, %v4908_v47 }
0x18bd   :  { %2508 = vpow2.f32 %v1884_v44 }
0x18be   :  { %v1400_v44 = vsel %vm451_vm1, %v1399_v15, 0.0 }
0x18c7   :  { %v2505_v5 = vpop.eup %2504 }
0x18c8   :  { %v1873_v48 = vadd.f32 1.0, %v2505_v5  ;;  %v1702_v5 = vsel %vm451_vm1, %v1701_v17, 0.0 }
0x18c9   :  { %v2507_v62 = vpop.eup %2506 }
0x18ca   :  { %2510 = vrcp.f32 %v1873_v48  ;;  %v1879_v37 = vadd.f32 1.0, %v2507_v62  ;;  %v2509_v53 = vpop.eup %2508  ;;  %v5741_v48 = vld [vmem:[#allocation15_spill] sm:$0xff] }
0x18cb   :  { %2512 = vtanh.f32 %v1866_v4  ;;  %v1886_v2 = vadd.f32 1.0, %v2509_v53  ;;  %vm488_vm10 = vcmp.eq.s32.totalorder %v3632_v11, %v5741_v48 }
0x18cc   :  { %2514 = vrcp.f32 %v1879_v37  ;;  %v2063_v63 = vsel %vm488_vm10, 1.0, %v5374_v23 }
0x18cd   :  { %2516 = vrcp.f32 %v1886_v2 }
0x18d7   :  { %v2511_v1 = vpop.eup %2510 }
0x18d8   :  { %v2513_v46 = vpop.eup %2512 }
0x18d9   :  { %v2515_v7 = vpop.eup %2514  ;;  %v1890_v8 = vmul.f32 %v2513_v46, %v2511_v1  ;;  %v491_v1 = vmul.f32 %v2063_v63, %v5736_v16 }
0x18da   :  { %v1889_v41 = vmul.f32 %v2515_v7, %v4834_v28  ;;  %v2517_v3 = vpop.eup %2516  ;;  %v5742_v7 = vld [vmem:[#allocation75_spill] sm:$0xff] }
0x18db   :  { %v492_v46 = vsel %vm451_vm1, %v491_v1, 0.0  ;;  %v800_v2 = vmul.f32 %v5738_v0, %v5742_v7 }
0x18dc   :  { %v1891_v21 = vadd.f32 %v1890_v8, %v1889_v41  ;;  %v5743_v41 = vld [vmem:[#allocation86_spill] sm:$0xff] }
0x18dd   :  { %v801_v8 = vsel %vm451_vm1, %v800_v2, 0.0 }
0x18de   :  { %2518 = vtanh.f32 %v1891_v21  ;;  %v1102_v21 = vmul.f32 %v5739_v38, %v5743_v41 }
0x18eb   :  { %v2519_v10 = vpop.eup %2518 }
0x18ec   :  { %v1893_v43 = vmul.f32 %v2519_v10, %v2517_v3  ;;  %v1103_v3 = vsel %vm451_vm1, %v1102_v21, 0.0  ;;  %v5744_v10 = vld [vmem:[#allocation83_spill] sm:$0xff] }
0x18ee   :  { %2384 = vmatmul.mubr.f32.vlgmr.msra.gmra.mxu1 %v1893_v43  ;;  %v1404_v43 = vmul.f32 %v5740_v14, %v5744_v10 }
0x19ae   :  { %v1960_v19 = vpop.f32.mrf.mxu1 }
0x19af   :  { %v1961_v49 = vadd.f32 %v4896_v36, %v1960_v19  ;;  %v1978_v36 = vld [vmem:[%s5047_s0 + $0x5] sm:$0x1]  ;;  %v1405_v19 = vsel %vm451_vm1, %v1404_v43, 0.0 }
0x19b0   :  { %v2385_v27 = vpop.f32.mrf.mxu1 }
0x19b1   :  { %v1964_v57 = vsel %vm451_vm1, %v1961_v49, -inf }
0x19b2   :  { %1965 = vmax.xlane.f32.xlu1 %v1964_v57 }
0x1a3b   :  { %v1966_v45 = vpop.xlane.xlu1 %1965 }
0x1a3c   :  { %v1967_v56 = vsub.f32 %v1961_v49, %v1966_v45  ;;  %v1706_v49 = vmul.f32 %v4908_v47, %v4901_v6 }
0x1a3e   :  { %v1968_v13 = vmul.f32 1.442695, %v1967_v56  ;;  %v1707_v27 = vsel %vm451_vm1, %v1706_v49, 0.0 }
0x1a40   :  { %2520 = vpow2.f32 %v1968_v13 }
0x1a4d   :  { %v2521_v12 = vpop.eup %2520 }
0x1a4e   :  { %v1970_v28 = vsel %vm451_vm1, %v2521_v12, 0.0 }
0x1a4f   :  { %1971 = vadd.xlane.f32.xlu0 %v1970_v28 }
0x1ad8   :  { %v1972_v34 = vpop.xlane.xlu0 %1971 }
0x1ad9   :  { %2522 = vrcp.f32 %v1972_v34 }
0x1ada   :  { %2524 = vlog2.f32 %v1972_v34 }
0x1ae6   :  { %v2523_v58 = vpop.eup %2522 }
0x1ae7   :  { %v2525_v30 = vpop.eup %2524  ;;  %v1974_v32 = vmul.f32 %v2523_v58, %v2521_v12 }
0x1ae8   :  { %v1976_v9 = vmul.f32 0.6931472, %v2525_v30 }
0x1ae9   :  { %2013 = vst.msk [vmem:[#allocation5 + $0x5] sm:$0x1] %vm451_vm1, %v1974_v32 }
0x1aea   :  { %v4980_v51 = vsub.f32 %v1967_v56, %v1976_v9 }
0x1aec   :  { %v1979_v29 = vadd.f32 %v1978_v36, %v4980_v51  ;;  %v2008_v57 = vmul.f32 %v4980_v51, %v1974_v32 }
0x1aee   :  { %v1980_v35 = vsel %vm451_vm1, %v1979_v29, -inf  ;;  %v2009_v45 = vsel %vm451_vm1, %v2008_v57, 0.0 }
0x1aef   :  { %1981 = vmax.xlane.f32.xlu1 %v1980_v35 }
0x1b78   :  { %v1982_v61 = vpop.xlane.xlu1 %1981 }
0x1b79   :  { %vm1983_vm0 = vcmp.eq.f32.partialorder %v1979_v29, %v1982_v61 }
0x1b7a   :  { %v1984_v25 = vsel %vm1983_vm0, %v3632_v11, 7 }
0x1b7b   :  { %v1985_v55 = vsel %vm451_vm1, %v1984_v25, 2147483647 }
0x1b7c   :  { %v1987_v42 = vshra.s32 %v1985_v55, 16  ;;  %v1986_v4 = vand.u32 65535, %v1985_v55 }
0x1b7e   :  { %v1989_v39 = vcvt.s32.f32 %v1987_v42  ;;  %v1988_v37 = vcvt.s32.f32 %v1986_v4 }
0x1b80   :  { %1990 = vmin.xlane.f32.xlu0 %v1989_v39 }
0x1b84   :  { %498 = vadd.xlane.f32.xlu0 %v497_v24 }
0x1b88   :  { %797 = vadd.xlane.f32.xlu0 %v796_v26 }
0x1b8c   :  { %1099 = vadd.xlane.f32.xlu0 %v1098_v60 }
0x1b90   :  { %1401 = vadd.xlane.f32.xlu0 %v1400_v44 }
0x1b94   :  { %1703 = vadd.xlane.f32.xlu0 %v1702_v5 }
0x1c09   :  { %v1991_v62 = vpop.xlane.xlu0 %1990 }
0x1c0a   :  { %vm1992_vm11 = vcmp.eq.f32.partialorder %v1989_v39, %v1991_v62  ;;  %v1997_v56 = vcvt.f32.s32 %v1991_v62 }
0x1c0b   :  { %v1993_v53 = vsel %vm1992_vm11, %v1988_v37, inf }
0x1c0c   :  { %1994 = vmin.xlane.f32.xlu1 %v1993_v53  ;;  %v1998_v12 = vshll.u32 %v1997_v56, 16 }
0x1c0d   :  { %v499_v9 = vpop.xlane.xlu0 %498 }
0x1c0e   :  { %v500_v29 = vsub.f32 0.0, %v499_v9 }
0x1c10   :  { %493 = vadd.xlane.f32.xlu1 %v492_v46 }
0x1c14   :  { %802 = vadd.xlane.f32.xlu1 %v801_v8 }
0x1c18   :  { %1104 = vadd.xlane.f32.xlu1 %v1103_v3 }
0x1c1c   :  { %1406 = vadd.xlane.f32.xlu1 %v1405_v19 }
0x1c20   :  { %1708 = vadd.xlane.f32.xlu1 %v1707_v27 }
0x1c24   :  { %2010 = vadd.xlane.f32.xlu1 %v2009_v45 }
0x1c95   :  { %v1995_v13 = vpop.xlane.xlu1 %1994 }
0x1c96   :  { %v1996_v28 = vcvt.f32.s32 %v1995_v13 }
0x1c98   :  { %v1999_v34 = vadd.s32 %v1998_v12, %v1996_v28 }
0x1c99   :  { %v494_v58 = vpop.xlane.xlu1 %493 }
0x1c9a   :  { %2014 = vst.msk [vmem:[%s5054_s7 + $0x5] sm:$0x1] %vm502_vm4, %v1999_v34  ;;  %vm2000_vm12 = vcmp.eq.s32.totalorder %v3632_v11, %v1999_v34  ;;  %s2023_s7 = sshll.u32 %s2896_s27, 4  ;;  %s2024_s7 = int_to_ptr.vmem [resolvable:$true] %s2023_s7 }
0x1c9b   :  { %v2073_v6 = vsel %vm2000_vm12, 1.0, %v5374_v23  ;;  %s2825_s28 = scalar_lea.vmem %s2024_s7, 128  ;;  %p2830_p6 = scmp.lt.s32.totalorder %s2024_s7, %s2024_s7 }
0x1c9c   :  { %v2003_v47 = vmul.f32 %v2073_v6, %v4980_v51  ;;  %p2826_p5 = scmp.ne.s32.totalorder %s2024_s7, %s2825_s28  ;;  %p2831_p7 = scmp.lt.s32.totalorder %s2825_s28, %s2825_s28 }
0x1c9d   :  { %v803_v30 = vpop.xlane.xlu1 %802 }
0x1c9e   :  { %v2004_v32 = vsel %vm451_vm1, %v2003_v47, 0.0  ;;  %v804_v61 = vsub.f32 %v500_v29, %v803_v30  ;;  %p2832_p8 = por %p2831_p7, %p2830_p6 }
0x1c9f   :  { %2005 = vadd.xlane.f32.xlu0 %v2004_v32 }
0x1ca0   :  { %p2833_p9 = pnand %p2832_p8, %p2826_p5 }
0x1ca1   :  { %v1105_v36 = vpop.xlane.xlu1 %1104 }
0x1ca2   :  { %v1106_v25 = vsub.f32 %v804_v61, %v1105_v36 }
0x1ca5   :  { %v1407_v35 = vpop.xlane.xlu1 %1406 }
0x1ca6   :  { %v1408_v42 = vsub.f32 %v1106_v25, %v1407_v35 }
0x1ca9   :  { %v1709_v55 = vpop.xlane.xlu1 %1708 }
0x1caa   :  { %v1710_v20 = vsub.f32 %v1408_v42, %v1709_v55 }
0x1cad   :  { %v2011_v11 = vpop.xlane.xlu1 %2010 }
0x1cae   :  { %2836 = shalt.err (!%p2833_p9)
}
0x1caf   :  { %2026 = dma.vmem_to_hbm [thread:$0]  %s2024_s7, 128, %s5053_s6, [#allocation4]   ;;  %v2012_v23 = vsub.f32 %v1710_v20, %v2011_v11  ;;  %v798_v51 = vpop.xlane.xlu0 %797 }
0x1cb0   :  { %v799_v31 = vadd.f32 %v798_v51, %v494_v58  ;;  %s2897_s10 = smov [#allocation6]   ;;  %s2898_s12 = smov [#allocation8]  }
0x1cb1   :  { %2016 = vst.msk [vmem:[#allocation8] sm:$0x1] %vm502_vm4, %v2012_v23  ;;  %s2035_s11 = sshll.u32 %s2897_s10, 4  ;;  %s2045_s13 = sshll.u32 %s2898_s12, 4  ;;  %s2036_s11 = int_to_ptr.vmem [resolvable:$true] %s2035_s11  ;;  %s2046_s13 = int_to_ptr.vmem [resolvable:$true] %s2045_s13 }
0x1cb2   :  { %s2845_s6 = scalar_lea.vmem %s2036_s11, 16  ;;  %s2849_s14 = scalar_lea.vmem %s2036_s11, 32 }
0x1cb3   :  { %v1100_v39 = vpop.xlane.xlu0 %1099  ;;  %p2846_p10 = scmp.ne.s32.totalorder %s2036_s11, %s2845_s6  ;;  %p2850_p11 = scmp.lt.s32.totalorder %s2036_s11, %s2036_s11 }
0x1cb4   :  { %v1101_v50 = vadd.f32 %v1100_v39, %v799_v31  ;;  %p2851_p12 = scmp.lt.s32.totalorder %s2849_s14, %s2845_s6 }
0x1cb6   :  { %p2852_p13 = por %p2851_p12, %p2850_p11 }
0x1cb7   :  { %v1402_v16 = vpop.xlane.xlu0 %1401 }
0x1cb8   :  { %v1403_v52 = vadd.f32 %v1402_v16, %v1101_v50  ;;  %p2853_p0 = pnand %p2852_p13, %p2846_p10 }
0x1cbb   :  { %v1704_v18 = vpop.xlane.xlu0 %1703 }
0x1cbc   :  { %v1705_v24 = vadd.f32 %v1704_v18, %v1403_v52 }
0x1d28   :  { %v2006_v0 = vpop.xlane.xlu0 %2005 }
0x1d29   :  { %v2007_v33 = vadd.f32 %v2006_v0, %v1705_v24 }
0x1d2b   :  { %2015 = vst.msk [vmem:[#allocation6] sm:$0x1] %vm502_vm4, %v2007_v33 }
0x1d2c   :  { %2856 = shalt.err (!%p2853_p0)
}
0x1d2d   :  { %2038 = dma.vmem_to_hbm [thread:$0]  %s2036_s11, 16, %s5055_s8, [#allocation7]  }
0x1d2e   :  { %s2865_s5 = scalar_lea.vmem %s2046_s13, 16  ;;  %s2869_s16 = scalar_lea.vmem %s2046_s13, 32 }
0x1d2f   :  { %p2866_p1 = scmp.ne.s32.totalorder %s2046_s13, %s2865_s5  ;;  %p2870_p2 = scmp.lt.s32.totalorder %s2046_s13, %s2046_s13 }
0x1d30   :  { %p2871_p3 = scmp.lt.s32.totalorder %s2869_s16, %s2865_s5 }
0x1d32   :  { %p2872_p4 = por %p2871_p3, %p2870_p2 }
0x1d34   :  { %p2873_p5 = pnand %p2872_p4, %p2866_p1 }
0x1d36   :  { %2876 = shalt.err (!%p2873_p5)
}
0x1d37   :  { %2048 = dma.vmem_to_hbm [thread:$0]  %s2046_s13, 16, %s5056_s9, [#allocation7]  }
0x1d38   :  { %2887 = dma.done.wait [#allocation4], 128  }
0x1d39   :  { %2888 = vsyncadd [#allocation4], 4294967168 }
0x1d3a   :  { %2889 = dma.done.wait [#allocation7], 32  }
0x1d3b   :  { %2890 = vsyncadd [#allocation7], 4294967264 }
0x1d3c   :  { %2060 = vsyncpa [#allocation3], 1 }
0x1d3d   :  { %2061 = vsyncpa [#allocation4], 1 }
0x1d3e   :  { %2062 = vsyncpa [#allocation7], 1 }

</bundles_post_ra>
